<compile_context>
chip_gen: v7x
topology: tpu7x:2x2x1
jax: 0.10.0
libtpu: 0.0.40
codegen_flags: <defaults>
</compile_context>

<pallas_src>
import jax
import jax.numpy as jnp
from jax.experimental import pallas as pl
from jax.experimental.pallas import tpu as pltpu  # noqa: F401  (TPU backend)

FEAT_DIM = 15             # input_proj in_features = 2*FEAT_DIM + 2 = 32
D_IN = 2 * FEAT_DIM + 2
D_MODEL = 128             # TransformerPredictor default d_model
NHEAD = 4
NUM_LAYERS = 2
DIM_FF = 2048             # TransformerEncoderLayer default
LN_EPS = 1e-5
B = 16                    # whole batch handled in one kernel invocation

# Row layout of the packed (N_ROWS, D_MODEL) vector slab.
ROW_B_IN = 0
_PER_LAYER = 7            # bv, bo, g1, be1, b2, g2, be2
ROW_WFC = 1 + _PER_LAYER * NUM_LAYERS
ROW_BFC = ROW_WFC + 1
N_ROWS = ROW_BFC + 1      # 17


def _layernorm(x, gamma, beta):
    mu = jnp.mean(x, axis=-1, keepdims=True)
    var = jnp.mean(jnp.square(x - mu), axis=-1, keepdims=True)
    return (x - mu) * jax.lax.rsqrt(var + LN_EPS) * gamma + beta


def transformer_kernel(x_ref, w_in_ref, wv_ref, wo_ref, w1_ref, w2_ref,
                       b1_ref, vec_ref, out_ref):
    # x: (B, D_IN) f32; weights already transposed to (in, out) and bf16.
    x = x_ref[...]
    b_in = vec_ref[ROW_B_IN:ROW_B_IN + 1, :]                           # (1, 128)

    h = jnp.dot(x.astype(jnp.bfloat16), w_in_ref[...],
                preferred_element_type=jnp.float32) + b_in             # (B, 128)

    for l in range(NUM_LAYERS):                                        # static unroll
        base = 1 + _PER_LAYER * l
        bv  = vec_ref[base + 0:base + 1, :]
        bo  = vec_ref[base + 1:base + 2, :]
        g1  = vec_ref[base + 2:base + 3, :]
        be1 = vec_ref[base + 3:base + 4, :]
        b2  = vec_ref[base + 4:base + 5, :]
        g2  = vec_ref[base + 5:base + 6, :]
        be2 = vec_ref[base + 6:base + 7, :]
        b1  = b1_ref[l:l + 1, :]                                       # (1, DIM_FF)

        # --- self-attention block (seq_len == 1: attn output == out_proj(V)) ---
        v = jnp.dot(h.astype(jnp.bfloat16), wv_ref[l],
                    preferred_element_type=jnp.float32) + bv
        attn = jnp.dot(v.astype(jnp.bfloat16), wo_ref[l],
                       preferred_element_type=jnp.float32) + bo
        h = _layernorm(h + attn, g1, be1)                              # norm1 (post-norm)

        # --- feed-forward block: linear2(relu(linear1(h))) ---
        ff = jnp.dot(h.astype(jnp.bfloat16), w1_ref[l],
                     preferred_element_type=jnp.float32) + b1
        ff = jnp.maximum(ff, 0.0)
        ff = jnp.dot(ff.astype(jnp.bfloat16), w2_ref[l],
                     preferred_element_type=jnp.float32) + b2
        h = _layernorm(h + ff, g2, be2)                                # norm2

    # final fc (128 -> 1): VPU multiply + lane reduce instead of N=1 MXU matmul.
    wfc = vec_ref[ROW_WFC:ROW_WFC + 1, :]                              # (1, 128)
    bfc = vec_ref[ROW_BFC:ROW_BFC + 1, 0:1]                            # (1, 1)
    out_ref[...] = jnp.sum(h * wfc, axis=-1, keepdims=True) + bfc


def init_params(key):
    """Deterministic synthetic parameters with the exact PyTorch shapes (f32)."""
    ks = jax.random.split(key, 10)
    s = 0.02
    w_in = s * jax.random.normal(ks[0], (D_MODEL, D_IN), jnp.float32)
    b_in = s * jax.random.normal(ks[1], (D_MODEL,), jnp.float32)
    # MultiheadAttention packed in_proj (3*d, d); only the V slice matters for seq_len=1.
    in_proj_w = s * jax.random.normal(ks[2], (NUM_LAYERS, 3 * D_MODEL, D_MODEL), jnp.float32)
    in_proj_b = s * jax.random.normal(ks[3], (NUM_LAYERS, 3 * D_MODEL), jnp.float32)
    wv = in_proj_w[:, 2 * D_MODEL:, :]
    bv = in_proj_b[:, 2 * D_MODEL:]
    wo = s * jax.random.normal(ks[4], (NUM_LAYERS, D_MODEL, D_MODEL), jnp.float32)
    bo = s * jax.random.normal(ks[5], (NUM_LAYERS, D_MODEL), jnp.float32)
    w1 = s * jax.random.normal(ks[6], (NUM_LAYERS, DIM_FF, D_MODEL), jnp.float32)
    b1 = s * jax.random.normal(ks[7], (NUM_LAYERS, DIM_FF), jnp.float32)
    w2 = s * jax.random.normal(ks[8], (NUM_LAYERS, D_MODEL, DIM_FF), jnp.float32)
    b2 = s * jax.random.normal(ks[9], (NUM_LAYERS, D_MODEL), jnp.float32)
    g1 = jnp.ones((NUM_LAYERS, D_MODEL), jnp.float32)
    be1 = jnp.zeros((NUM_LAYERS, D_MODEL), jnp.float32)
    g2 = jnp.ones((NUM_LAYERS, D_MODEL), jnp.float32)
    be2 = jnp.zeros((NUM_LAYERS, D_MODEL), jnp.float32)
    wfc = s * jax.random.normal(jax.random.fold_in(key, 99), (1, D_MODEL), jnp.float32)
    bfc = s * jax.random.normal(jax.random.fold_in(key, 100), (1,), jnp.float32)
    return dict(w_in=w_in, b_in=b_in, wv=wv, bv=bv, wo=wo, bo=bo,
                w1=w1, b1=b1, w2=w2, b2=b2, g1=g1, be1=be1, g2=g2, be2=be2,
                wfc=wfc, bfc=bfc)


def pack_params(p):
    """Wrapper-side layout plumbing: transpose weights to (in,out), cast big
    matmul weights to bf16, and pack all d_model-wide vectors into one slab."""
    w_in_t = p["w_in"].T.astype(jnp.bfloat16)                          # (D_IN, D_MODEL)
    wv_t = jnp.transpose(p["wv"], (0, 2, 1)).astype(jnp.bfloat16)      # (L, D_MODEL, D_MODEL)
    wo_t = jnp.transpose(p["wo"], (0, 2, 1)).astype(jnp.bfloat16)      # (L, D_MODEL, D_MODEL)
    w1_t = jnp.transpose(p["w1"], (0, 2, 1)).astype(jnp.bfloat16)      # (L, D_MODEL, DIM_FF)
    w2_t = jnp.transpose(p["w2"], (0, 2, 1)).astype(jnp.bfloat16)      # (L, DIM_FF, D_MODEL)
    b1s = p["b1"].astype(jnp.float32)                                  # (L, DIM_FF)

    row = lambda v: jnp.reshape(v, (1, D_MODEL)).astype(jnp.float32)
    rows = [row(p["b_in"])]
    for l in range(NUM_LAYERS):
        rows += [row(p["bv"][l]), row(p["bo"][l]), row(p["g1"][l]), row(p["be1"][l]),
                 row(p["b2"][l]), row(p["g2"][l]), row(p["be2"][l])]
    rows.append(row(p["wfc"]))
    rows.append(jnp.broadcast_to(p["bfc"].reshape(1, 1), (1, D_MODEL)).astype(jnp.float32))
    vecs = jnp.concatenate(rows, axis=0)                               # (N_ROWS, D_MODEL)
    return w_in_t, wv_t, wo_t, w1_t, w2_t, b1s, vecs


def transformer_predictor(x_curr, x_prev_input, pl_prev, pl_curr, params):
    # Glue: stack + concat, exactly as the PyTorch forward.
    lbls = jnp.stack([pl_prev, pl_curr], axis=1)                       # (B, 2)
    x = jnp.concatenate([x_curr, x_prev_input, lbls], axis=1)          # (B, 2*feat+2)
    x = x.astype(jnp.float32)
    b_total = x.shape[0]

    w_in_t, wv_t, wo_t, w1_t, w2_t, b1s, vecs = pack_params(params)

    out = pl.pallas_call(
        transformer_kernel,
        out_shape=jax.ShapeDtypeStruct((b_total, 1), jnp.float32),
    )(x, w_in_t, wv_t, wo_t, w1_t, w2_t, b1s, vecs)
    return out[:, 0]                                                   # (B,) like .squeeze(1)


def _reference(x_curr, x_prev_input, pl_prev, pl_curr, p):
    """Pure-JAX f32 reference of the same forward (sanity check)."""
    lbls = jnp.stack([pl_prev, pl_curr], axis=1)
    x = jnp.concatenate([x_curr, x_prev_input, lbls], axis=1).astype(jnp.float32)
    h = x @ p["w_in"].T + p["b_in"]
    for l in range(NUM_LAYERS):
        v = h @ p["wv"][l].T + p["bv"][l]
        attn = v @ p["wo"][l].T + p["bo"][l]
        h = _layernorm(h + attn, p["g1"][l], p["be1"][l])
        ff = jnp.maximum(h @ p["w1"][l].T + p["b1"][l], 0.0)
        ff = ff @ p["w2"][l].T + p["b2"][l]
        h = _layernorm(h + ff, p["g2"][l], p["be2"][l])
    return (h @ p["wfc"].T + p["bfc"])[:, 0]


if __name__ == "__main__":
    key = jax.random.PRNGKey(0)
    k1, k2, k3, k4, kp = jax.random.split(key, 5)
    x_curr = jax.random.normal(k1, (B, FEAT_DIM), jnp.float32)
    x_prev_input = jax.random.normal(k2, (B, FEAT_DIM), jnp.float32)
    pl_prev = jax.random.normal(k3, (B,), jnp.float32)
    pl_curr = jax.random.normal(k4, (B,), jnp.float32)
    params = init_params(kp)

    out = transformer_predictor(x_curr, x_prev_input, pl_prev, pl_curr, params)
    out = jax.block_until_ready(out)
    assert out.shape == (B,)

    ref = jax.block_until_ready(_reference(x_curr, x_prev_input, pl_prev, pl_curr, params))
    assert jnp.all(jnp.isfinite(out))
    assert jnp.allclose(out, ref, atol=5e-2, rtol=5e-2)

    print("KERNEL_OK")
</pallas_src>

<mosaic_0001>
module attributes {stable_mosaic.version = 11 : i64} {
  func.func @transformer_kernel(%arg0: memref<16x32xf32, #tpu.memory_space<vmem>>, %arg1: memref<32x128xbf16, #tpu.memory_space<vmem>>, %arg2: memref<2x128x128xbf16, #tpu.memory_space<vmem>>, %arg3: memref<2x128x128xbf16, #tpu.memory_space<vmem>>, %arg4: memref<2x128x2048xbf16, #tpu.memory_space<vmem>>, %arg5: memref<2x2048x128xbf16, #tpu.memory_space<vmem>>, %arg6: memref<2x2048xf32, #tpu.memory_space<vmem>>, %arg7: memref<17x128xf32, #tpu.memory_space<vmem>>, %arg8: memref<16x1xf32, #tpu.memory_space<vmem>>) attributes {dimension_semantics = [], scalar_prefetch = 0 : i64, scratch_operands = 0 : i64, tpu.core_type = #tpu.core_type<tc>} {
    %c0 = arith.constant 0 : index
    %c0_0 = arith.constant 0 : index
    %0 = vector.load %arg0[%c0, %c0_0] : memref<16x32xf32, #tpu.memory_space<vmem>>, vector<16x32xf32>
    %c0_1 = arith.constant 0 : index
    %c0_2 = arith.constant 0 : index
    %1 = vector.load %arg7[%c0_1, %c0_2] : memref<17x128xf32, #tpu.memory_space<vmem>>, vector<1x128xf32>
    %2 = arith.truncf %0 : vector<16x32xf32> to vector<16x32xbf16>
    %c0_3 = arith.constant 0 : index
    %c0_4 = arith.constant 0 : index
    %3 = vector.load %arg1[%c0_3, %c0_4] : memref<32x128xbf16, #tpu.memory_space<vmem>>, vector<32x128xbf16>
    %cst = arith.constant dense<0.000000e+00> : vector<16x128xf32>
    %4 = tpu.matmul %2, %3, %cst {dimension_numbers = #tpu.dot_dimension_numbers<[1], [0], [0], [1], [0, 0, 1, 1], [], []>} : vector<16x32xbf16>, vector<32x128xbf16>, vector<16x128xf32> -> vector<16x128xf32>
    %5 = vector.broadcast %1 : vector<1x128xf32> to vector<16x128xf32>
    %6 = arith.addf %4, %5 : vector<16x128xf32>
    %c1 = arith.constant 1 : index
    %c0_5 = arith.constant 0 : index
    %7 = vector.load %arg7[%c1, %c0_5] : memref<17x128xf32, #tpu.memory_space<vmem>>, vector<1x128xf32>
    %c2 = arith.constant 2 : index
    %c0_6 = arith.constant 0 : index
    %8 = vector.load %arg7[%c2, %c0_6] : memref<17x128xf32, #tpu.memory_space<vmem>>, vector<1x128xf32>
    %c3 = arith.constant 3 : index
    %c0_7 = arith.constant 0 : index
    %9 = vector.load %arg7[%c3, %c0_7] : memref<17x128xf32, #tpu.memory_space<vmem>>, vector<1x128xf32>
    %c4 = arith.constant 4 : index
    %c0_8 = arith.constant 0 : index
    %10 = vector.load %arg7[%c4, %c0_8] : memref<17x128xf32, #tpu.memory_space<vmem>>, vector<1x128xf32>
    %c5 = arith.constant 5 : index
    %c0_9 = arith.constant 0 : index
    %11 = vector.load %arg7[%c5, %c0_9] : memref<17x128xf32, #tpu.memory_space<vmem>>, vector<1x128xf32>
    %c6 = arith.constant 6 : index
    %c0_10 = arith.constant 0 : index
    %12 = vector.load %arg7[%c6, %c0_10] : memref<17x128xf32, #tpu.memory_space<vmem>>, vector<1x128xf32>
    %c7 = arith.constant 7 : index
    %c0_11 = arith.constant 0 : index
    %13 = vector.load %arg7[%c7, %c0_11] : memref<17x128xf32, #tpu.memory_space<vmem>>, vector<1x128xf32>
    %c0_12 = arith.constant 0 : index
    %c0_13 = arith.constant 0 : index
    %14 = vector.load %arg6[%c0_12, %c0_13] : memref<2x2048xf32, #tpu.memory_space<vmem>>, vector<1x2048xf32>
    %15 = arith.truncf %6 : vector<16x128xf32> to vector<16x128xbf16>
    %c0_14 = arith.constant 0 : index
    %c0_15 = arith.constant 0 : index
    %c0_16 = arith.constant 0 : index
    %16 = vector.load %arg2[%c0_14, %c0_15, %c0_16] : memref<2x128x128xbf16, #tpu.memory_space<vmem>>, vector<1x128x128xbf16>
    %17 = vector.shape_cast %16 : vector<1x128x128xbf16> to vector<128x128xbf16>
    %cst_17 = arith.constant dense<0.000000e+00> : vector<16x128xf32>
    %18 = tpu.matmul %15, %17, %cst_17 {dimension_numbers = #tpu.dot_dimension_numbers<[1], [0], [0], [1], [0, 0, 1, 1], [], []>} : vector<16x128xbf16>, vector<128x128xbf16>, vector<16x128xf32> -> vector<16x128xf32>
    %19 = vector.broadcast %7 : vector<1x128xf32> to vector<16x128xf32>
    %20 = arith.addf %18, %19 : vector<16x128xf32>
    %21 = arith.truncf %20 : vector<16x128xf32> to vector<16x128xbf16>
    %c0_18 = arith.constant 0 : index
    %c0_19 = arith.constant 0 : index
    %c0_20 = arith.constant 0 : index
    %22 = vector.load %arg3[%c0_18, %c0_19, %c0_20] : memref<2x128x128xbf16, #tpu.memory_space<vmem>>, vector<1x128x128xbf16>
    %23 = vector.shape_cast %22 : vector<1x128x128xbf16> to vector<128x128xbf16>
    %cst_21 = arith.constant dense<0.000000e+00> : vector<16x128xf32>
    %24 = tpu.matmul %21, %23, %cst_21 {dimension_numbers = #tpu.dot_dimension_numbers<[1], [0], [0], [1], [0, 0, 1, 1], [], []>} : vector<16x128xbf16>, vector<128x128xbf16>, vector<16x128xf32> -> vector<16x128xf32>
    %25 = vector.broadcast %8 : vector<1x128xf32> to vector<16x128xf32>
    %26 = arith.addf %24, %25 : vector<16x128xf32>
    %27 = arith.addf %6, %26 : vector<16x128xf32>
    %cst_22 = arith.constant dense<0.000000e+00> : vector<16xf32>
    %28 = vector.multi_reduction <add>, %27, %cst_22 [1] : vector<16x128xf32> to vector<16xf32>
    %29 = vector.shape_cast %28 : vector<16xf32> to vector<16x1xf32>
    %cst_23 = arith.constant 1.280000e+02 : f32
    %30 = vector.broadcast %cst_23 : f32 to vector<16x1xf32>
    %31 = arith.divf %29, %30 : vector<16x1xf32>
    %32 = vector.broadcast %31 : vector<16x1xf32> to vector<16x128xf32>
    %33 = arith.subf %27, %32 : vector<16x128xf32>
    %34 = arith.mulf %33, %33 : vector<16x128xf32>
    %cst_24 = arith.constant dense<0.000000e+00> : vector<16xf32>
    %35 = vector.multi_reduction <add>, %34, %cst_24 [1] : vector<16x128xf32> to vector<16xf32>
    %36 = vector.shape_cast %35 : vector<16xf32> to vector<16x1xf32>
    %cst_25 = arith.constant 1.280000e+02 : f32
    %37 = vector.broadcast %cst_25 : f32 to vector<16x1xf32>
    %38 = arith.divf %36, %37 : vector<16x1xf32>
    %39 = vector.broadcast %31 : vector<16x1xf32> to vector<16x128xf32>
    %40 = arith.subf %27, %39 : vector<16x128xf32>
    %cst_26 = arith.constant 9.99999974E-6 : f32
    %41 = vector.broadcast %cst_26 : f32 to vector<16x1xf32>
    %42 = arith.addf %38, %41 : vector<16x1xf32>
    %43 = math.rsqrt %42 : vector<16x1xf32>
    %44 = vector.broadcast %43 : vector<16x1xf32> to vector<16x128xf32>
    %45 = arith.mulf %40, %44 : vector<16x128xf32>
    %46 = vector.broadcast %9 : vector<1x128xf32> to vector<16x128xf32>
    %47 = arith.mulf %45, %46 : vector<16x128xf32>
    %48 = vector.broadcast %10 : vector<1x128xf32> to vector<16x128xf32>
    %49 = arith.addf %47, %48 : vector<16x128xf32>
    %50 = arith.truncf %49 : vector<16x128xf32> to vector<16x128xbf16>
    %c0_27 = arith.constant 0 : index
    %c0_28 = arith.constant 0 : index
    %c0_29 = arith.constant 0 : index
    %51 = vector.load %arg4[%c0_27, %c0_28, %c0_29] : memref<2x128x2048xbf16, #tpu.memory_space<vmem>>, vector<1x128x2048xbf16>
    %52 = vector.shape_cast %51 : vector<1x128x2048xbf16> to vector<128x2048xbf16>
    %cst_30 = arith.constant dense<0.000000e+00> : vector<16x2048xf32>
    %53 = tpu.matmul %50, %52, %cst_30 {dimension_numbers = #tpu.dot_dimension_numbers<[1], [0], [0], [1], [0, 0, 1, 1], [], []>} : vector<16x128xbf16>, vector<128x2048xbf16>, vector<16x2048xf32> -> vector<16x2048xf32>
    %54 = vector.broadcast %14 : vector<1x2048xf32> to vector<16x2048xf32>
    %55 = arith.addf %53, %54 : vector<16x2048xf32>
    %cst_31 = arith.constant 0.000000e+00 : f32
    %56 = vector.broadcast %cst_31 : f32 to vector<16x2048xf32>
    %57 = arith.maximumf %55, %56 : vector<16x2048xf32>
    %58 = arith.truncf %57 : vector<16x2048xf32> to vector<16x2048xbf16>
    %c0_32 = arith.constant 0 : index
    %c0_33 = arith.constant 0 : index
    %c0_34 = arith.constant 0 : index
    %59 = vector.load %arg5[%c0_32, %c0_33, %c0_34] : memref<2x2048x128xbf16, #tpu.memory_space<vmem>>, vector<1x2048x128xbf16>
    %60 = vector.shape_cast %59 : vector<1x2048x128xbf16> to vector<2048x128xbf16>
    %cst_35 = arith.constant dense<0.000000e+00> : vector<16x128xf32>
    %61 = tpu.matmul %58, %60, %cst_35 {dimension_numbers = #tpu.dot_dimension_numbers<[1], [0], [0], [1], [0, 0, 1, 1], [], []>} : vector<16x2048xbf16>, vector<2048x128xbf16>, vector<16x128xf32> -> vector<16x128xf32>
    %62 = vector.broadcast %11 : vector<1x128xf32> to vector<16x128xf32>
    %63 = arith.addf %61, %62 : vector<16x128xf32>
    %64 = arith.addf %49, %63 : vector<16x128xf32>
    %cst_36 = arith.constant dense<0.000000e+00> : vector<16xf32>
    %65 = vector.multi_reduction <add>, %64, %cst_36 [1] : vector<16x128xf32> to vector<16xf32>
    %66 = vector.shape_cast %65 : vector<16xf32> to vector<16x1xf32>
    %cst_37 = arith.constant 1.280000e+02 : f32
    %67 = vector.broadcast %cst_37 : f32 to vector<16x1xf32>
    %68 = arith.divf %66, %67 : vector<16x1xf32>
    %69 = vector.broadcast %68 : vector<16x1xf32> to vector<16x128xf32>
    %70 = arith.subf %64, %69 : vector<16x128xf32>
    %71 = arith.mulf %70, %70 : vector<16x128xf32>
    %cst_38 = arith.constant dense<0.000000e+00> : vector<16xf32>
    %72 = vector.multi_reduction <add>, %71, %cst_38 [1] : vector<16x128xf32> to vector<16xf32>
    %73 = vector.shape_cast %72 : vector<16xf32> to vector<16x1xf32>
    %cst_39 = arith.constant 1.280000e+02 : f32
    %74 = vector.broadcast %cst_39 : f32 to vector<16x1xf32>
    %75 = arith.divf %73, %74 : vector<16x1xf32>
    %76 = vector.broadcast %68 : vector<16x1xf32> to vector<16x128xf32>
    %77 = arith.subf %64, %76 : vector<16x128xf32>
    %cst_40 = arith.constant 9.99999974E-6 : f32
    %78 = vector.broadcast %cst_40 : f32 to vector<16x1xf32>
    %79 = arith.addf %75, %78 : vector<16x1xf32>
    %80 = math.rsqrt %79 : vector<16x1xf32>
    %81 = vector.broadcast %80 : vector<16x1xf32> to vector<16x128xf32>
    %82 = arith.mulf %77, %81 : vector<16x128xf32>
    %83 = vector.broadcast %12 : vector<1x128xf32> to vector<16x128xf32>
    %84 = arith.mulf %82, %83 : vector<16x128xf32>
    %85 = vector.broadcast %13 : vector<1x128xf32> to vector<16x128xf32>
    %86 = arith.addf %84, %85 : vector<16x128xf32>
    %c8 = arith.constant 8 : index
    %c0_41 = arith.constant 0 : index
    %87 = vector.load %arg7[%c8, %c0_41] : memref<17x128xf32, #tpu.memory_space<vmem>>, vector<1x128xf32>
    %c9 = arith.constant 9 : index
    %c0_42 = arith.constant 0 : index
    %88 = vector.load %arg7[%c9, %c0_42] : memref<17x128xf32, #tpu.memory_space<vmem>>, vector<1x128xf32>
    %c10 = arith.constant 10 : index
    %c0_43 = arith.constant 0 : index
    %89 = vector.load %arg7[%c10, %c0_43] : memref<17x128xf32, #tpu.memory_space<vmem>>, vector<1x128xf32>
    %c11 = arith.constant 11 : index
    %c0_44 = arith.constant 0 : index
    %90 = vector.load %arg7[%c11, %c0_44] : memref<17x128xf32, #tpu.memory_space<vmem>>, vector<1x128xf32>
    %c12 = arith.constant 12 : index
    %c0_45 = arith.constant 0 : index
    %91 = vector.load %arg7[%c12, %c0_45] : memref<17x128xf32, #tpu.memory_space<vmem>>, vector<1x128xf32>
    %c13 = arith.constant 13 : index
    %c0_46 = arith.constant 0 : index
    %92 = vector.load %arg7[%c13, %c0_46] : memref<17x128xf32, #tpu.memory_space<vmem>>, vector<1x128xf32>
    %c14 = arith.constant 14 : index
    %c0_47 = arith.constant 0 : index
    %93 = vector.load %arg7[%c14, %c0_47] : memref<17x128xf32, #tpu.memory_space<vmem>>, vector<1x128xf32>
    %c1_48 = arith.constant 1 : index
    %c0_49 = arith.constant 0 : index
    %94 = vector.load %arg6[%c1_48, %c0_49] : memref<2x2048xf32, #tpu.memory_space<vmem>>, vector<1x2048xf32>
    %95 = arith.truncf %86 : vector<16x128xf32> to vector<16x128xbf16>
    %c1_50 = arith.constant 1 : index
    %c0_51 = arith.constant 0 : index
    %c0_52 = arith.constant 0 : index
    %96 = vector.load %arg2[%c1_50, %c0_51, %c0_52] : memref<2x128x128xbf16, #tpu.memory_space<vmem>>, vector<1x128x128xbf16>
    %97 = vector.shape_cast %96 : vector<1x128x128xbf16> to vector<128x128xbf16>
    %cst_53 = arith.constant dense<0.000000e+00> : vector<16x128xf32>
    %98 = tpu.matmul %95, %97, %cst_53 {dimension_numbers = #tpu.dot_dimension_numbers<[1], [0], [0], [1], [0, 0, 1, 1], [], []>} : vector<16x128xbf16>, vector<128x128xbf16>, vector<16x128xf32> -> vector<16x128xf32>
    %99 = vector.broadcast %87 : vector<1x128xf32> to vector<16x128xf32>
    %100 = arith.addf %98, %99 : vector<16x128xf32>
    %101 = arith.truncf %100 : vector<16x128xf32> to vector<16x128xbf16>
    %c1_54 = arith.constant 1 : index
    %c0_55 = arith.constant 0 : index
    %c0_56 = arith.constant 0 : index
    %102 = vector.load %arg3[%c1_54, %c0_55, %c0_56] : memref<2x128x128xbf16, #tpu.memory_space<vmem>>, vector<1x128x128xbf16>
    %103 = vector.shape_cast %102 : vector<1x128x128xbf16> to vector<128x128xbf16>
    %cst_57 = arith.constant dense<0.000000e+00> : vector<16x128xf32>
    %104 = tpu.matmul %101, %103, %cst_57 {dimension_numbers = #tpu.dot_dimension_numbers<[1], [0], [0], [1], [0, 0, 1, 1], [], []>} : vector<16x128xbf16>, vector<128x128xbf16>, vector<16x128xf32> -> vector<16x128xf32>
    %105 = vector.broadcast %88 : vector<1x128xf32> to vector<16x128xf32>
    %106 = arith.addf %104, %105 : vector<16x128xf32>
    %107 = arith.addf %86, %106 : vector<16x128xf32>
    %cst_58 = arith.constant dense<0.000000e+00> : vector<16xf32>
    %108 = vector.multi_reduction <add>, %107, %cst_58 [1] : vector<16x128xf32> to vector<16xf32>
    %109 = vector.shape_cast %108 : vector<16xf32> to vector<16x1xf32>
    %cst_59 = arith.constant 1.280000e+02 : f32
    %110 = vector.broadcast %cst_59 : f32 to vector<16x1xf32>
    %111 = arith.divf %109, %110 : vector<16x1xf32>
    %112 = vector.broadcast %111 : vector<16x1xf32> to vector<16x128xf32>
    %113 = arith.subf %107, %112 : vector<16x128xf32>
    %114 = arith.mulf %113, %113 : vector<16x128xf32>
    %cst_60 = arith.constant dense<0.000000e+00> : vector<16xf32>
    %115 = vector.multi_reduction <add>, %114, %cst_60 [1] : vector<16x128xf32> to vector<16xf32>
    %116 = vector.shape_cast %115 : vector<16xf32> to vector<16x1xf32>
    %cst_61 = arith.constant 1.280000e+02 : f32
    %117 = vector.broadcast %cst_61 : f32 to vector<16x1xf32>
    %118 = arith.divf %116, %117 : vector<16x1xf32>
    %119 = vector.broadcast %111 : vector<16x1xf32> to vector<16x128xf32>
    %120 = arith.subf %107, %119 : vector<16x128xf32>
    %cst_62 = arith.constant 9.99999974E-6 : f32
    %121 = vector.broadcast %cst_62 : f32 to vector<16x1xf32>
    %122 = arith.addf %118, %121 : vector<16x1xf32>
    %123 = math.rsqrt %122 : vector<16x1xf32>
    %124 = vector.broadcast %123 : vector<16x1xf32> to vector<16x128xf32>
    %125 = arith.mulf %120, %124 : vector<16x128xf32>
    %126 = vector.broadcast %89 : vector<1x128xf32> to vector<16x128xf32>
    %127 = arith.mulf %125, %126 : vector<16x128xf32>
    %128 = vector.broadcast %90 : vector<1x128xf32> to vector<16x128xf32>
    %129 = arith.addf %127, %128 : vector<16x128xf32>
    %130 = arith.truncf %129 : vector<16x128xf32> to vector<16x128xbf16>
    %c1_63 = arith.constant 1 : index
    %c0_64 = arith.constant 0 : index
    %c0_65 = arith.constant 0 : index
    %131 = vector.load %arg4[%c1_63, %c0_64, %c0_65] : memref<2x128x2048xbf16, #tpu.memory_space<vmem>>, vector<1x128x2048xbf16>
    %132 = vector.shape_cast %131 : vector<1x128x2048xbf16> to vector<128x2048xbf16>
    %cst_66 = arith.constant dense<0.000000e+00> : vector<16x2048xf32>
    %133 = tpu.matmul %130, %132, %cst_66 {dimension_numbers = #tpu.dot_dimension_numbers<[1], [0], [0], [1], [0, 0, 1, 1], [], []>} : vector<16x128xbf16>, vector<128x2048xbf16>, vector<16x2048xf32> -> vector<16x2048xf32>
    %134 = vector.broadcast %94 : vector<1x2048xf32> to vector<16x2048xf32>
    %135 = arith.addf %133, %134 : vector<16x2048xf32>
    %cst_67 = arith.constant 0.000000e+00 : f32
    %136 = vector.broadcast %cst_67 : f32 to vector<16x2048xf32>
    %137 = arith.maximumf %135, %136 : vector<16x2048xf32>
    %138 = arith.truncf %137 : vector<16x2048xf32> to vector<16x2048xbf16>
    %c1_68 = arith.constant 1 : index
    %c0_69 = arith.constant 0 : index
    %c0_70 = arith.constant 0 : index
    %139 = vector.load %arg5[%c1_68, %c0_69, %c0_70] : memref<2x2048x128xbf16, #tpu.memory_space<vmem>>, vector<1x2048x128xbf16>
    %140 = vector.shape_cast %139 : vector<1x2048x128xbf16> to vector<2048x128xbf16>
    %cst_71 = arith.constant dense<0.000000e+00> : vector<16x128xf32>
    %141 = tpu.matmul %138, %140, %cst_71 {dimension_numbers = #tpu.dot_dimension_numbers<[1], [0], [0], [1], [0, 0, 1, 1], [], []>} : vector<16x2048xbf16>, vector<2048x128xbf16>, vector<16x128xf32> -> vector<16x128xf32>
    %142 = vector.broadcast %91 : vector<1x128xf32> to vector<16x128xf32>
    %143 = arith.addf %141, %142 : vector<16x128xf32>
    %144 = arith.addf %129, %143 : vector<16x128xf32>
    %cst_72 = arith.constant dense<0.000000e+00> : vector<16xf32>
    %145 = vector.multi_reduction <add>, %144, %cst_72 [1] : vector<16x128xf32> to vector<16xf32>
    %146 = vector.shape_cast %145 : vector<16xf32> to vector<16x1xf32>
    %cst_73 = arith.constant 1.280000e+02 : f32
    %147 = vector.broadcast %cst_73 : f32 to vector<16x1xf32>
    %148 = arith.divf %146, %147 : vector<16x1xf32>
    %149 = vector.broadcast %148 : vector<16x1xf32> to vector<16x128xf32>
    %150 = arith.subf %144, %149 : vector<16x128xf32>
    %151 = arith.mulf %150, %150 : vector<16x128xf32>
    %cst_74 = arith.constant dense<0.000000e+00> : vector<16xf32>
    %152 = vector.multi_reduction <add>, %151, %cst_74 [1] : vector<16x128xf32> to vector<16xf32>
    %153 = vector.shape_cast %152 : vector<16xf32> to vector<16x1xf32>
    %cst_75 = arith.constant 1.280000e+02 : f32
    %154 = vector.broadcast %cst_75 : f32 to vector<16x1xf32>
    %155 = arith.divf %153, %154 : vector<16x1xf32>
    %156 = vector.broadcast %148 : vector<16x1xf32> to vector<16x128xf32>
    %157 = arith.subf %144, %156 : vector<16x128xf32>
    %cst_76 = arith.constant 9.99999974E-6 : f32
    %158 = vector.broadcast %cst_76 : f32 to vector<16x1xf32>
    %159 = arith.addf %155, %158 : vector<16x1xf32>
    %160 = math.rsqrt %159 : vector<16x1xf32>
    %161 = vector.broadcast %160 : vector<16x1xf32> to vector<16x128xf32>
    %162 = arith.mulf %157, %161 : vector<16x128xf32>
    %163 = vector.broadcast %92 : vector<1x128xf32> to vector<16x128xf32>
    %164 = arith.mulf %162, %163 : vector<16x128xf32>
    %165 = vector.broadcast %93 : vector<1x128xf32> to vector<16x128xf32>
    %166 = arith.addf %164, %165 : vector<16x128xf32>
    %c15 = arith.constant 15 : index
    %c0_77 = arith.constant 0 : index
    %167 = vector.load %arg7[%c15, %c0_77] : memref<17x128xf32, #tpu.memory_space<vmem>>, vector<1x128xf32>
    %c16 = arith.constant 16 : index
    %c0_78 = arith.constant 0 : index
    %168 = vector.load %arg7[%c16, %c0_78] : memref<17x128xf32, #tpu.memory_space<vmem>>, vector<1x1xf32>
    %169 = vector.broadcast %167 : vector<1x128xf32> to vector<16x128xf32>
    %170 = arith.mulf %166, %169 : vector<16x128xf32>
    %cst_79 = arith.constant dense<0.000000e+00> : vector<16xf32>
    %171 = vector.multi_reduction <add>, %170, %cst_79 [1] : vector<16x128xf32> to vector<16xf32>
    %172 = vector.shape_cast %171 : vector<16xf32> to vector<16x1xf32>
    %173 = vector.broadcast %168 : vector<1x1xf32> to vector<16x1xf32>
    %174 = arith.addf %172, %173 : vector<16x1xf32>
    %c0_80 = arith.constant 0 : index
    %c0_81 = arith.constant 0 : index
    %175 = vector.load %arg8[%c0_80, %c0_81] : memref<16x1xf32, #tpu.memory_space<vmem>>, vector<16x1xf32>
    tpu.vector_store %arg8[%c0_80, %c0_81], %174 {strides = array<i32>} : memref<16x1xf32, #tpu.memory_space<vmem>>, vector<16x1xf32>,
    return
  }
}

</mosaic_0001>

<bundles_post_ra>
// kernel: tpu_custom_call.1
= control target key start
LH: loop header
LB: loop body
LE: loop exit
PB: predicated region body
PF: predicated region fallthrough
CT: control target
= control target key end

     0   :  { %13 = vsyncpa [#allocation3], 0  ;;  %s7990_s0 = inlined_call_operand.hbm [shape: f32[16,32], index: 0, kind: input, shape index: {}]   ;;  %s7991_s1 = inlined_call_operand.hbm [shape: bf16[32,128], index: 1, kind: input, shape index: {}]   ;;  %s7992_s2 = inlined_call_operand.hbm [shape: bf16[2,128,128], index: 2, kind: input, shape index: {}]   ;;  %s7993_s3 = inlined_call_operand.hbm [shape: bf16[2,128,128], index: 3, kind: input, shape index: {}]   ;;  %s7994_s4 = inlined_call_operand.hbm [shape: bf16[2,128,2048], index: 4, kind: input, shape index: {}]   ;;  %s7995_s5 = inlined_call_operand.hbm [shape: bf16[2,2048,128], index: 5, kind: input, shape index: {}]   ;;  %s7996_s6 = inlined_call_operand.hbm [shape: f32[2,2048], index: 6, kind: input, shape index: {}]   ;;  %s7997_s7 = inlined_call_operand.vmem [shape: f32[17,128], index: 7, kind: input, shape index: {}]   ;;  %s7998_s8 = inlined_call_operand.vmem [shape: f32[16,1], index: 8, kind: output, shape index: {}]  }
   0x1   :  { %14 = vsyncpa [#allocation5], 0 }
   0x2   :  { %15 = vsyncpa [#allocation8], 0 }
   0x3   :  { %16 = vsyncpa [#allocation11], 0  ;;  %s7555_s27 = smov [#allocation4]   ;;  %s7393_s9 = scalar_lea.hbm %s7991_s1, 256 }
   0x4   :  { %s34_s28 = sshll.u32 %s7555_s27, 4  ;;  %p7394_p0 = scmp.ne.s32.totalorder %s7991_s1, %s7393_s9  ;;  %s35_s28 = int_to_ptr.vmem [resolvable:$true] %s34_s28 }
   0x5   :  { %p7397_p1 = scmp.lt.u32.totalorder %s7393_s9, %s7991_s1 }
   0x7   :  { %p7399_p2 = pnand %p7397_p1, %p7394_p0 }
   0x9   :  { %7402 = shalt.err (!%p7399_p2)
}
   0xa   :  { %s7403_s14 = scalar_lea.vmem %s35_s28, 256  ;;  %p7408_p4 = scmp.lt.s32.totalorder %s35_s28, %s35_s28 }
   0xb   :  { %p7404_p3 = scmp.ne.s32.totalorder %s35_s28, %s7403_s14  ;;  %p7409_p5 = scmp.lt.s32.totalorder %s7403_s14, %s7403_s14 }
   0xd   :  { %p7410_p6 = por %p7409_p5, %p7408_p4 }
   0xf   :  { %p7411_p7 = pnand %p7410_p6, %p7404_p3 }
  0x11   :  { %7414 = shalt.err (!%p7411_p7)
}
  0x12   :  { %s7556_s15 = smov 64   ;;  %s7557_s16 = smov 4  }
  0x13   :  { %40 = dma.hbm_to_vmem [thread:$0]  %s7991_s1, 256, %s35_s28, [#allocation5], %s7556_s15, %s7556_s15, %s7557_s16  }
  0x14   :  { %s7558_s19 = smov [#allocation7]   ;;  %s7559_s21 = smov [#allocation10]  }
  0x15   :  { %s58_s20 = sshll.u32 %s7558_s19, 4  ;;  %s82_s22 = sshll.u32 %s7559_s21, 4  ;;  %s59_s20 = int_to_ptr.vmem [resolvable:$true] %s58_s20  ;;  %s83_s22 = int_to_ptr.vmem [resolvable:$true] %s82_s22 }
  0x16   :  { %s7415_s25 = scalar_lea.hbm %s7993_s3, 2048 }
  0x17   :  { %p7416_p8 = scmp.ne.s32.totalorder %s7993_s3, %s7415_s25  ;;  %p7419_p9 = scmp.lt.u32.totalorder %s7415_s25, %s7993_s3 }
  0x19   :  { %p7421_p10 = pnand %p7419_p9, %p7416_p8 }
  0x1b   :  { %7424 = shalt.err (!%p7421_p10)
}
  0x1c   :  { %s7425_s1 = scalar_lea.vmem %s59_s20, 2048  ;;  %p7430_p12 = scmp.lt.s32.totalorder %s59_s20, %s59_s20 }
  0x1d   :  { %p7426_p11 = scmp.ne.s32.totalorder %s59_s20, %s7425_s1  ;;  %p7431_p13 = scmp.lt.s32.totalorder %s7425_s1, %s7425_s1 }
  0x1f   :  { %p7432_p0 = por %p7431_p13, %p7430_p12 }
  0x21   :  { %p7433_p1 = pnand %p7432_p0, %p7426_p11 }
  0x23   :  { %7436 = shalt.err (!%p7433_p1)
}
  0x24   :  { %64 = dma.hbm_to_vmem [thread:$0]  %s7993_s3, 2048, %s59_s20, [#allocation8], %s7556_s15, %s7556_s15, %s7557_s16  }
  0x25   :  { %s7437_s12 = scalar_lea.hbm %s7995_s5, 32768 }
  0x26   :  { %p7438_p2 = scmp.ne.s32.totalorder %s7995_s5, %s7437_s12  ;;  %p7441_p3 = scmp.lt.u32.totalorder %s7437_s12, %s7995_s5 }
  0x28   :  { %p7443_p4 = pnand %p7441_p3, %p7438_p2 }
  0x2a   :  { %7446 = shalt.err (!%p7443_p4)
}
  0x2b   :  { %s7447_s19 = scalar_lea.vmem %s83_s22, 32768  ;;  %p7452_p6 = scmp.lt.s32.totalorder %s83_s22, %s83_s22 }
  0x2c   :  { %p7448_p5 = scmp.ne.s32.totalorder %s83_s22, %s7447_s19  ;;  %p7453_p7 = scmp.lt.s32.totalorder %s7447_s19, %s7447_s19 }
  0x2e   :  { %p7454_p8 = por %p7453_p7, %p7452_p6 }
  0x30   :  { %p7455_p9 = pnand %p7454_p8, %p7448_p5 }
  0x32   :  { %7458 = shalt.err (!%p7455_p9)
}
  0x33   :  { %88 = dma.hbm_to_vmem [thread:$0]  %s7995_s5, 32768, %s83_s22, [#allocation11], %s7556_s15, %s7556_s15, %s7557_s16  }
  0x34   :  { %s7560_s21 = smov [#allocation2]   ;;  %s7459_s26 = scalar_lea.hbm %s7990_s0, 256 }
  0x35   :  { %s22_s23 = sshll.u32 %s7560_s21, 4  ;;  %p7460_p10 = scmp.ne.s32.totalorder %s7990_s0, %s7459_s26  ;;  %s23_s23 = int_to_ptr.vmem [resolvable:$true] %s22_s23 }
  0x36   :  { %p7463_p11 = scmp.lt.u32.totalorder %s7459_s26, %s7990_s0 }
  0x38   :  { %p7465_p12 = pnand %p7463_p11, %p7460_p10 }
  0x3a   :  { %7468 = shalt.err (!%p7465_p12)
}
  0x3b   :  { %s7469_s28 = scalar_lea.vmem %s23_s23, 256  ;;  %p7474_p0 = scmp.lt.s32.totalorder %s23_s23, %s23_s23 }
  0x3c   :  { %p7470_p13 = scmp.ne.s32.totalorder %s23_s23, %s7469_s28  ;;  %p7475_p1 = scmp.lt.s32.totalorder %s7469_s28, %s7469_s28 }
  0x3e   :  { %p7476_p2 = por %p7475_p1, %p7474_p0 }
  0x40   :  { %p7477_p3 = pnand %p7476_p2, %p7470_p13 }
  0x42   :  { %7480 = shalt.err (!%p7477_p3)
}
  0x43   :  { %s7561_s5 = smov 128   ;;  %s7562_s22 = smov 8  }
  0x44   :  { %28 = dma.hbm_to_vmem [thread:$0]  %s7990_s0, 256, %s23_s23, [#allocation3], %s7561_s5, %s7561_s5, %s7562_s22  }
  0x45   :  { %s7563_s11 = smov [#allocation6]   ;;  %s7564_s13 = smov [#allocation9]  }
  0x46   :  { %s46_s12 = sshll.u32 %s7563_s11, 4  ;;  %s70_s14 = sshll.u32 %s7564_s13, 4  ;;  %s47_s12 = int_to_ptr.vmem [resolvable:$true] %s46_s12  ;;  %s7672_s14 = int_to_ptr.vmem [resolvable:$true] %s70_s14 }
  0x47   :  { %s7481_s19 = scalar_lea.hbm %s7992_s2, 2048 }
  0x48   :  { %p7482_p4 = scmp.ne.s32.totalorder %s7992_s2, %s7481_s19  ;;  %p7485_p5 = scmp.lt.u32.totalorder %s7481_s19, %s7992_s2 }
  0x4a   :  { %p7487_p6 = pnand %p7485_p5, %p7482_p4 }
  0x4c   :  { %7490 = shalt.err (!%p7487_p6)
}
  0x4d   :  { %s7491_s0 = scalar_lea.vmem %s47_s12, 2048  ;;  %p7496_p8 = scmp.lt.s32.totalorder %s47_s12, %s47_s12 }
  0x4e   :  { %p7492_p7 = scmp.ne.s32.totalorder %s47_s12, %s7491_s0  ;;  %p7497_p9 = scmp.lt.s32.totalorder %s7491_s0, %s7491_s0 }
  0x50   :  { %p7498_p10 = por %p7497_p9, %p7496_p8 }
  0x52   :  { %p7499_p11 = pnand %p7498_p10, %p7492_p7 }
  0x54   :  { %7502 = shalt.err (!%p7499_p11)
}
  0x55   :  { %52 = dma.hbm_to_vmem [thread:$0]  %s7992_s2, 2048, %s47_s12, [#allocation5], %s7556_s15, %s7556_s15, %s7557_s16  }
  0x56   :  { %s7503_s29 = scalar_lea.hbm %s7994_s4, 32768 }
  0x57   :  { %p7504_p12 = scmp.ne.s32.totalorder %s7994_s4, %s7503_s29  ;;  %p7507_p13 = scmp.lt.u32.totalorder %s7503_s29, %s7994_s4 }
  0x59   :  { %p7509_p0 = pnand %p7507_p13, %p7504_p12 }
  0x5b   :  { %7512 = shalt.err (!%p7509_p0)
}
  0x5c   :  { %s7513_s22 = scalar_lea.vmem %s7672_s14, 32768  ;;  %p7518_p2 = scmp.lt.s32.totalorder %s7672_s14, %s7672_s14 }
  0x5d   :  { %p7514_p1 = scmp.ne.s32.totalorder %s7672_s14, %s7513_s22  ;;  %p7519_p3 = scmp.lt.s32.totalorder %s7513_s22, %s7513_s22 }
  0x5f   :  { %p7520_p4 = por %p7519_p3, %p7518_p2 }
  0x61   :  { %p7521_p5 = pnand %p7520_p4, %p7514_p1 }
  0x63   :  { %7524 = shalt.err (!%p7521_p5)
}
  0x64   :  { %s7565_s2 = smov 1024   ;;  %s7566_s10 = smov [#allocation12]  }
  0x65   :  { %76 = dma.hbm_to_vmem [thread:$0]  %s7994_s4, 32768, %s7672_s14, [#allocation8], %s7565_s2, %s7565_s2, %s7556_s15  }
  0x66   :  { %s95_s11 = sshll.u32 %s7566_s10, 4  ;;  %s7525_s17 = scalar_lea.hbm %s7996_s6, 512  ;;  %s96_s11 = int_to_ptr.vmem [resolvable:$true] %s95_s11 }
  0x67   :  { %p7526_p6 = scmp.ne.s32.totalorder %s7996_s6, %s7525_s17  ;;  %p7529_p7 = scmp.lt.u32.totalorder %s7525_s17, %s7996_s6 }
  0x69   :  { %p7531_p8 = pnand %p7529_p7, %p7526_p6 }
  0x6b   :  { %7534 = shalt.err (!%p7531_p8)
}
  0x6c   :  { %s7535_s21 = scalar_lea.vmem %s96_s11, 512  ;;  %p7540_p10 = scmp.lt.s32.totalorder %s96_s11, %s96_s11 }
  0x6d   :  { %p7536_p9 = scmp.ne.s32.totalorder %s96_s11, %s7535_s21  ;;  %p7541_p11 = scmp.lt.s32.totalorder %s7535_s21, %s7535_s21 }
  0x6f   :  { %p7542_p12 = por %p7541_p11, %p7540_p10 }
  0x71   :  { %p7543_p13 = pnand %p7542_p12, %p7536_p9 }
  0x73   :  { %7546 = shalt.err (!%p7543_p13)
}
  0x74   :  { %98 = dma.hbm_to_vmem [thread:$0]  %s7996_s6, 512, %s96_s11, [#allocation11]  }
  0x75   :  { %7547 = dma.done.wait [#allocation3], 256  }
  0x76   :  { %7548 = vsyncadd [#allocation3], 4294967040 }
  0x77   :  { %7549 = dma.done.wait [#allocation5], 2304  }
  0x78   :  { %7550 = vsyncadd [#allocation5], 4294964992 }
  0x79   :  { %7551 = dma.done.wait [#allocation8], 34816  }
  0x7a   :  { %7552 = vsyncadd [#allocation8], 4294932480 }
  0x7b   :  { %7553 = dma.done.wait [#allocation11], 33280  }
  0x7c   :  { %7554 = vsyncadd [#allocation11], 4294934016  ;;  %v7567_v0 = vmov 0.0   ;;  %vm7568_vm0 = vmmov 0   ;;  %v7087_v1 = vld [vmem:[#allocation4] sm:$0xff]   ;;  %v7088_v2 = vld [vmem:[#allocation4 + $0x8] sm:$0xff]  }
  0x7d   :  { %6984 = vmatprep.subr.bf16.mxu0 %v7567_v0  ;;  %6988 = vmatprep.mubr.msk.bf16.mxu0 %vm7568_vm0, %v7567_v0  ;;  %v123_v3 = vld [vmem:[#allocation2] sm:$0xff]  ;;  %v124_v4 = vld [vmem:[#allocation2 + $0x8] sm:$0xff]  ;;  %vm147_vm1 = vcmask 261120   ;;  %v7091_v8 = vld [vmem:[#allocation6 + $0x10] sm:$0xff]   ;;  %vm6018_vm2 = vcmask 7168  }
  0x7e   :  { %6992 = vmatprep.subr.bf16.mxu1 %v7567_v0  ;;  %7008 = vmatprep.mubr.msk.bf16.mxu1 %vm7568_vm0, %v7567_v0  ;;  %v7089_v5 = vld [vmem:[#allocation6] sm:$0xff]   ;;  %v126_v6 = vpack.c.bf16 %v124_v4, %v123_v3  ;;  %v7090_v7 = vld [vmem:[#allocation6 + $0x8] sm:$0xff]   ;;  %v7092_v9 = vld [vmem:[#allocation6 + $0x18] sm:$0xff]  }
  0x7f   :  { %6985 = vmatpush3.bf16.msra.mxu0 %v7087_v1  ;;  %6993 = vmatpush3.bf16.msra.mxu1 %v7089_v5  ;;  %v7093_v10 = vld [vmem:[#allocation6 + $0x20] sm:$0xff]   ;;  %v7094_v11 = vld [vmem:[#allocation6 + $0x28] sm:$0xff]   ;;  %v7095_v12 = vld [vmem:[#allocation6 + $0x30] sm:$0xff]  }
  0x80   :  { %6986 = vmatprep.subr.bf16.mxu0 %v7567_v0  ;;  %6994 = vmatprep.subr.bf16.mxu1 %v7567_v0  ;;  %v7096_v13 = vld [vmem:[#allocation6 + $0x38] sm:$0xff]   ;;  %v7097_v14 = vld [vmem:[#allocation7] sm:$0xff]   ;;  %v7098_v15 = vld [vmem:[#allocation7 + $0x8] sm:$0xff]  }
  0x81   :  { %v7099_v16 = vld [vmem:[#allocation7 + $0x10] sm:$0xff]   ;;  %v7100_v17 = vld [vmem:[#allocation7 + $0x18] sm:$0xff]   ;;  %v7101_v18 = vld [vmem:[#allocation7 + $0x20] sm:$0xff]  }
  0x82   :  { %v7102_v19 = vld [vmem:[#allocation7 + $0x28] sm:$0xff]   ;;  %v7103_v28 = vld [vmem:[#allocation7 + $0x30] sm:$0xff]   ;;  %v7104_v29 = vld [vmem:[#allocation7 + $0x38] sm:$0xff]  }
  0x83   :  { %6987 = vmatpush3.bf16.msra.mxu0 %v7088_v2  ;;  %6995 = vmatpush3.bf16.msra.mxu1 %v7090_v7  ;;  %v6029_v20 = vld [vmem:[%s7997_s7] ss:$0 sm:$0xff]  ;;  %v6033_v30 = vld [vmem:[%s7997_s7 + $0x1] ss:$0 sm:$0xff]  ;;  %v6042_v38 = vld [vmem:[%s7997_s7 + $0x2] ss:$0 sm:$0xff] }
  0x84   :  { %7012 = vmatprep.subr.bf16.mxu0 %v7567_v0  ;;  %6996 = vmatprep.subr.bf16.mxu1 %v7567_v0  ;;  %v460_v47 = vld [vmem:[#allocation9] sm:$0xff]  ;;  %v461_v49 = vld [vmem:[#allocation9 + $0x8] sm:$0xff] }
  0x85   :  { %v468_v48 = vld [vmem:[#allocation9 + $0x40] sm:$0xff]  ;;  %v469_v52 = vld [vmem:[#allocation9 + $0x48] sm:$0xff] }
  0x86   :  { %6989 = vmatmul.mubr.msk.bf16.vlgmr.msra.gmra.mrb[0].mxu0 %vm147_vm1, %v126_v6  ;;  %v6053_v50 = vcombine.low %v460_v47, %v468_v48  ;;  %v6054_v51 = vcombine.high %v460_v47, %v468_v48  ;;  %v476_v53 = vld [vmem:[#allocation9 + $0x80] sm:$0xff]  ;;  %v6055_v55 = vcombine.low %v461_v49, %v469_v52  ;;  %v6056_v56 = vcombine.high %v461_v49, %v469_v52  ;;  %v477_v58 = vld [vmem:[#allocation9 + $0x88] sm:$0xff] }
  0x87   :  { %7028 = vmatprep.mubr.msk.bf16.mxu0 %vm7568_vm0, %v7567_v0  ;;  %6997 = vmatpush3.bf16.msra.mxu1 %v7091_v8  ;;  %v484_v54 = vld [vmem:[#allocation9 + $0xc0] sm:$0xff]  ;;  %v485_v59 = vld [vmem:[#allocation9 + $0xc8] sm:$0xff] }
  0x88   :  { %6998 = vmatprep.subr.bf16.mxu1 %v7567_v0  ;;  %7013 = vmatpush3.bf16.msra.mxu0 %v7097_v14  ;;  %v6070_v57 = vcombine.high %v476_v53, %v484_v54  ;;  %v6072_v60 = vcombine.high %v477_v58, %v485_v59  ;;  %v6069_v61 = vcombine.low %v476_v53, %v484_v54  ;;  %v492_v8 = vld [vmem:[#allocation9 + $0x100] sm:$0xff]  ;;  %v581_v52 = vld [vmem:[#allocation9 + $0x3c8] sm:$0xff] }
  0x89   :  { %7014 = vmatprep.subr.bf16.mxu0 %v7567_v0  ;;  %v6071_v62 = vcombine.low %v477_v58, %v485_v59  ;;  %v572_v48 = vld [vmem:[#allocation9 + $0x380] sm:$0xff]  ;;  %v463_v58 = vld [vmem:[#allocation9 + $0x18] sm:$0xff] }
  0x8a   :  { %v580_v49 = vld [vmem:[#allocation9 + $0x3c0] sm:$0xff] }
  0x8b   :  { %6999 = vmatpush3.bf16.msra.mxu1 %v7092_v9  ;;  %v500_v9 = vld [vmem:[#allocation9 + $0x140] sm:$0xff]  ;;  %v6165_v53 = vcombine.low %v572_v48, %v580_v49 }
  0x8c   :  { %7000 = vmatprep.subr.bf16.mxu1 %v7567_v0  ;;  %7015 = vmatpush3.bf16.msra.mxu0 %v7098_v15 }
  0x8d   :  { %7016 = vmatprep.subr.bf16.mxu0 %v7567_v0 }
  0x8f   :  { %7001 = vmatpush3.bf16.msra.mxu1 %v7093_v10  ;;  %v493_v10 = vld [vmem:[#allocation9 + $0x108] sm:$0xff] }
  0x90   :  { %7002 = vmatprep.subr.bf16.mxu1 %v7567_v0  ;;  %7017 = vmatpush3.bf16.msra.mxu0 %v7099_v16  ;;  %v508_v16 = vld [vmem:[#allocation9 + $0x180] sm:$0xff] }
  0x91   :  { %7018 = vmatprep.subr.bf16.mxu0 %v7567_v0 }
  0x93   :  { %7003 = vmatpush3.bf16.msra.mxu1 %v7094_v11  ;;  %v6086_v11 = vcombine.high %v492_v8, %v500_v9 }
  0x94   :  { %7004 = vmatprep.subr.bf16.mxu1 %v7567_v0  ;;  %7019 = vmatpush3.bf16.msra.mxu0 %v7100_v17  ;;  %v516_v17 = vld [vmem:[#allocation9 + $0x1c0] sm:$0xff] }
  0x95   :  { %7020 = vmatprep.subr.bf16.mxu0 %v7567_v0 }
  0x97   :  { %7005 = vmatpush3.bf16.msra.mxu1 %v7095_v12  ;;  %v501_v12 = vld [vmem:[#allocation9 + $0x148] sm:$0xff] }
  0x98   :  { %7006 = vmatprep.subr.bf16.mxu1 %v7567_v0  ;;  %7021 = vmatpush3.bf16.msra.mxu0 %v7101_v18  ;;  %v6087_v14 = vcombine.low %v493_v10, %v501_v12  ;;  %v6088_v15 = vcombine.high %v493_v10, %v501_v12  ;;  %v509_v18 = vld [vmem:[#allocation9 + $0x188] sm:$0xff] }
  0x99   :  { %7022 = vmatprep.subr.bf16.mxu0 %v7567_v0  ;;  %v6051_v12 = vld [vmem:[%s7997_s7 + $0x3] ss:$0 sm:$0xff] }
  0x9b   :  { %7007 = vmatpush3.bf16.msra.mxu1 %v7096_v13  ;;  %v6085_v13 = vcombine.low %v492_v8, %v500_v9 }
  0x9c   :  { %7023 = vmatpush3.bf16.msra.mxu0 %v7102_v19  ;;  %1310 = vmatprep.subr.bf16.mxu1 %v6054_v51  ;;  %v6102_v19 = vcombine.high %v508_v16, %v516_v17  ;;  %v6166_v51 = vcombine.high %v572_v48, %v580_v49  ;;  %v542_v49 = vld [vmem:[#allocation9 + $0x290] sm:$0xff] }
  0x9d   :  { %7024 = vmatprep.subr.bf16.mxu0 %v7567_v0 }
  0xa0   :  { %7025 = vmatpush3.bf16.msra.mxu0 %v7103_v28  ;;  %v533_v28 = vld [vmem:[#allocation9 + $0x248] sm:$0xff] }
  0xa1   :  { %7026 = vmatprep.subr.bf16.mxu0 %v7567_v0 }
  0xa4   :  { %7027 = vmatpush3.bf16.msra.mxu0 %v7104_v29 }
  0xa5   :  { %1353 = vmatprep.subr.bf16.mxu0 %v6056_v56  ;;  %v462_v56 = vld [vmem:[#allocation9 + $0x10] sm:$0xff] }
 0x159   :  { %v185_v21 = vpop.f32.mrb[0].mxu0 }
 0x15a   :  { %v6990_v22 = vpop.f32.mrb[1].mxu0  ;;  %v186_v24 = vadd.f32 %v6029_v20, %v185_v21  ;;  %v6101_v21 = vcombine.low %v508_v16, %v516_v17  ;;  %v6052_v16 = vld [vmem:[%s7997_s7 + $0x4] ss:$0 sm:$0xff] }
 0x15b   :  { %v188_v23 = vpop.f32.mrb[2].mxu0 }
 0x15c   :  { %v189_v25 = vadd.f32 %v6029_v20, %v188_v23  ;;  %v6991_v26 = vpop.f32.mrb[3].mxu0  ;;  %v517_v20 = vld [vmem:[#allocation9 + $0x1c8] sm:$0xff] }
 0x15d   :  { %v6103_v22 = vcombine.low %v509_v18, %v517_v20  ;;  %v6104_v23 = vcombine.high %v509_v18, %v517_v20  ;;  %v525_v26 = vld [vmem:[#allocation9 + $0x208] sm:$0xff]  ;;  %v478_v18 = vld [vmem:[#allocation9 + $0x90] sm:$0xff]  ;;  %v479_v20 = vld [vmem:[#allocation9 + $0x98] sm:$0xff] }
 0x15e   :  { %v202_v27 = vpack.c.bf16 %v189_v25, %v186_v24 }
 0x160   :  { %7009 = vmatmul.mubr.bf16.vlgmr.msra.gmra.mrb[0].mxu1 %v202_v27 }
 0x161   :  { %1311 = vmatpush1.bf16.msra.mxu1 %v6053_v50  ;;  %v573_v50 = vld [vmem:[#allocation9 + $0x388] sm:$0xff] }
 0x162   :  { %1312 = vmatprep.subr.bf16.mxu1 %v6070_v57  ;;  %v6167_v54 = vcombine.low %v573_v50, %v581_v52  ;;  %v470_v57 = vld [vmem:[#allocation9 + $0x50] sm:$0xff] }
 0x163   :  { %v6058_v59 = vcombine.high %v462_v56, %v470_v57 }
 0x165   :  { %1313 = vmatpush1.bf16.msra.mxu1 %v6069_v61  ;;  %v6057_v61 = vcombine.low %v462_v56, %v470_v57  ;;  %v558_v57 = vld [vmem:[#allocation9 + $0x310] sm:$0xff] }
 0x166   :  { %1314 = vmatprep.subr.bf16.mxu1 %v6086_v11 }
 0x169   :  { %1315 = vmatpush1.bf16.msra.mxu1 %v6085_v13 }
 0x16a   :  { %1316 = vmatprep.subr.bf16.mxu1 %v6102_v19  ;;  %v486_v19 = vld [vmem:[#allocation9 + $0xd0] sm:$0xff] }
 0x16d   :  { %1317 = vmatpush1.bf16.msra.mxu1 %v6101_v21  ;;  %v487_v21 = vld [vmem:[#allocation9 + $0xd8] sm:$0xff] }
 0x233   :  { %v305_v31 = vpop.f32.mrb[0].mxu1 }
 0x234   :  { %v7010_v32 = vpop.f32.mrb[1].mxu1  ;;  %v306_v34 = vadd.f32 %v6033_v30, %v305_v31  ;;  %v6120_v31 = vcombine.high %v525_v26, %v533_v28 }
 0x235   :  { %v308_v33 = vpop.f32.mrb[2].mxu1  ;;  %v540_v32 = vld [vmem:[#allocation9 + $0x280] sm:$0xff] }
 0x236   :  { %v309_v35 = vadd.f32 %v6033_v30, %v308_v33  ;;  %v7011_v36 = vpop.f32.mrb[3].mxu1  ;;  %v6119_v30 = vcombine.low %v525_v26, %v533_v28  ;;  %v548_v33 = vld [vmem:[#allocation9 + $0x2c0] sm:$0xff]  ;;  %v502_v26 = vld [vmem:[#allocation9 + $0x150] sm:$0xff]  ;;  %v503_v28 = vld [vmem:[#allocation9 + $0x158] sm:$0xff] }
 0x237   :  { %v549_v36 = vld [vmem:[#allocation9 + $0x2c8] sm:$0xff] }
 0x238   :  { %v312_v37 = vpack.c.bf16 %v309_v35, %v306_v34  ;;  %v541_v34 = vld [vmem:[#allocation9 + $0x288] sm:$0xff]  ;;  %v6134_v35 = vcombine.high %v540_v32, %v548_v33 }
 0x23a   :  { %7029 = vmatmul.mubr.bf16.vlgmr.msra.gmra.mrb[4].mxu0 %v312_v37  ;;  %v6133_v37 = vcombine.low %v540_v32, %v548_v33  ;;  %v510_v33 = vld [vmem:[#allocation9 + $0x190] sm:$0xff] }
 0x23b   :  { %1354 = vmatpush1.bf16.msra.mxu0 %v6055_v55  ;;  %v6168_v55 = vcombine.high %v573_v50, %v581_v52  ;;  %v550_v50 = vld [vmem:[#allocation9 + $0x2d0] sm:$0xff]  ;;  %v551_v52 = vld [vmem:[#allocation9 + $0x2d8] sm:$0xff] }
 0x23c   :  { %1355 = vmatprep.subr.bf16.mxu0 %v6072_v60  ;;  %v471_v60 = vld [vmem:[#allocation9 + $0x58] sm:$0xff] }
 0x23f   :  { %1356 = vmatpush1.bf16.msra.mxu0 %v6071_v62  ;;  %v6059_v62 = vcombine.low %v463_v58, %v471_v60 }
 0x240   :  { %1357 = vmatprep.subr.bf16.mxu0 %v6088_v15 }
 0x243   :  { %1358 = vmatpush1.bf16.msra.mxu0 %v6087_v14 }
 0x244   :  { %1359 = vmatprep.subr.bf16.mxu0 %v6104_v23 }
 0x247   :  { %1360 = vmatpush1.bf16.msra.mxu0 %v6103_v22 }
 0x248   :  { %1361 = vmatprep.subr.bf16.mxu0 %v6120_v31 }
 0x24b   :  { %1362 = vmatpush1.bf16.msra.mxu0 %v6119_v30  ;;  %v6075_v30 = vcombine.low %v479_v20, %v487_v21 }
 0x30d   :  { %v415_v39 = vpop.f32.mrb[4].mxu0 }
 0x30e   :  { %v416_v40 = vadd.f32 %v6042_v38, %v415_v39  ;;  %v7030_v41 = vpop.f32.mrb[5].mxu0  ;;  %v6136_v39 = vcombine.high %v541_v34, %v549_v36 }
 0x30f   :  { %v418_v42 = vpop.f32.mrb[6].mxu0  ;;  %v564_v41 = vld [vmem:[#allocation9 + $0x340] sm:$0xff] }
 0x310   :  { %v419_v43 = vadd.f32 %v6042_v38, %v418_v42  ;;  %v7031_v44 = vpop.f32.mrb[7].mxu0  ;;  %v422_v45 = vadd.f32 %v416_v40, %v186_v24  ;;  %v524_v24 = vld [vmem:[#allocation9 + $0x200] sm:$0xff]  ;;  %v6135_v38 = vcombine.low %v541_v34, %v549_v36  ;;  %1363 = vmatprep.subr.bf16.mxu0 %v6136_v39  ;;  %v557_v42 = vld [vmem:[#allocation9 + $0x308] sm:$0xff]  ;;  %v518_v34 = vld [vmem:[#allocation9 + $0x1d0] sm:$0xff] }
 0x311   :  { %v556_v40 = vld [vmem:[#allocation9 + $0x300] sm:$0xff]  ;;  %v565_v44 = vld [vmem:[#allocation9 + $0x348] sm:$0xff]  ;;  %v519_v36 = vld [vmem:[#allocation9 + $0x1d8] sm:$0xff]  ;;  %v6106_v39 = vcombine.high %v510_v33, %v518_v34 }
 0x312   :  { %424 = vadd.xlane.f32.xlu0 %v422_v45  ;;  %v423_v46 = vadd.f32 %v419_v43, %v189_v25  ;;  %v532_v25 = vld [vmem:[#allocation9 + $0x240] sm:$0xff]  ;;  %1364 = vmatpush1.bf16.msra.mxu0 %v6135_v38  ;;  %v6150_v43 = vcombine.high %v556_v40, %v564_v41  ;;  %v6152_v47 = vcombine.high %v557_v42, %v565_v44 }
 0x313   :  { %v6118_v27 = vcombine.high %v524_v24, %v532_v25  ;;  %v6117_v29 = vcombine.low %v524_v24, %v532_v25  ;;  %v6074_v24 = vcombine.high %v478_v18, %v486_v19  ;;  %v6076_v25 = vcombine.high %v479_v20, %v487_v21  ;;  %v480_v21 = vld [vmem:[#allocation9 + $0xa0] sm:$0xff] }
 0x314   :  { %1365 = vmatprep.subr.bf16.mxu0 %v6152_v47 }
 0x315   :  { %1318 = vmatprep.subr.bf16.mxu1 %v6118_v27  ;;  %v495_v27 = vld [vmem:[#allocation9 + $0x118] sm:$0xff] }
 0x316   :  { %426 = vadd.xlane.f32.xlu0 %v423_v46  ;;  %1319 = vmatpush1.bf16.msra.mxu1 %v6117_v29  ;;  %v6073_v29 = vcombine.low %v478_v18, %v486_v19  ;;  %v6092_v32 = vcombine.high %v495_v27, %v503_v28  ;;  %v6091_v38 = vcombine.low %v495_v27, %v503_v28 }
 0x317   :  { %1320 = vmatprep.subr.bf16.mxu1 %v6134_v35  ;;  %v511_v35 = vld [vmem:[#allocation9 + $0x198] sm:$0xff] }
 0x31a   :  { %1321 = vmatpush1.bf16.msra.mxu1 %v6133_v37 }
 0x31b   :  { %1322 = vmatprep.subr.bf16.mxu1 %v6150_v43  ;;  %v527_v43 = vld [vmem:[#allocation9 + $0x218] sm:$0xff] }
 0x39f   :  { %v425_v63 = vpop.xlane.xlu0 %424 }
 0x3a0   :  { %v429_v1 = vmul.f32 0.0078125, %v425_v63  ;;  %v6060_v63 = vcombine.high %v463_v58, %v471_v60  ;;  %v566_v58 = vld [vmem:[#allocation9 + $0x350] sm:$0xff]  ;;  %v567_v60 = vld [vmem:[#allocation9 + $0x358] sm:$0xff] }
 0x3a2   :  { %v7752_v2 = vsub.f32 %v422_v45, %v429_v1  ;;  %v6149_v45 = vcombine.low %v556_v40, %v564_v41  ;;  %v7569_v1 = vmov 0   ;;  %v6108_v40 = vcombine.high %v511_v35, %v519_v36  ;;  %v526_v41 = vld [vmem:[#allocation9 + $0x210] sm:$0xff] }
 0x3a3   :  { %v427_v3 = vpop.xlane.xlu0 %426  ;;  %1342 = vmatprep.mubr.bf16.mxu1 %v7569_v1  ;;  %1385 = vmatprep.mubr.bf16.mxu0 %v7569_v1 }
 0x3a4   :  { %v430_v4 = vmul.f32 0.0078125, %v427_v3  ;;  %v433_v5 = vmul.f32 %v7752_v2, %v7752_v2  ;;  %1323 = vmatpush1.bf16.msra.mxu1 %v6149_v45  ;;  %v6105_v45 = vcombine.low %v510_v33, %v518_v34  ;;  %v505_v33 = vld [vmem:[#allocation9 + $0x168] sm:$0xff] }
 0x3a5   :  { %1324 = vmatprep.subr.bf16.mxu1 %v6166_v51  ;;  %v543_v51 = vld [vmem:[#allocation9 + $0x298] sm:$0xff] }
 0x3a6   :  { %v7756_v6 = vsub.f32 %v423_v46, %v430_v4  ;;  %435 = vadd.xlane.f32.xlu1 %v433_v5  ;;  %v6151_v46 = vcombine.low %v557_v42, %v565_v44  ;;  %v534_v42 = vld [vmem:[#allocation9 + $0x250] sm:$0xff]  ;;  %v535_v44 = vld [vmem:[#allocation9 + $0x258] sm:$0xff]  ;;  %v6140_v56 = vcombine.high %v543_v51, %v551_v52 }
 0x3a7   :  { %v6122_v47 = vcombine.high %v526_v41, %v534_v42  ;;  %v6124_v48 = vcombine.high %v527_v43, %v535_v44 }
 0x3a8   :  { %v434_v7 = vmul.f32 %v7756_v6, %v7756_v6  ;;  %1366 = vmatpush1.bf16.msra.mxu0 %v6151_v46  ;;  %1325 = vmatpush1.bf16.msra.mxu1 %v6165_v53  ;;  %v6107_v46 = vcombine.low %v511_v35, %v519_v36  ;;  %v6121_v53 = vcombine.low %v526_v41, %v534_v42  ;;  %v521_v41 = vld [vmem:[#allocation9 + $0x1e8] sm:$0xff] }
 0x3a9   :  { %1367 = vmatprep.subr.bf16.mxu0 %v6168_v55  ;;  %1396 = vmatprep.subr.bf16.mxu1 %v6058_v59  ;;  %v6138_v55 = vcombine.high %v542_v49, %v550_v50  ;;  %v559_v59 = vld [vmem:[#allocation9 + $0x318] sm:$0xff] }
 0x3aa   :  { %437 = vadd.xlane.f32.xlu1 %v434_v7 }
 0x3ac   :  { %1368 = vmatpush1.bf16.msra.mxu0 %v6167_v54  ;;  %v6123_v54 = vcombine.low %v527_v43, %v535_v44 }
 0x3ad   :  { %1439 = vmatprep.subr.bf16.mxu0 %v6060_v63  ;;  %v6154_v63 = vcombine.high %v558_v57, %v566_v58 }
 0x433   :  { %v436_v3 = vpop.xlane.xlu1 %435 }
 0x434   :  { %v439_v4 = vmul.f32 0.0078125, %v436_v3  ;;  %v6156_v3 = vcombine.high %v559_v59, %v567_v60 }
 0x436   :  { %v441_v5 = vadd.f32 1e-05, %v439_v4  ;;  %v574_v4 = vld [vmem:[#allocation9 + $0x390] sm:$0xff] }
 0x437   :  { %v438_v7 = vpop.xlane.xlu1 %437 }
 0x438   :  { %7377 = vrsqrt.f32 %v441_v5  ;;  %v440_v8 = vmul.f32 0.0078125, %v438_v7  ;;  %v582_v5 = vld [vmem:[#allocation9 + $0x3d0] sm:$0xff]  ;;  %v575_v7 = vld [vmem:[#allocation9 + $0x398] sm:$0xff] }
 0x43a   :  { %v442_v9 = vadd.f32 1e-05, %v440_v8  ;;  %v583_v8 = vld [vmem:[#allocation9 + $0x3d8] sm:$0xff] }
 0x43b   :  { %v6171_v18 = vcombine.low %v575_v7, %v583_v8 }
 0x43c   :  { %7379 = vrsqrt.f32 %v442_v9  ;;  %v6153_v9 = vcombine.low %v558_v57, %v566_v58  ;;  %v553_v57 = vld [vmem:[#allocation9 + $0x2e8] sm:$0xff] }
 0x442   :  { %v7378_v10 = vpop.eup %7377 }
 0x443   :  { %v445_v11 = vmul.f32 %v7378_v10, %v7752_v2  ;;  %v6155_v10 = vcombine.low %v559_v59, %v567_v60 }
 0x445   :  { %v451_v14 = vmul.f32 %v6051_v12, %v445_v11  ;;  %v6170_v11 = vcombine.high %v574_v4, %v582_v5 }
 0x446   :  { %v7380_v13 = vpop.eup %7379 }
 0x447   :  { %v446_v15 = vmul.f32 %v7380_v13, %v7756_v6  ;;  %v7770_v22 = vadd.f32 %v6052_v16, %v451_v14  ;;  %v494_v6 = vld [vmem:[#allocation9 + $0x110] sm:$0xff]  ;;  %v464_v13 = vld [vmem:[#allocation9 + $0x20] sm:$0xff] }
 0x448   :  { %v6090_v31 = vcombine.high %v494_v6, %v502_v26  ;;  %v6089_v37 = vcombine.low %v494_v6, %v502_v26  ;;  %v472_v14 = vld [vmem:[#allocation9 + $0x60] sm:$0xff]  ;;  %v489_v6 = vld [vmem:[#allocation9 + $0xe8] sm:$0xff] }
 0x449   :  { %v452_v17 = vmul.f32 %v6051_v12, %v446_v15  ;;  %v6172_v12 = vcombine.high %v575_v7, %v583_v8  ;;  %v465_v15 = vld [vmem:[#allocation9 + $0x28] sm:$0xff]  ;;  %v6062_v19 = vcombine.high %v464_v13, %v472_v14  ;;  %v6061_v26 = vcombine.low %v464_v13, %v472_v14 }
 0x44a   :  { %v585_v13 = vld [vmem:[#allocation9 + $0x3e8] sm:$0xff] }
 0x44b   :  { %v7772_v2 = vadd.f32 %v6052_v16, %v452_v17  ;;  %v473_v16 = vld [vmem:[#allocation9 + $0x68] sm:$0xff]  ;;  %v6169_v17 = vcombine.low %v574_v4, %v582_v5 }
 0x44c   :  { %v6064_v20 = vcombine.high %v465_v15, %v473_v16  ;;  %v6063_v27 = vcombine.low %v465_v15, %v473_v16  ;;  %v569_v4 = vld [vmem:[#allocation9 + $0x368] sm:$0xff] }
 0x44d   :  { %v7776_v23 = vpack.c.bf16 %v7772_v2, %v7770_v22 }
 0x44f   :  { %1343 = vmatmul.mubr.bf16.vlgmr.msra.gmra.mrb[4].mxu1 %v7776_v23  ;;  %1386 = vmatmul.mubr.bf16.vlgmr.msra.gmra.mrb[8].mxu0 %v7776_v23 }
 0x450   :  { %1397 = vmatpush1.bf16.msra.mxu1 %v6057_v61  ;;  %1440 = vmatpush1.bf16.msra.mxu0 %v6059_v62  ;;  %v6137_v61 = vcombine.low %v542_v49, %v550_v50  ;;  %v6139_v62 = vcombine.low %v543_v51, %v551_v52  ;;  %v537_v49 = vld [vmem:[#allocation9 + $0x268] sm:$0xff] }
 0x451   :  { %1398 = vmatprep.subr.bf16.mxu1 %v6074_v24  ;;  %1441 = vmatprep.subr.bf16.mxu0 %v6076_v25  ;;  %v488_v24 = vld [vmem:[#allocation9 + $0xe0] sm:$0xff]  ;;  %v481_v25 = vld [vmem:[#allocation9 + $0xa8] sm:$0xff] }
 0x452   :  { %1428 = vmatprep.mubr.bf16.mxu1 %v7569_v1  ;;  %1471 = vmatprep.mubr.bf16.mxu0 %v7569_v1  ;;  %v6078_v28 = vcombine.high %v480_v21, %v488_v24  ;;  %v6077_v34 = vcombine.low %v480_v21, %v488_v24  ;;  %v6079_v35 = vcombine.low %v481_v25, %v489_v6  ;;  %v475_v21 = vld [vmem:[#allocation9 + $0x78] sm:$0xff] }
 0x454   :  { %1399 = vmatpush1.bf16.msra.mxu1 %v6073_v29  ;;  %1442 = vmatpush1.bf16.msra.mxu0 %v6075_v30  ;;  %v6080_v29 = vcombine.high %v481_v25, %v489_v6  ;;  %v496_v30 = vld [vmem:[#allocation9 + $0x120] sm:$0xff] }
 0x455   :  { %1400 = vmatprep.subr.bf16.mxu1 %v6090_v31  ;;  %1443 = vmatprep.subr.bf16.mxu0 %v6092_v32  ;;  %v504_v31 = vld [vmem:[#allocation9 + $0x160] sm:$0xff]  ;;  %v497_v32 = vld [vmem:[#allocation9 + $0x128] sm:$0xff] }
 0x456   :  { %v6094_v36 = vcombine.high %v496_v30, %v504_v31  ;;  %v6093_v42 = vcombine.low %v496_v30, %v504_v31  ;;  %v6095_v43 = vcombine.low %v497_v32, %v505_v33  ;;  %v491_v30 = vld [vmem:[#allocation9 + $0xf8] sm:$0xff] }
 0x458   :  { %1401 = vmatpush1.bf16.msra.mxu1 %v6089_v37  ;;  %1444 = vmatpush1.bf16.msra.mxu0 %v6091_v38  ;;  %v6096_v37 = vcombine.high %v497_v32, %v505_v33  ;;  %v512_v38 = vld [vmem:[#allocation9 + $0x1a0] sm:$0xff] }
 0x459   :  { %1402 = vmatprep.subr.bf16.mxu1 %v6106_v39  ;;  %1445 = vmatprep.subr.bf16.mxu0 %v6108_v40  ;;  %v520_v39 = vld [vmem:[#allocation9 + $0x1e0] sm:$0xff]  ;;  %v513_v40 = vld [vmem:[#allocation9 + $0x1a8] sm:$0xff] }
 0x45a   :  { %v6110_v44 = vcombine.high %v512_v38, %v520_v39  ;;  %v6109_v50 = vcombine.low %v512_v38, %v520_v39  ;;  %v6111_v51 = vcombine.low %v513_v40, %v521_v41  ;;  %v507_v38 = vld [vmem:[#allocation9 + $0x178] sm:$0xff] }
 0x45c   :  { %1403 = vmatpush1.bf16.msra.mxu1 %v6105_v45  ;;  %1446 = vmatpush1.bf16.msra.mxu0 %v6107_v46  ;;  %v6112_v45 = vcombine.high %v513_v40, %v521_v41  ;;  %v528_v46 = vld [vmem:[#allocation9 + $0x220] sm:$0xff] }
 0x45d   :  { %1404 = vmatprep.subr.bf16.mxu1 %v6122_v47  ;;  %1447 = vmatprep.subr.bf16.mxu0 %v6124_v48  ;;  %v536_v47 = vld [vmem:[#allocation9 + $0x260] sm:$0xff]  ;;  %v529_v48 = vld [vmem:[#allocation9 + $0x228] sm:$0xff] }
 0x45e   :  { %v6126_v52 = vcombine.high %v528_v46, %v536_v47  ;;  %v6125_v58 = vcombine.low %v528_v46, %v536_v47  ;;  %v6127_v59 = vcombine.low %v529_v48, %v537_v49  ;;  %v523_v46 = vld [vmem:[#allocation9 + $0x1f8] sm:$0xff] }
 0x460   :  { %1405 = vmatpush1.bf16.msra.mxu1 %v6121_v53  ;;  %1448 = vmatpush1.bf16.msra.mxu0 %v6123_v54  ;;  %v6128_v53 = vcombine.high %v529_v48, %v537_v49  ;;  %v544_v54 = vld [vmem:[#allocation9 + $0x2a0] sm:$0xff] }
 0x461   :  { %1406 = vmatprep.subr.bf16.mxu1 %v6138_v55  ;;  %1449 = vmatprep.subr.bf16.mxu0 %v6140_v56  ;;  %v552_v55 = vld [vmem:[#allocation9 + $0x2e0] sm:$0xff]  ;;  %v545_v56 = vld [vmem:[#allocation9 + $0x2a8] sm:$0xff] }
 0x462   :  { %v6142_v60 = vcombine.high %v544_v54, %v552_v55  ;;  %v6141_v5 = vcombine.low %v544_v54, %v552_v55  ;;  %v6143_v7 = vcombine.low %v545_v56, %v553_v57  ;;  %v539_v54 = vld [vmem:[#allocation9 + $0x278] sm:$0xff] }
 0x464   :  { %1407 = vmatpush1.bf16.msra.mxu1 %v6137_v61  ;;  %1450 = vmatpush1.bf16.msra.mxu0 %v6139_v62  ;;  %v6144_v61 = vcombine.high %v545_v56, %v553_v57  ;;  %v560_v62 = vld [vmem:[#allocation9 + $0x320] sm:$0xff] }
 0x465   :  { %1408 = vmatprep.subr.bf16.mxu1 %v6154_v63  ;;  %1451 = vmatprep.subr.bf16.mxu0 %v6156_v3  ;;  %v568_v63 = vld [vmem:[#allocation9 + $0x360] sm:$0xff]  ;;  %v561_v3 = vld [vmem:[#allocation9 + $0x328] sm:$0xff] }
 0x466   :  { %v6158_v8 = vcombine.high %v560_v62, %v568_v63  ;;  %v6157_v14 = vcombine.low %v560_v62, %v568_v63  ;;  %v6159_v15 = vcombine.low %v561_v3, %v569_v4  ;;  %v555_v62 = vld [vmem:[#allocation9 + $0x2f8] sm:$0xff] }
 0x468   :  { %1409 = vmatpush1.bf16.msra.mxu1 %v6153_v9  ;;  %1452 = vmatpush1.bf16.msra.mxu0 %v6155_v10  ;;  %v6160_v9 = vcombine.high %v561_v3, %v569_v4  ;;  %v576_v10 = vld [vmem:[#allocation9 + $0x3a0] sm:$0xff] }
 0x469   :  { %1410 = vmatprep.subr.bf16.mxu1 %v6170_v11  ;;  %1453 = vmatprep.subr.bf16.mxu0 %v6172_v12  ;;  %v584_v11 = vld [vmem:[#allocation9 + $0x3e0] sm:$0xff]  ;;  %v577_v12 = vld [vmem:[#allocation9 + $0x3a8] sm:$0xff] }
 0x46a   :  { %v6174_v16 = vcombine.high %v576_v10, %v584_v11  ;;  %v6173_v24 = vcombine.low %v576_v10, %v584_v11  ;;  %v6175_v25 = vcombine.low %v577_v12, %v585_v13  ;;  %v571_v10 = vld [vmem:[#allocation9 + $0x378] sm:$0xff] }
 0x46c   :  { %1411 = vmatpush1.bf16.msra.mxu1 %v6169_v17  ;;  %1454 = vmatpush1.bf16.msra.mxu0 %v6171_v18  ;;  %v6176_v17 = vcombine.high %v577_v12, %v585_v13  ;;  %v466_v18 = vld [vmem:[#allocation9 + $0x30] sm:$0xff] }
 0x46d   :  { %1482 = vmatprep.subr.bf16.mxu1 %v6062_v19  ;;  %1525 = vmatprep.subr.bf16.mxu0 %v6064_v20  ;;  %v474_v19 = vld [vmem:[#allocation9 + $0x70] sm:$0xff]  ;;  %v467_v20 = vld [vmem:[#allocation9 + $0x38] sm:$0xff] }
 0x46e   :  { %v6066_v6 = vcombine.high %v466_v18, %v474_v19  ;;  %v6065_v31 = vcombine.low %v466_v18, %v474_v19  ;;  %v6067_v32 = vcombine.low %v467_v20, %v475_v21  ;;  %v587_v18 = vld [vmem:[#allocation9 + $0x3f8] sm:$0xff] }
 0x46f   :  { %1429 = vmatmul.mubr.bf16.vlgmr.msra.gmra.mrb[8].mxu1 %v7776_v23  ;;  %1472 = vmatmul.mubr.bf16.vlgmr.msra.gmra.mrb[12].mxu0 %v7776_v23 }
 0x470   :  { %1483 = vmatpush1.bf16.msra.mxu1 %v6061_v26  ;;  %1526 = vmatpush1.bf16.msra.mxu0 %v6063_v27  ;;  %v6068_v26 = vcombine.high %v467_v20, %v475_v21  ;;  %v482_v27 = vld [vmem:[#allocation9 + $0xb0] sm:$0xff] }
 0x471   :  { %1484 = vmatprep.subr.bf16.mxu1 %v6078_v28  ;;  %1527 = vmatprep.subr.bf16.mxu0 %v6080_v29  ;;  %v490_v28 = vld [vmem:[#allocation9 + $0xf0] sm:$0xff]  ;;  %v483_v29 = vld [vmem:[#allocation9 + $0xb8] sm:$0xff] }
 0x472   :  { %1514 = vmatprep.mubr.bf16.mxu1 %v7569_v1  ;;  %1557 = vmatprep.mubr.bf16.mxu0 %v7569_v1  ;;  %v6082_v33 = vcombine.high %v482_v27, %v490_v28  ;;  %v6081_v39 = vcombine.low %v482_v27, %v490_v28  ;;  %v6083_v40 = vcombine.low %v483_v29, %v491_v30  ;;  %v7106_v27 = vld [vmem:[#allocation10 + $0xc0] sm:$0xff]  }
 0x473   :  { %v7107_v28 = vld [vmem:[#allocation10] sm:$0xff]  }
 0x474   :  { %1485 = vmatpush1.bf16.msra.mxu1 %v6077_v34  ;;  %1528 = vmatpush1.bf16.msra.mxu0 %v6079_v35  ;;  %v6084_v34 = vcombine.high %v483_v29, %v491_v30  ;;  %v498_v35 = vld [vmem:[#allocation9 + $0x130] sm:$0xff]  ;;  %v7108_v29 = vld [vmem:[#allocation10 + $0x80] sm:$0xff]   ;;  %v7109_v30 = vld [vmem:[#allocation10 + $0x48] sm:$0xff]  }
 0x475   :  { %1486 = vmatprep.subr.bf16.mxu1 %v6094_v36  ;;  %1529 = vmatprep.subr.bf16.mxu0 %v6096_v37  ;;  %v506_v36 = vld [vmem:[#allocation9 + $0x170] sm:$0xff]  ;;  %v499_v37 = vld [vmem:[#allocation9 + $0x138] sm:$0xff] }
 0x476   :  { %v6098_v41 = vcombine.high %v498_v35, %v506_v36  ;;  %v6097_v47 = vcombine.low %v498_v35, %v506_v36  ;;  %v6099_v48 = vcombine.low %v499_v37, %v507_v38  ;;  %v7114_v35 = vld [vmem:[#allocation10 + $0xd0] sm:$0xff]  }
 0x477   :  { %v7115_v36 = vld [vmem:[#allocation10 + $0x10] sm:$0xff]  }
 0x478   :  { %1487 = vmatpush1.bf16.msra.mxu1 %v6093_v42  ;;  %1530 = vmatpush1.bf16.msra.mxu0 %v6095_v43  ;;  %v6100_v42 = vcombine.high %v499_v37, %v507_v38  ;;  %v514_v43 = vld [vmem:[#allocation9 + $0x1b0] sm:$0xff]  ;;  %v7117_v38 = vld [vmem:[#allocation10 + $0x58] sm:$0xff]  }
 0x479   :  { %1488 = vmatprep.subr.bf16.mxu1 %v6110_v44  ;;  %1531 = vmatprep.subr.bf16.mxu0 %v6112_v45  ;;  %v522_v44 = vld [vmem:[#allocation9 + $0x1f0] sm:$0xff]  ;;  %v515_v45 = vld [vmem:[#allocation9 + $0x1b8] sm:$0xff] }
 0x47a   :  { %v6114_v49 = vcombine.high %v514_v43, %v522_v44  ;;  %v6113_v55 = vcombine.low %v514_v43, %v522_v44  ;;  %v6115_v56 = vcombine.low %v515_v45, %v523_v46  ;;  %v7116_v37 = vld [vmem:[#allocation10 + $0x90] sm:$0xff]   ;;  %v7123_v43 = vld [vmem:[#allocation10 + $0x20] sm:$0xff]  }
 0x47b   :  { %v7124_v44 = vld [vmem:[#allocation10 + $0xa0] sm:$0xff]  }
 0x47c   :  { %1489 = vmatpush1.bf16.msra.mxu1 %v6109_v50  ;;  %1532 = vmatpush1.bf16.msra.mxu0 %v6111_v51  ;;  %v6116_v50 = vcombine.high %v515_v45, %v523_v46  ;;  %v530_v51 = vld [vmem:[#allocation9 + $0x230] sm:$0xff]  ;;  %v7125_v45 = vld [vmem:[#allocation10 + $0x68] sm:$0xff]  }
 0x47d   :  { %1490 = vmatprep.subr.bf16.mxu1 %v6126_v52  ;;  %1533 = vmatprep.subr.bf16.mxu0 %v6128_v53  ;;  %v538_v52 = vld [vmem:[#allocation9 + $0x270] sm:$0xff]  ;;  %v531_v53 = vld [vmem:[#allocation9 + $0x238] sm:$0xff]  ;;  %v7126_v46 = vld [vmem:[#allocation10 + $0xe8] sm:$0xff]  }
 0x47e   :  { %v6130_v57 = vcombine.high %v530_v51, %v538_v52  ;;  %v6129_v63 = vcombine.low %v530_v51, %v538_v52  ;;  %v6131_v3 = vcombine.low %v531_v53, %v539_v54  ;;  %v7131_v51 = vld [vmem:[#allocation10 + $0x30] sm:$0xff]  }
 0x47f   :  { %v7132_v52 = vld [vmem:[#allocation10 + $0xb0] sm:$0xff]  }
 0x480   :  { %1491 = vmatpush1.bf16.msra.mxu1 %v6125_v58  ;;  %1534 = vmatpush1.bf16.msra.mxu0 %v6127_v59  ;;  %v6132_v58 = vcombine.high %v531_v53, %v539_v54  ;;  %v546_v59 = vld [vmem:[#allocation9 + $0x2b0] sm:$0xff]  ;;  %v7133_v53 = vld [vmem:[#allocation10 + $0x78] sm:$0xff]  }
 0x481   :  { %1492 = vmatprep.subr.bf16.mxu1 %v6142_v60  ;;  %1535 = vmatprep.subr.bf16.mxu0 %v6144_v61  ;;  %v554_v60 = vld [vmem:[#allocation9 + $0x2f0] sm:$0xff]  ;;  %v547_v61 = vld [vmem:[#allocation9 + $0x2b8] sm:$0xff] }
 0x482   :  { %v6146_v4 = vcombine.high %v546_v59, %v554_v60  ;;  %v6145_v11 = vcombine.low %v546_v59, %v554_v60  ;;  %v6147_v12 = vcombine.low %v547_v61, %v555_v62  ;;  %v7134_v54 = vld [vmem:[#allocation10 + $0xf8] sm:$0xff]   ;;  %v590_v59 = vlaneseq }
 0x484   :  { %1493 = vmatpush1.bf16.msra.mxu1 %v6141_v5  ;;  %1536 = vmatpush1.bf16.msra.mxu0 %v6143_v7  ;;  %v6148_v5 = vcombine.high %v547_v61, %v555_v62  ;;  %v562_v7 = vld [vmem:[#allocation9 + $0x330] sm:$0xff]  ;;  %v7792_v60 = vshrl.u32 %v590_v59, 7 }
 0x485   :  { %1494 = vmatprep.subr.bf16.mxu1 %v6158_v8  ;;  %1537 = vmatprep.subr.bf16.mxu0 %v6160_v9  ;;  %v570_v8 = vld [vmem:[#allocation9 + $0x370] sm:$0xff]  ;;  %v563_v9 = vld [vmem:[#allocation9 + $0x338] sm:$0xff] }
 0x486   :  { %v6162_v13 = vcombine.high %v562_v7, %v570_v8  ;;  %v6161_v19 = vcombine.low %v562_v7, %v570_v8  ;;  %v6163_v20 = vcombine.low %v563_v9, %v571_v10  ;;  %v7795_v61 = vsub.s32 0, %v7792_v60 }
 0x487   :  { %v7798_v62 = vsub.s32 2, %v7792_v60  ;;  %v7820_v59 = vsub.s32 6, %v7792_v60 }
 0x488   :  { %1495 = vmatpush1.bf16.msra.mxu1 %v6157_v14  ;;  %1538 = vmatpush1.bf16.msra.mxu0 %v6159_v15  ;;  %v6164_v14 = vcombine.high %v563_v9, %v571_v10  ;;  %v578_v15 = vld [vmem:[#allocation9 + $0x3b0] sm:$0xff] }
 0x489   :  { %1496 = vmatprep.subr.bf16.mxu1 %v6174_v16  ;;  %1539 = vmatprep.subr.bf16.mxu0 %v6176_v17  ;;  %v586_v16 = vld [vmem:[#allocation9 + $0x3f0] sm:$0xff]  ;;  %v579_v17 = vld [vmem:[#allocation9 + $0x3b8] sm:$0xff] }
 0x48a   :  { %v6178_v21 = vcombine.high %v578_v15, %v586_v16 }
 0x48c   :  { %1497 = vmatpush1.bf16.msra.mxu1 %v6173_v24  ;;  %1540 = vmatpush1.bf16.msra.mxu0 %v6175_v25  ;;  %v6180_v24 = vcombine.high %v579_v17, %v587_v18  ;;  %v6177_v25 = vcombine.low %v578_v15, %v586_v16 }
 0x48d   :  { %1568 = vmatprep.subr.bf16.mxu1 %v6066_v6  ;;  %1611 = vmatprep.subr.bf16.mxu0 %v6068_v26  ;;  %v6179_v6 = vcombine.low %v579_v17, %v587_v18  ;;  %v7105_v26 = vld [vmem:[#allocation10 + $0x40] sm:$0xff]  }
 0x48f   :  { %1515 = vmatmul.mubr.bf16.vlgmr.msra.gmra.mrb[12].mxu1 %v7776_v23  ;;  %1558 = vmatmul.mubr.bf16.vlgmr.msra.gmra.mrb[16].mxu0 %v7776_v23 }
 0x490   :  { %1569 = vmatpush1.bf16.msra.mxu1 %v6065_v31  ;;  %1612 = vmatpush1.bf16.msra.mxu0 %v6067_v32  ;;  %v7110_v31 = vld [vmem:[#allocation10 + $0xc8] sm:$0xff]  }
 0x491   :  { %1570 = vmatprep.subr.bf16.mxu1 %v6082_v33  ;;  %1613 = vmatprep.subr.bf16.mxu0 %v6084_v34  ;;  %v7111_v32 = vld [vmem:[#allocation10 + $0x8] sm:$0xff]   ;;  %v7113_v34 = vld [vmem:[#allocation10 + $0x50] sm:$0xff]  }
 0x492   :  { %1600 = vmatprep.mubr.bf16.mxu1 %v7569_v1  ;;  %1643 = vmatprep.mubr.bf16.mxu0 %v7569_v1  ;;  %v7112_v33 = vld [vmem:[#allocation10 + $0x88] sm:$0xff]  }
 0x494   :  { %1571 = vmatpush1.bf16.msra.mxu1 %v6081_v39  ;;  %1614 = vmatpush1.bf16.msra.mxu0 %v6083_v40  ;;  %v7118_v39 = vld [vmem:[#allocation10 + $0xd8] sm:$0xff]  }
 0x495   :  { %1572 = vmatprep.subr.bf16.mxu1 %v6098_v41  ;;  %1615 = vmatprep.subr.bf16.mxu0 %v6100_v42  ;;  %v7119_v40 = vld [vmem:[#allocation10 + $0x18] sm:$0xff]   ;;  %v7121_v41 = vld [vmem:[#allocation10 + $0x60] sm:$0xff]  }
 0x496   :  { %v7122_v42 = vld [vmem:[#allocation10 + $0xe0] sm:$0xff]  }
 0x498   :  { %1573 = vmatpush1.bf16.msra.mxu1 %v6097_v47  ;;  %1616 = vmatpush1.bf16.msra.mxu0 %v6099_v48  ;;  %v7127_v47 = vld [vmem:[#allocation10 + $0x28] sm:$0xff]  }
 0x499   :  { %1574 = vmatprep.subr.bf16.mxu1 %v6114_v49  ;;  %1617 = vmatprep.subr.bf16.mxu0 %v6116_v50  ;;  %v7128_v48 = vld [vmem:[#allocation10 + $0xa8] sm:$0xff]   ;;  %v7129_v49 = vld [vmem:[#allocation10 + $0x70] sm:$0xff]  }
 0x49a   :  { %v7130_v50 = vld [vmem:[#allocation10 + $0xf0] sm:$0xff]  }
 0x49c   :  { %1575 = vmatpush1.bf16.msra.mxu1 %v6113_v55  ;;  %1618 = vmatpush1.bf16.msra.mxu0 %v6115_v56  ;;  %v7135_v55 = vld [vmem:[#allocation10 + $0x38] sm:$0xff]  }
 0x49d   :  { %1576 = vmatprep.subr.bf16.mxu1 %v6130_v57  ;;  %1619 = vmatprep.subr.bf16.mxu0 %v6132_v58  ;;  %v7136_v56 = vld [vmem:[#allocation10 + $0xb8] sm:$0xff]   ;;  %v7137_v57 = vld [vmem:[#allocation10 + $0x140] sm:$0xff]  }
 0x49e   :  { %v7138_v58 = vld [vmem:[#allocation10 + $0x1c0] sm:$0xff]  }
 0x4a0   :  { %1577 = vmatpush1.bf16.msra.mxu1 %v6129_v63  ;;  %1620 = vmatpush1.bf16.msra.mxu0 %v6131_v3  ;;  %v7800_v63 = vld [vmem:[#allocation12] ss:$2 sm:$0xff]  ;;  %v7803_v3 = vsub.s32 1, %v7792_v60 }
 0x4a1   :  { %1578 = vmatprep.subr.bf16.mxu1 %v6146_v4  ;;  %1621 = vmatprep.subr.bf16.mxu0 %v6148_v5  ;;  %v7806_v4 = vsub.s32 3, %v7792_v60  ;;  %v593_v5 = vrot.slane %v7800_v63, %v7795_v61  ;;  %v601_v7 = vrot.slane %v7800_v63, %v7798_v62 }
 0x4a2   :  { %v597_v8 = vrot.slane %v7800_v63, %v7803_v3 }
 0x4a3   :  { %v605_v9 = vrot.slane %v7800_v63, %v7806_v4 }
 0x4a4   :  { %1579 = vmatpush1.bf16.msra.mxu1 %v6145_v11  ;;  %1622 = vmatpush1.bf16.msra.mxu0 %v6147_v12 }
 0x4a5   :  { %1580 = vmatprep.subr.bf16.mxu1 %v6162_v13  ;;  %1623 = vmatprep.subr.bf16.mxu0 %v6164_v14 }
 0x4a8   :  { %1581 = vmatpush1.bf16.msra.mxu1 %v6161_v19  ;;  %1624 = vmatpush1.bf16.msra.mxu0 %v6163_v20 }
 0x4a9   :  { %1582 = vmatprep.subr.bf16.mxu1 %v6178_v21  ;;  %1625 = vmatprep.subr.bf16.mxu0 %v6180_v24 }
 0x4ac   :  { %1583 = vmatpush1.bf16.msra.mxu1 %v6177_v25  ;;  %1626 = vmatpush1.bf16.msra.mxu0 %v6179_v6 }
 0x4ad   :  { %6614 = vmatprep.subr.bf16.mxu1 %v7105_v26  ;;  %6636 = vmatprep.subr.bf16.mxu0 %v7106_v27 }
 0x4af   :  { %1601 = vmatmul.mubr.bf16.vlgmr.msra.gmra.mrb[16].mxu1 %v7776_v23  ;;  %1644 = vmatmul.mubr.bf16.vlgmr.msra.gmra.mrb[20].mxu0 %v7776_v23  ;;  %v7120_v23 = vld [vmem:[#allocation10 + $0x98] sm:$0xff]  }
 0x4b0   :  { %6615 = vmatpush3.bf16.msra.mxu1 %v7107_v28  ;;  %6637 = vmatpush3.bf16.msra.mxu0 %v7108_v29 }
 0x4b1   :  { %6616 = vmatprep.subr.bf16.mxu1 %v7109_v30  ;;  %6638 = vmatprep.subr.bf16.mxu0 %v7110_v31 }
 0x4b4   :  { %6617 = vmatpush3.bf16.msra.mxu1 %v7111_v32  ;;  %6639 = vmatpush3.bf16.msra.mxu0 %v7112_v33 }
 0x4b5   :  { %6618 = vmatprep.subr.bf16.mxu1 %v7113_v34  ;;  %6640 = vmatprep.subr.bf16.mxu0 %v7114_v35 }
 0x4b8   :  { %6619 = vmatpush3.bf16.msra.mxu1 %v7115_v36  ;;  %6641 = vmatpush3.bf16.msra.mxu0 %v7116_v37 }
 0x4b9   :  { %6620 = vmatprep.subr.bf16.mxu1 %v7117_v38  ;;  %6642 = vmatprep.subr.bf16.mxu0 %v7118_v39  ;;  %v7139_v39 = vld [vmem:[#allocation10 + $0x100] sm:$0xff]  }
 0x4bc   :  { %6621 = vmatpush3.bf16.msra.mxu1 %v7119_v40  ;;  %6643 = vmatpush3.bf16.msra.mxu0 %v7120_v23  ;;  %v7140_v40 = vld [vmem:[#allocation10 + $0x180] sm:$0xff]   ;;  %v7141_v23 = vld [vmem:[#allocation10 + $0x148] sm:$0xff]  }
 0x4bd   :  { %6622 = vmatprep.subr.bf16.mxu1 %v7121_v41  ;;  %6644 = vmatprep.subr.bf16.mxu0 %v7122_v42  ;;  %v7142_v41 = vld [vmem:[#allocation10 + $0x1c8] sm:$0xff]  }
 0x4be   :  { %v7143_v42 = vld [vmem:[#allocation10 + $0x108] sm:$0xff]  }
 0x4c0   :  { %6623 = vmatpush3.bf16.msra.mxu1 %v7123_v43  ;;  %6645 = vmatpush3.bf16.msra.mxu0 %v7124_v44  ;;  %v7144_v43 = vld [vmem:[#allocation10 + $0x188] sm:$0xff]   ;;  %v7145_v44 = vld [vmem:[#allocation10 + $0x150] sm:$0xff]  }
 0x4c1   :  { %6624 = vmatprep.subr.bf16.mxu1 %v7125_v45  ;;  %6646 = vmatprep.subr.bf16.mxu0 %v7126_v46  ;;  %v7146_v45 = vld [vmem:[#allocation10 + $0x1d0] sm:$0xff]  }
 0x4c2   :  { %v7147_v46 = vld [vmem:[#allocation10 + $0x110] sm:$0xff]  }
 0x4c4   :  { %6625 = vmatpush3.bf16.msra.mxu1 %v7127_v47  ;;  %6647 = vmatpush3.bf16.msra.mxu0 %v7128_v48  ;;  %v7148_v47 = vld [vmem:[#allocation10 + $0x190] sm:$0xff]   ;;  %v7149_v48 = vld [vmem:[#allocation10 + $0x158] sm:$0xff]  }
 0x4c5   :  { %6626 = vmatprep.subr.bf16.mxu1 %v7129_v49  ;;  %6648 = vmatprep.subr.bf16.mxu0 %v7130_v50  ;;  %v7150_v49 = vld [vmem:[#allocation10 + $0x1d8] sm:$0xff]  }
 0x4c6   :  { %v7151_v50 = vld [vmem:[#allocation10 + $0x118] sm:$0xff]  }
 0x4c8   :  { %6627 = vmatpush3.bf16.msra.mxu1 %v7131_v51  ;;  %6649 = vmatpush3.bf16.msra.mxu0 %v7132_v52  ;;  %v7152_v51 = vld [vmem:[#allocation10 + $0x198] sm:$0xff]   ;;  %v7153_v52 = vld [vmem:[#allocation10 + $0x160] sm:$0xff]  }
 0x4c9   :  { %6628 = vmatprep.subr.bf16.mxu1 %v7133_v53  ;;  %6650 = vmatprep.subr.bf16.mxu0 %v7134_v54  ;;  %v7154_v53 = vld [vmem:[#allocation10 + $0x1e0] sm:$0xff]  }
 0x4ca   :  { %v7155_v54 = vld [vmem:[#allocation10 + $0x120] sm:$0xff]  }
 0x4cc   :  { %6629 = vmatpush3.bf16.msra.mxu1 %v7135_v55  ;;  %6651 = vmatpush3.bf16.msra.mxu0 %v7136_v56  ;;  %v7156_v55 = vld [vmem:[#allocation10 + $0x1a0] sm:$0xff]   ;;  %v7157_v56 = vld [vmem:[#allocation10 + $0x168] sm:$0xff]  }
 0x4cd   :  { %6658 = vmatprep.subr.bf16.mxu1 %v7137_v57  ;;  %6680 = vmatprep.subr.bf16.mxu0 %v7138_v58  ;;  %v7158_v57 = vld [vmem:[#allocation10 + $0x1e8] sm:$0xff]   ;;  %v7817_v58 = vsub.s32 4, %v7792_v60 }
 0x522   :  { %v1344_v10 = vpop.f32.mrb[4].mxu1  ;;  %v1387_v11 = vpop.f32.mrb[8].mxu0 }
 0x523   :  { %v1345_v12 = vadd.f32 %v1344_v10, %v593_v5  ;;  %v1388_v13 = vadd.f32 %v1387_v11, %v601_v7  ;;  %v1346_v14 = vpop.f32.mrb[5].mxu1  ;;  %v1389_v15 = vpop.f32.mrb[9].mxu0  ;;  %v609_v10 = vrot.slane %v7800_v63, %v7817_v58  ;;  %v617_v11 = vrot.slane %v7800_v63, %v7820_v59 }
 0x524   :  { %v1347_v16 = vadd.f32 %v1346_v14, %v597_v8  ;;  %v1390_v17 = vadd.f32 %v1389_v15, %v605_v9  ;;  %v1348_v18 = vpop.f32.mrb[6].mxu1  ;;  %v1391_v19 = vpop.f32.mrb[10].mxu0 }
 0x525   :  { %v1349_v20 = vadd.f32 %v1348_v18, %v593_v5  ;;  %v1392_v21 = vadd.f32 %v1391_v19, %v601_v7  ;;  %v1350_v24 = vpop.f32.mrb[7].mxu1  ;;  %v1393_v25 = vpop.f32.mrb[11].mxu0  ;;  %v1654_v27 = vmax.f32 %v1345_v12, 0.0  ;;  %v1656_v28 = vmax.f32 %v1388_v13, 0.0  ;;  %v7161_v12 = vld [vmem:[#allocation10 + $0x170] sm:$0xff]  }
 0x526   :  { %v1351_v6 = vadd.f32 %v1350_v24, %v597_v8  ;;  %v1394_v26 = vadd.f32 %v1393_v25, %v605_v9  ;;  %v1655_v31 = vmax.f32 %v1347_v16, 0.0  ;;  %v1657_v32 = vmax.f32 %v1390_v17, 0.0  ;;  %v7159_v8 = vld [vmem:[#allocation10 + $0x128] sm:$0xff]   ;;  %v7162_v13 = vld [vmem:[#allocation10 + $0x1f0] sm:$0xff]   ;;  %v7165_v25 = vld [vmem:[#allocation10 + $0x178] sm:$0xff]  }
 0x527   :  { %v1670_v29 = vmax.f32 %v1349_v20, 0.0  ;;  %v1672_v30 = vmax.f32 %v1392_v21, 0.0  ;;  %v7823_v5 = vsub.s32 5, %v7792_v60  ;;  %v7826_v7 = vsub.s32 7, %v7792_v60  ;;  %v7160_v9 = vld [vmem:[#allocation10 + $0x1a8] sm:$0xff]   ;;  %v7163_v17 = vld [vmem:[#allocation10 + $0x130] sm:$0xff]  }
 0x528   :  { %v1671_v33 = vmax.f32 %v1351_v6, 0.0  ;;  %v1673_v34 = vmax.f32 %v1394_v26, 0.0  ;;  %v7164_v18 = vld [vmem:[#allocation10 + $0x1b0] sm:$0xff]   ;;  %v7166_v6 = vld [vmem:[#allocation10 + $0x1f8] sm:$0xff]  }
 0x529   :  { %v1686_v35 = vpack.c.bf16 %v1670_v29, %v1654_v27  ;;  %v1688_v36 = vpack.c.bf16 %v1672_v30, %v1656_v28  ;;  %v613_v14 = vrot.slane %v7800_v63, %v7823_v5  ;;  %v621_v60 = vrot.slane %v7800_v63, %v7826_v7 }
 0x52a   :  { %v1687_v37 = vpack.c.bf16 %v1671_v33, %v1655_v31  ;;  %v1689_v38 = vpack.c.bf16 %v1673_v34, %v1657_v32 }
 0x52c   :  { %2762 = vmatprep.mubr.bf16.mxu1 %v1687_v37  ;;  %2803 = vmatprep.mubr.bf16.mxu0 %v1689_v38 }
 0x52d   :  { %2763 = vmatmul.mubr.bf16.vlgmr.msra.gmra.mrb[20].mxu1 %v1686_v35  ;;  %2804 = vmatmul.mubr.bf16.vlgmr.msra.gmra.mrb[24].mxu0 %v1688_v36  ;;  %v7167_v35 = vld [vmem:[#allocation10 + $0x138] sm:$0xff]  }
 0x52e   :  { %6659 = vmatpush3.bf16.msra.mxu1 %v7139_v39  ;;  %6681 = vmatpush3.bf16.msra.mxu0 %v7140_v40  ;;  %v7168_v36 = vld [vmem:[#allocation10 + $0x1b8] sm:$0xff]  }
 0x52f   :  { %6660 = vmatprep.subr.bf16.mxu1 %v7141_v23  ;;  %6682 = vmatprep.subr.bf16.mxu0 %v7142_v41  ;;  %v7169_v23 = vld [vmem:[#allocation10 + $0x240] sm:$0xff]  }
 0x530   :  { %v7170_v41 = vld [vmem:[#allocation10 + $0x2c0] sm:$0xff]  }
 0x532   :  { %6661 = vmatpush3.bf16.msra.mxu1 %v7143_v42  ;;  %6683 = vmatpush3.bf16.msra.mxu0 %v7144_v43 }
 0x533   :  { %6662 = vmatprep.subr.bf16.mxu1 %v7145_v44  ;;  %6684 = vmatprep.subr.bf16.mxu0 %v7146_v45 }
 0x536   :  { %6663 = vmatpush3.bf16.msra.mxu1 %v7147_v46  ;;  %6685 = vmatpush3.bf16.msra.mxu0 %v7148_v47 }
 0x537   :  { %6664 = vmatprep.subr.bf16.mxu1 %v7149_v48  ;;  %6686 = vmatprep.subr.bf16.mxu0 %v7150_v49 }
 0x53a   :  { %6665 = vmatpush3.bf16.msra.mxu1 %v7151_v50  ;;  %6687 = vmatpush3.bf16.msra.mxu0 %v7152_v51  ;;  %v7171_v50 = vld [vmem:[#allocation10 + $0x200] sm:$0xff]  }
 0x53b   :  { %6666 = vmatprep.subr.bf16.mxu1 %v7153_v52  ;;  %6688 = vmatprep.subr.bf16.mxu0 %v7154_v53  ;;  %v7172_v51 = vld [vmem:[#allocation10 + $0x280] sm:$0xff]   ;;  %v7173_v52 = vld [vmem:[#allocation10 + $0x248] sm:$0xff]  }
 0x53c   :  { %v7174_v53 = vld [vmem:[#allocation10 + $0x2c8] sm:$0xff]  }
 0x53e   :  { %6667 = vmatpush3.bf16.msra.mxu1 %v7155_v54  ;;  %6689 = vmatpush3.bf16.msra.mxu0 %v7156_v55  ;;  %v7175_v54 = vld [vmem:[#allocation10 + $0x208] sm:$0xff]  }
 0x53f   :  { %6668 = vmatprep.subr.bf16.mxu1 %v7157_v56  ;;  %6690 = vmatprep.subr.bf16.mxu0 %v7158_v57  ;;  %v7176_v55 = vld [vmem:[#allocation10 + $0x288] sm:$0xff]   ;;  %v7177_v56 = vld [vmem:[#allocation10 + $0x250] sm:$0xff]  }
 0x540   :  { %v7178_v57 = vld [vmem:[#allocation10 + $0x2d0] sm:$0xff]  }
 0x542   :  { %v1430_v15 = vpop.f32.mrb[8].mxu1  ;;  %v1473_v16 = vpop.f32.mrb[12].mxu0  ;;  %6669 = vmatpush3.bf16.msra.mxu1 %v7159_v8  ;;  %6691 = vmatpush3.bf16.msra.mxu0 %v7160_v9  ;;  %v7179_v8 = vld [vmem:[#allocation10 + $0x210] sm:$0xff]  }
 0x543   :  { %v1431_v19 = vadd.f32 %v1430_v15, %v609_v10  ;;  %v1474_v20 = vadd.f32 %v1473_v16, %v617_v11  ;;  %v1432_v21 = vpop.f32.mrb[9].mxu1  ;;  %v1475_v24 = vpop.f32.mrb[13].mxu0  ;;  %6670 = vmatprep.subr.bf16.mxu1 %v7161_v12  ;;  %6692 = vmatprep.subr.bf16.mxu0 %v7162_v13  ;;  %v7180_v9 = vld [vmem:[#allocation10 + $0x290] sm:$0xff]   ;;  %v7183_v12 = vld [vmem:[#allocation10 + $0x218] sm:$0xff]   ;;  %v7187_v15 = vld [vmem:[#allocation10 + $0x220] sm:$0xff]  }
 0x544   :  { %v1433_v26 = vadd.f32 %v1432_v21, %v613_v14  ;;  %v1476_v27 = vadd.f32 %v1475_v24, %v621_v60  ;;  %v1434_v28 = vpop.f32.mrb[10].mxu1  ;;  %v1477_v29 = vpop.f32.mrb[14].mxu0  ;;  %v7184_v13 = vld [vmem:[#allocation10 + $0x298] sm:$0xff]   ;;  %v7188_v16 = vld [vmem:[#allocation10 + $0x2a0] sm:$0xff]   ;;  %v7192_v21 = vld [vmem:[#allocation10 + $0x2a8] sm:$0xff]  }
 0x545   :  { %v1435_v30 = vadd.f32 %v1434_v28, %v609_v10  ;;  %v1478_v63 = vadd.f32 %v1477_v29, %v617_v11  ;;  %v1436_v31 = vpop.f32.mrb[11].mxu1  ;;  %v1479_v32 = vpop.f32.mrb[15].mxu0  ;;  %v1658_v37 = vmax.f32 %v1431_v19, 0.0  ;;  %v1660_v38 = vmax.f32 %v1474_v20, 0.0  ;;  %v7181_v10 = vld [vmem:[#allocation10 + $0x258] sm:$0xff]   ;;  %v7191_v20 = vld [vmem:[#allocation10 + $0x228] sm:$0xff]  }
 0x546   :  { %v1437_v33 = vadd.f32 %v1436_v31, %v613_v14  ;;  %v1480_v34 = vadd.f32 %v1479_v32, %v621_v60  ;;  %6671 = vmatpush3.bf16.msra.mxu1 %v7163_v17  ;;  %6693 = vmatpush3.bf16.msra.mxu0 %v7164_v18  ;;  %v1659_v42 = vmax.f32 %v1433_v26, 0.0  ;;  %v1661_v43 = vmax.f32 %v1476_v27, 0.0  ;;  %v7182_v11 = vld [vmem:[#allocation10 + $0x2d8] sm:$0xff]   ;;  %v7185_v14 = vld [vmem:[#allocation10 + $0x260] sm:$0xff]   ;;  %v7189_v17 = vld [vmem:[#allocation10 + $0x268] sm:$0xff]  }
 0x547   :  { %v1674_v39 = vmax.f32 %v1435_v30, 0.0  ;;  %v1676_v40 = vmax.f32 %v1478_v63, 0.0  ;;  %6672 = vmatprep.subr.bf16.mxu1 %v7165_v25  ;;  %6694 = vmatprep.subr.bf16.mxu0 %v7166_v6  ;;  %v7186_v60 = vld [vmem:[#allocation10 + $0x2e0] sm:$0xff]   ;;  %v7190_v18 = vld [vmem:[#allocation10 + $0x2e8] sm:$0xff]   ;;  %v7836_v19 = vld [vmem:[#allocation12 + $0x10] ss:$2 sm:$0xff] }
 0x548   :  { %v1675_v44 = vmax.f32 %v1437_v33, 0.0  ;;  %v1677_v45 = vmax.f32 %v1480_v34, 0.0  ;;  %v625_v24 = vrot.slane %v7836_v19, %v7795_v61  ;;  %v633_v25 = vrot.slane %v7836_v19, %v7798_v62  ;;  %v7193_v6 = vld [vmem:[#allocation10 + $0x270] sm:$0xff]  }
 0x549   :  { %v1690_v46 = vpack.c.bf16 %v1674_v39, %v1658_v37  ;;  %v1692_v47 = vpack.c.bf16 %v1676_v40, %v1660_v38  ;;  %v7194_v26 = vld [vmem:[#allocation10 + $0x2f0] sm:$0xff]   ;;  %v629_v27 = vrot.slane %v7836_v19, %v7803_v3  ;;  %v637_v28 = vrot.slane %v7836_v19, %v7806_v4  ;;  %v7198_v37 = vld [vmem:[#allocation10 + $0x2f8] sm:$0xff]  }
 0x54a   :  { %v1691_v48 = vpack.c.bf16 %v1675_v44, %v1659_v42  ;;  %v1693_v49 = vpack.c.bf16 %v1677_v45, %v1661_v43  ;;  %6673 = vmatpush3.bf16.msra.mxu1 %v7167_v35  ;;  %6695 = vmatpush3.bf16.msra.mxu0 %v7168_v36  ;;  %v7195_v63 = vld [vmem:[#allocation10 + $0x230] sm:$0xff]   ;;  %v7197_v36 = vld [vmem:[#allocation10 + $0x278] sm:$0xff]  }
 0x54b   :  { %6702 = vmatprep.subr.bf16.mxu1 %v7169_v23  ;;  %6724 = vmatprep.subr.bf16.mxu0 %v7170_v41  ;;  %v7196_v31 = vld [vmem:[#allocation10 + $0x2b0] sm:$0xff]  }
 0x54c   :  { %2844 = vmatprep.mubr.bf16.mxu1 %v1691_v48  ;;  %2885 = vmatprep.mubr.bf16.mxu0 %v1693_v49  ;;  %v7200_v48 = vld [vmem:[#allocation10 + $0x2b8] sm:$0xff]  }
 0x54d   :  { %2845 = vmatmul.mubr.bf16.vlgmr.msra.gmra.mrb[24].mxu1 %v1690_v46  ;;  %2886 = vmatmul.mubr.bf16.vlgmr.msra.gmra.mrb[28].mxu0 %v1692_v47  ;;  %v7199_v47 = vld [vmem:[#allocation10 + $0x238] sm:$0xff]  }
 0x54e   :  { %6703 = vmatpush3.bf16.msra.mxu1 %v7171_v50  ;;  %6725 = vmatpush3.bf16.msra.mxu0 %v7172_v51 }
 0x54f   :  { %6704 = vmatprep.subr.bf16.mxu1 %v7173_v52  ;;  %6726 = vmatprep.subr.bf16.mxu0 %v7174_v53  ;;  %v7201_v53 = vld [vmem:[#allocation10 + $0x340] sm:$0xff]  }
 0x552   :  { %6705 = vmatpush3.bf16.msra.mxu1 %v7175_v54  ;;  %6727 = vmatpush3.bf16.msra.mxu0 %v7176_v55  ;;  %v7202_v54 = vld [vmem:[#allocation10 + $0x3c0] sm:$0xff]  }
 0x553   :  { %6706 = vmatprep.subr.bf16.mxu1 %v7177_v56  ;;  %6728 = vmatprep.subr.bf16.mxu0 %v7178_v57 }
 0x556   :  { %6707 = vmatpush3.bf16.msra.mxu1 %v7179_v8  ;;  %6729 = vmatpush3.bf16.msra.mxu0 %v7180_v9 }
 0x557   :  { %6708 = vmatprep.subr.bf16.mxu1 %v7181_v10  ;;  %6730 = vmatprep.subr.bf16.mxu0 %v7182_v11 }
 0x55a   :  { %6709 = vmatpush3.bf16.msra.mxu1 %v7183_v12  ;;  %6731 = vmatpush3.bf16.msra.mxu0 %v7184_v13  ;;  %v7203_v13 = vld [vmem:[#allocation10 + $0x300] sm:$0xff]  }
 0x55b   :  { %6710 = vmatprep.subr.bf16.mxu1 %v7185_v14  ;;  %6732 = vmatprep.subr.bf16.mxu0 %v7186_v60  ;;  %v7204_v14 = vld [vmem:[#allocation10 + $0x380] sm:$0xff]   ;;  %v7205_v60 = vld [vmem:[#allocation10 + $0x348] sm:$0xff]  }
 0x55e   :  { %6711 = vmatpush3.bf16.msra.mxu1 %v7187_v15  ;;  %6733 = vmatpush3.bf16.msra.mxu0 %v7188_v16  ;;  %v7206_v15 = vld [vmem:[#allocation10 + $0x3c8] sm:$0xff]  }
 0x55f   :  { %6712 = vmatprep.subr.bf16.mxu1 %v7189_v17  ;;  %6734 = vmatprep.subr.bf16.mxu0 %v7190_v18  ;;  %v7207_v16 = vld [vmem:[#allocation10 + $0x308] sm:$0xff]   ;;  %v7209_v18 = vld [vmem:[#allocation10 + $0x350] sm:$0xff]  }
 0x560   :  { %v7208_v17 = vld [vmem:[#allocation10 + $0x388] sm:$0xff]  }
 0x562   :  { %v1516_v29 = vpop.f32.mrb[12].mxu1  ;;  %v1559_v30 = vpop.f32.mrb[16].mxu0  ;;  %6713 = vmatpush3.bf16.msra.mxu1 %v7191_v20  ;;  %6735 = vmatpush3.bf16.msra.mxu0 %v7192_v21  ;;  %v7210_v20 = vld [vmem:[#allocation10 + $0x3d0] sm:$0xff]  }
 0x563   :  { %v1517_v32 = vadd.f32 %v1516_v29, %v625_v24  ;;  %v1560_v33 = vadd.f32 %v1559_v30, %v633_v25  ;;  %v1518_v34 = vpop.f32.mrb[13].mxu1  ;;  %v1561_v35 = vpop.f32.mrb[17].mxu0  ;;  %6714 = vmatprep.subr.bf16.mxu1 %v7193_v6  ;;  %6736 = vmatprep.subr.bf16.mxu0 %v7194_v26  ;;  %v7211_v21 = vld [vmem:[#allocation10 + $0x310] sm:$0xff]   ;;  %v7214_v6 = vld [vmem:[#allocation10 + $0x3d8] sm:$0xff]   ;;  %v7218_v29 = vld [vmem:[#allocation10 + $0x3e0] sm:$0xff]  }
 0x564   :  { %v1519_v38 = vadd.f32 %v1518_v34, %v629_v27  ;;  %v1562_v39 = vadd.f32 %v1561_v35, %v637_v28  ;;  %v1520_v40 = vpop.f32.mrb[14].mxu1  ;;  %v1563_v23 = vpop.f32.mrb[18].mxu0  ;;  %v7215_v26 = vld [vmem:[#allocation10 + $0x318] sm:$0xff]   ;;  %v7219_v30 = vld [vmem:[#allocation10 + $0x320] sm:$0xff]   ;;  %v7224_v34 = vld [vmem:[#allocation10 + $0x3a8] sm:$0xff]   ;;  %v641_v35 = vrot.slane %v7836_v19, %v7817_v58 }
 0x565   :  { %v1521_v41 = vadd.f32 %v1520_v40, %v625_v24  ;;  %v1564_v42 = vadd.f32 %v1563_v23, %v633_v25  ;;  %v1522_v43 = vpop.f32.mrb[15].mxu1  ;;  %v1565_v44 = vpop.f32.mrb[19].mxu0  ;;  %v1662_v49 = vmax.f32 %v1517_v32, 0.0  ;;  %v1664_v50 = vmax.f32 %v1560_v33, 0.0  ;;  %v7212_v24 = vld [vmem:[#allocation10 + $0x390] sm:$0xff]   ;;  %v7213_v25 = vld [vmem:[#allocation10 + $0x358] sm:$0xff]  }
 0x566   :  { %v1523_v45 = vadd.f32 %v1522_v43, %v629_v27  ;;  %v1566_v46 = vadd.f32 %v1565_v44, %v637_v28  ;;  %6715 = vmatpush3.bf16.msra.mxu1 %v7195_v63  ;;  %6737 = vmatpush3.bf16.msra.mxu0 %v7196_v31  ;;  %v1663_v55 = vmax.f32 %v1519_v38, 0.0  ;;  %v1665_v56 = vmax.f32 %v1562_v39, 0.0  ;;  %v7216_v27 = vld [vmem:[#allocation10 + $0x398] sm:$0xff]   ;;  %v7217_v28 = vld [vmem:[#allocation10 + $0x360] sm:$0xff]   ;;  %v7221_v31 = vld [vmem:[#allocation10 + $0x368] sm:$0xff]  }
 0x567   :  { %v1678_v51 = vmax.f32 %v1521_v41, 0.0  ;;  %v1680_v52 = vmax.f32 %v1564_v42, 0.0  ;;  %6716 = vmatprep.subr.bf16.mxu1 %v7197_v36  ;;  %6738 = vmatprep.subr.bf16.mxu0 %v7198_v37  ;;  %v7220_v63 = vld [vmem:[#allocation10 + $0x3a0] sm:$0xff]   ;;  %v7222_v32 = vld [vmem:[#allocation10 + $0x3e8] sm:$0xff]   ;;  %v649_v36 = vrot.slane %v7836_v19, %v7820_v59  ;;  %v7225_v37 = vld [vmem:[#allocation10 + $0x370] sm:$0xff]   ;;  %v645_v39 = vrot.slane %v7836_v19, %v7823_v5 }
 0x568   :  { %v1679_v57 = vmax.f32 %v1523_v45, 0.0  ;;  %v1681_v8 = vmax.f32 %v1566_v46, 0.0  ;;  %v7223_v33 = vld [vmem:[#allocation10 + $0x328] sm:$0xff]   ;;  %v7226_v38 = vld [vmem:[#allocation10 + $0x3f0] sm:$0xff]   ;;  %v653_v40 = vrot.slane %v7836_v19, %v7826_v7 }
 0x569   :  { %v1694_v9 = vpack.c.bf16 %v1678_v51, %v1662_v49  ;;  %v1696_v10 = vpack.c.bf16 %v1680_v52, %v1664_v50  ;;  %v7227_v42 = vld [vmem:[#allocation10 + $0x330] sm:$0xff]   ;;  %v7230_v49 = vld [vmem:[#allocation10 + $0x3f8] sm:$0xff]  }
 0x56a   :  { %v1695_v11 = vpack.c.bf16 %v1679_v57, %v1663_v55  ;;  %v1697_v12 = vpack.c.bf16 %v1681_v8, %v1665_v56  ;;  %6717 = vmatpush3.bf16.msra.mxu1 %v7199_v47  ;;  %6739 = vmatpush3.bf16.msra.mxu0 %v7200_v48  ;;  %v7228_v43 = vld [vmem:[#allocation10 + $0x3b0] sm:$0xff]   ;;  %v7229_v48 = vld [vmem:[#allocation10 + $0x378] sm:$0xff]  }
 0x56b   :  { %6746 = vmatprep.subr.bf16.mxu1 %v7201_v53  ;;  %6768 = vmatprep.subr.bf16.mxu0 %v7202_v54 }
 0x56c   :  { %2926 = vmatprep.mubr.bf16.mxu1 %v1695_v11  ;;  %2967 = vmatprep.mubr.bf16.mxu0 %v1697_v12 }
 0x56d   :  { %2927 = vmatmul.mubr.bf16.vlgmr.msra.gmra.mrb[28].mxu1 %v1694_v9  ;;  %2968 = vmatmul.mubr.bf16.vlgmr.msra.gmra.mrb[32].mxu0 %v1696_v10  ;;  %v7231_v9 = vld [vmem:[#allocation10 + $0x338] sm:$0xff]  }
 0x56e   :  { %6747 = vmatpush3.bf16.msra.mxu1 %v7203_v13  ;;  %6769 = vmatpush3.bf16.msra.mxu0 %v7204_v14  ;;  %v7232_v10 = vld [vmem:[#allocation10 + $0x3b8] sm:$0xff]  }
 0x56f   :  { %6748 = vmatprep.subr.bf16.mxu1 %v7205_v60  ;;  %6770 = vmatprep.subr.bf16.mxu0 %v7206_v15 }
 0x572   :  { %6749 = vmatpush3.bf16.msra.mxu1 %v7207_v16  ;;  %6771 = vmatpush3.bf16.msra.mxu0 %v7208_v17 }
 0x573   :  { %6750 = vmatprep.subr.bf16.mxu1 %v7209_v18  ;;  %6772 = vmatprep.subr.bf16.mxu0 %v7210_v20 }
 0x576   :  { %6751 = vmatpush3.bf16.msra.mxu1 %v7211_v21  ;;  %6773 = vmatpush3.bf16.msra.mxu0 %v7212_v24 }
 0x577   :  { %6752 = vmatprep.subr.bf16.mxu1 %v7213_v25  ;;  %6774 = vmatprep.subr.bf16.mxu0 %v7214_v6 }
 0x57a   :  { %6753 = vmatpush3.bf16.msra.mxu1 %v7215_v26  ;;  %6775 = vmatpush3.bf16.msra.mxu0 %v7216_v27  ;;  %v6181_v26 = vld [vmem:[%s7997_s7 + $0x5] ss:$0 sm:$0xff] }
 0x57b   :  { %6754 = vmatprep.subr.bf16.mxu1 %v7217_v28  ;;  %6776 = vmatprep.subr.bf16.mxu0 %v7218_v29 }
 0x57e   :  { %6755 = vmatpush3.bf16.msra.mxu1 %v7219_v30  ;;  %6777 = vmatpush3.bf16.msra.mxu0 %v7220_v63 }
 0x57f   :  { %6756 = vmatprep.subr.bf16.mxu1 %v7221_v31  ;;  %6778 = vmatprep.subr.bf16.mxu0 %v7222_v32 }
 0x582   :  { %v1602_v23 = vpop.f32.mrb[16].mxu1  ;;  %v1645_v41 = vpop.f32.mrb[20].mxu0  ;;  %6757 = vmatpush3.bf16.msra.mxu1 %v7223_v33  ;;  %6779 = vmatpush3.bf16.msra.mxu0 %v7224_v34 }
 0x583   :  { %v1603_v44 = vadd.f32 %v1602_v23, %v641_v35  ;;  %v1646_v45 = vadd.f32 %v1645_v41, %v649_v36  ;;  %v1604_v46 = vpop.f32.mrb[17].mxu1  ;;  %v1647_v47 = vpop.f32.mrb[21].mxu0  ;;  %6758 = vmatprep.subr.bf16.mxu1 %v7225_v37  ;;  %6780 = vmatprep.subr.bf16.mxu0 %v7226_v38 }
 0x584   :  { %v1605_v50 = vadd.f32 %v1604_v46, %v645_v39  ;;  %v1648_v51 = vadd.f32 %v1647_v47, %v653_v40  ;;  %v1606_v52 = vpop.f32.mrb[18].mxu1  ;;  %v1649_v53 = vpop.f32.mrb[22].mxu0 }
 0x585   :  { %v1607_v54 = vadd.f32 %v1606_v52, %v641_v35  ;;  %v1650_v19 = vadd.f32 %v1649_v53, %v649_v36  ;;  %v1608_v55 = vpop.f32.mrb[19].mxu1  ;;  %v1651_v56 = vpop.f32.mrb[23].mxu0  ;;  %v1666_v11 = vmax.f32 %v1603_v44, 0.0  ;;  %v1668_v12 = vmax.f32 %v1646_v45, 0.0 }
 0x586   :  { %v1609_v57 = vadd.f32 %v1608_v55, %v645_v39  ;;  %v1652_v8 = vadd.f32 %v1651_v56, %v653_v40  ;;  %6759 = vmatpush3.bf16.msra.mxu1 %v7227_v42  ;;  %6781 = vmatpush3.bf16.msra.mxu0 %v7228_v43  ;;  %v1667_v60 = vmax.f32 %v1605_v50, 0.0  ;;  %v1669_v15 = vmax.f32 %v1648_v51, 0.0 }
 0x587   :  { %v1682_v13 = vmax.f32 %v1607_v54, 0.0  ;;  %v1684_v14 = vmax.f32 %v1650_v19, 0.0  ;;  %6760 = vmatprep.subr.bf16.mxu1 %v7229_v48  ;;  %6782 = vmatprep.subr.bf16.mxu0 %v7230_v49 }
 0x588   :  { %v1683_v16 = vmax.f32 %v1609_v57, 0.0  ;;  %v1685_v17 = vmax.f32 %v1652_v8, 0.0 }
 0x589   :  { %v1698_v18 = vpack.c.bf16 %v1682_v13, %v1666_v11  ;;  %v1700_v20 = vpack.c.bf16 %v1684_v14, %v1668_v12 }
 0x58a   :  { %v1699_v21 = vpack.c.bf16 %v1683_v16, %v1667_v60  ;;  %v1701_v24 = vpack.c.bf16 %v1685_v17, %v1669_v15  ;;  %6761 = vmatpush3.bf16.msra.mxu1 %v7231_v9  ;;  %6783 = vmatpush3.bf16.msra.mxu0 %v7232_v10 }
 0x58b   :  { %7032 = vmatprep.subr.bf16.mxu1 %v7567_v0  ;;  %7052 = vmatprep.subr.bf16.mxu0 %v7567_v0 }
 0x58c   :  { %3008 = vmatprep.mubr.bf16.mxu1 %v1699_v21  ;;  %3049 = vmatprep.mubr.bf16.mxu0 %v1701_v24 }
 0x58d   :  { %3009 = vmatmul.mubr.bf16.vlgmr.msra.gmra.mrb[32].mxu1 %v1698_v18  ;;  %3050 = vmatmul.mubr.bf16.vlgmr.msra.gmra.mrb[36].mxu0 %v1700_v20 }
 0x58e   :  { %7048 = vmatprep.mubr.msk.bf16.mxu1 %vm7568_vm0, %v7567_v0  ;;  %7068 = vmatprep.mubr.msk.bf16.mxu0 %vm7568_vm0, %v7567_v0 }
 0x600   :  { %v6630_v25 = vpop.f32.mrb[20].mxu1  ;;  %v6652_v6 = vpop.f32.mrb[24].mxu0 }
 0x601   :  { %v6631_v27 = vpop.f32.mrb[21].mxu1  ;;  %v6653_v28 = vpop.f32.mrb[25].mxu0 }
 0x602   :  { %v6632_v29 = vadd.f32 %v6631_v27, %v6630_v25  ;;  %v6654_v30 = vadd.f32 %v6653_v28, %v6652_v6  ;;  %v6633_v63 = vpop.f32.mrb[22].mxu1  ;;  %v6655_v31 = vpop.f32.mrb[26].mxu0 }
 0x603   :  { %v6634_v32 = vpop.f32.mrb[23].mxu1  ;;  %v6656_v33 = vpop.f32.mrb[27].mxu0 }
 0x604   :  { %v2765_v34 = vadd.f32 %v6632_v29, %v6181_v26  ;;  %v6635_v35 = vadd.f32 %v6634_v32, %v6633_v63  ;;  %v6657_v36 = vadd.f32 %v6656_v33, %v6655_v31 }
 0x606   :  { %v2806_v37 = vadd.f32 %v6654_v30, %v2765_v34  ;;  %v2768_v38 = vadd.f32 %v6635_v35, %v6181_v26 }
 0x608   :  { %v2809_v39 = vadd.f32 %v6657_v36, %v2768_v38  ;;  %v7233_v38 = vld [vmem:[#allocation6 + $0x40] sm:$0xff]  }
 0x609   :  { %7033 = vmatpush3.bf16.msra.mxu1 %v7233_v38 }
 0x60a   :  { %7034 = vmatprep.subr.bf16.mxu1 %v7567_v0 }
 0x620   :  { %v6674_v40 = vpop.f32.mrb[24].mxu1  ;;  %v6696_v23 = vpop.f32.mrb[28].mxu0 }
 0x621   :  { %v6675_v41 = vpop.f32.mrb[25].mxu1  ;;  %v6697_v42 = vpop.f32.mrb[29].mxu0 }
 0x622   :  { %v6676_v43 = vadd.f32 %v6675_v41, %v6674_v40  ;;  %v6698_v44 = vadd.f32 %v6697_v42, %v6696_v23  ;;  %v6677_v45 = vpop.f32.mrb[26].mxu1  ;;  %v6699_v46 = vpop.f32.mrb[30].mxu0 }
 0x623   :  { %v6678_v47 = vpop.f32.mrb[27].mxu1  ;;  %v6700_v48 = vpop.f32.mrb[31].mxu0 }
 0x624   :  { %v2847_v49 = vadd.f32 %v6676_v43, %v2806_v37  ;;  %v6679_v50 = vadd.f32 %v6678_v47, %v6677_v45  ;;  %v6701_v51 = vadd.f32 %v6700_v48, %v6699_v46  ;;  %v7236_v46 = vld [vmem:[#allocation6 + $0x58] sm:$0xff]   ;;  %v7237_v47 = vld [vmem:[#allocation6 + $0x60] sm:$0xff]   ;;  %v7238_v48 = vld [vmem:[#allocation6 + $0x68] sm:$0xff]  }
 0x626   :  { %v2888_v52 = vadd.f32 %v6698_v44, %v2847_v49  ;;  %v2850_v53 = vadd.f32 %v6679_v50, %v2809_v39  ;;  %v7234_v39 = vld [vmem:[#allocation6 + $0x48] sm:$0xff]   ;;  %v7239_v49 = vld [vmem:[#allocation6 + $0x70] sm:$0xff]   ;;  %v7240_v50 = vld [vmem:[#allocation6 + $0x78] sm:$0xff]  }
 0x627   :  { %7035 = vmatpush3.bf16.msra.mxu1 %v7234_v39 }
 0x628   :  { %v2891_v54 = vadd.f32 %v6701_v51, %v2850_v53  ;;  %7036 = vmatprep.subr.bf16.mxu1 %v7567_v0  ;;  %v7241_v51 = vld [vmem:[#allocation7 + $0x40] sm:$0xff]   ;;  %v7243_v53 = vld [vmem:[#allocation7 + $0x50] sm:$0xff]  }
 0x629   :  { %7053 = vmatpush3.bf16.msra.mxu0 %v7241_v51 }
 0x62a   :  { %7054 = vmatprep.subr.bf16.mxu0 %v7567_v0 }
 0x640   :  { %v6718_v19 = vpop.f32.mrb[28].mxu1  ;;  %v6740_v55 = vpop.f32.mrb[32].mxu0 }
 0x641   :  { %v6719_v56 = vpop.f32.mrb[29].mxu1  ;;  %v6741_v57 = vpop.f32.mrb[33].mxu0 }
 0x642   :  { %v6720_v8 = vadd.f32 %v6719_v56, %v6718_v19  ;;  %v6742_v9 = vadd.f32 %v6741_v57, %v6740_v55  ;;  %v6721_v10 = vpop.f32.mrb[30].mxu1  ;;  %v6743_v11 = vpop.f32.mrb[34].mxu0  ;;  %v7245_v19 = vld [vmem:[#allocation7 + $0x60] sm:$0xff]   ;;  %v7246_v55 = vld [vmem:[#allocation7 + $0x68] sm:$0xff]  }
 0x643   :  { %v6722_v12 = vpop.f32.mrb[31].mxu1  ;;  %v6744_v13 = vpop.f32.mrb[35].mxu0 }
 0x644   :  { %v2929_v14 = vadd.f32 %v6720_v8, %v2888_v52  ;;  %v6723_v60 = vadd.f32 %v6722_v12, %v6721_v10  ;;  %v6745_v15 = vadd.f32 %v6744_v13, %v6743_v11  ;;  %v7242_v52 = vld [vmem:[#allocation7 + $0x48] sm:$0xff]  }
 0x645   :  { %7055 = vmatpush3.bf16.msra.mxu0 %v7242_v52  ;;  %v6310_v13 = vld [vmem:[%s7997_s7 + $0x6] ss:$0 sm:$0xff] }
 0x646   :  { %v2970_v16 = vadd.f32 %v6742_v9, %v2929_v14  ;;  %v2932_v17 = vadd.f32 %v6723_v60, %v2891_v54  ;;  %7056 = vmatprep.subr.bf16.mxu0 %v7567_v0  ;;  %v7244_v54 = vld [vmem:[#allocation7 + $0x58] sm:$0xff]  }
 0x648   :  { %v2973_v18 = vadd.f32 %v6745_v15, %v2932_v17  ;;  %v6311_v17 = vld [vmem:[%s7997_s7 + $0x7] ss:$0 sm:$0xff] }
 0x649   :  { %7057 = vmatpush3.bf16.msra.mxu0 %v7243_v53 }
 0x64a   :  { %7058 = vmatprep.subr.bf16.mxu0 %v7567_v0 }
 0x64d   :  { %7059 = vmatpush3.bf16.msra.mxu0 %v7244_v54 }
 0x64e   :  { %7060 = vmatprep.subr.bf16.mxu0 %v7567_v0 }
 0x651   :  { %7061 = vmatpush3.bf16.msra.mxu0 %v7245_v19 }
 0x652   :  { %7062 = vmatprep.subr.bf16.mxu0 %v7567_v0 }
 0x655   :  { %7063 = vmatpush3.bf16.msra.mxu0 %v7246_v55 }
 0x656   :  { %7064 = vmatprep.subr.bf16.mxu0 %v7567_v0 }
 0x660   :  { %v6762_v20 = vpop.f32.mrb[32].mxu1  ;;  %v6784_v21 = vpop.f32.mrb[36].mxu0 }
 0x661   :  { %v6763_v24 = vpop.f32.mrb[33].mxu1  ;;  %v6785_v25 = vpop.f32.mrb[37].mxu0 }
 0x662   :  { %v6764_v6 = vadd.f32 %v6763_v24, %v6762_v20  ;;  %v6786_v26 = vadd.f32 %v6785_v25, %v6784_v21  ;;  %v6765_v27 = vpop.f32.mrb[34].mxu1  ;;  %v6787_v28 = vpop.f32.mrb[38].mxu0  ;;  %v7247_v25 = vld [vmem:[#allocation7 + $0x70] sm:$0xff]  }
 0x663   :  { %v6766_v29 = vpop.f32.mrb[35].mxu1  ;;  %v6788_v30 = vpop.f32.mrb[39].mxu0  ;;  %7065 = vmatpush3.bf16.msra.mxu0 %v7247_v25  ;;  %v3422_v25 = vld [vmem:[#allocation9 + $0x5c8] sm:$0xff] }
 0x664   :  { %v3011_v63 = vadd.f32 %v6764_v6, %v2970_v16  ;;  %v6767_v31 = vadd.f32 %v6766_v29, %v6765_v27  ;;  %v6789_v32 = vadd.f32 %v6788_v30, %v6787_v28  ;;  %7066 = vmatprep.subr.bf16.mxu0 %v7567_v0  ;;  %v7248_v6 = vld [vmem:[#allocation7 + $0x78] sm:$0xff]  }
 0x666   :  { %v3052_v33 = vadd.f32 %v6786_v26, %v3011_v63  ;;  %v3014_v34 = vadd.f32 %v6767_v31, %v2973_v18  ;;  %v6312_v26 = vld [vmem:[%s7997_s7 + $0x8] ss:$0 sm:$0xff] }
 0x667   :  { %7067 = vmatpush3.bf16.msra.mxu0 %v7248_v6 }
 0x668   :  { %v3055_v35 = vadd.f32 %v6789_v32, %v3014_v34  ;;  %v3058_v36 = vadd.f32 %v3052_v33, %v7770_v22 }
 0x66a   :  { %3060 = vadd.xlane.f32.xlu0 %v3058_v36  ;;  %v3059_v37 = vadd.f32 %v3055_v35, %v7772_v2  ;;  %v7235_v2 = vld [vmem:[#allocation6 + $0x50] sm:$0xff]  }
 0x66b   :  { %7037 = vmatpush3.bf16.msra.mxu1 %v7235_v2  ;;  %v3389_v2 = vld [vmem:[#allocation9 + $0x4c0] sm:$0xff] }
 0x66c   :  { %3062 = vadd.xlane.f32.xlu1 %v3059_v37  ;;  %7038 = vmatprep.subr.bf16.mxu1 %v7567_v0 }
 0x66f   :  { %7039 = vmatpush3.bf16.msra.mxu1 %v7236_v46 }
 0x670   :  { %7040 = vmatprep.subr.bf16.mxu1 %v7567_v0 }
 0x673   :  { %7041 = vmatpush3.bf16.msra.mxu1 %v7237_v47 }
 0x674   :  { %7042 = vmatprep.subr.bf16.mxu1 %v7567_v0 }
 0x677   :  { %7043 = vmatpush3.bf16.msra.mxu1 %v7238_v48 }
 0x678   :  { %7044 = vmatprep.subr.bf16.mxu1 %v7567_v0 }
 0x67b   :  { %7045 = vmatpush3.bf16.msra.mxu1 %v7239_v49  ;;  %v3382_v49 = vld [vmem:[#allocation9 + $0x488] sm:$0xff] }
 0x67c   :  { %7046 = vmatprep.subr.bf16.mxu1 %v7567_v0  ;;  %v6321_v0 = vld [vmem:[%s7997_s7 + $0x9] ss:$0 sm:$0xff] }
 0x67f   :  { %7047 = vmatpush3.bf16.msra.mxu1 %v7240_v50  ;;  %v3390_v50 = vld [vmem:[#allocation9 + $0x4c8] sm:$0xff] }
 0x680   :  { %v6351_v51 = vcombine.high %v3382_v49, %v3390_v50  ;;  %v6350_v53 = vcombine.low %v3382_v49, %v3390_v50  ;;  %v3478_v49 = vld [vmem:[#allocation9 + $0x788] sm:$0xff] }
 0x6f7   :  { %v3061_v40 = vpop.xlane.xlu0 %3060 }
 0x6f8   :  { %v3064_v23 = vmul.f32 0.0078125, %v3061_v40 }
 0x6f9   :  { %v3063_v41 = vpop.xlane.xlu1 %3062 }
 0x6fa   :  { %v3066_v42 = vsub.f32 %v3058_v36, %v3064_v23  ;;  %v3065_v43 = vmul.f32 0.0078125, %v3063_v41  ;;  %v3365_v23 = vld [vmem:[#allocation9 + $0x400] sm:$0xff] }
 0x6fb   :  { %v3373_v41 = vld [vmem:[#allocation9 + $0x440] sm:$0xff] }
 0x6fc   :  { %v3067_v44 = vsub.f32 %v3059_v37, %v3065_v43  ;;  %v3068_v45 = vmul.f32 %v3066_v42, %v3066_v42  ;;  %v6332_v43 = vcombine.low %v3365_v23, %v3373_v41 }
 0x6fe   :  { %3070 = vadd.xlane.f32.xlu0 %v3068_v45  ;;  %v3069_v22 = vmul.f32 %v3067_v44, %v3067_v44  ;;  %v3374_v45 = vld [vmem:[#allocation9 + $0x448] sm:$0xff] }
 0x700   :  { %3072 = vadd.xlane.f32.xlu1 %v3069_v22  ;;  %v3381_v22 = vld [vmem:[#allocation9 + $0x480] sm:$0xff] }
 0x701   :  { %v6349_v48 = vcombine.high %v3381_v22, %v3389_v2  ;;  %v6348_v52 = vcombine.low %v3381_v22, %v3389_v2 }
 0x78b   :  { %v3071_v56 = vpop.xlane.xlu0 %3070 }
 0x78c   :  { %v3074_v57 = vmul.f32 0.0078125, %v3071_v56 }
 0x78d   :  { %v3073_v8 = vpop.xlane.xlu1 %3072 }
 0x78e   :  { %v3076_v9 = vadd.f32 1e-05, %v3074_v57  ;;  %v3075_v10 = vmul.f32 0.0078125, %v3073_v8 }
 0x790   :  { %7381 = vrsqrt.f32 %v3076_v9  ;;  %v3077_v11 = vadd.f32 1e-05, %v3075_v10 }
 0x792   :  { %7383 = vrsqrt.f32 %v3077_v11  ;;  %v3397_v11 = vld [vmem:[#allocation9 + $0x500] sm:$0xff] }
 0x79a   :  { %v7382_v12 = vpop.eup %7381 }
 0x79b   :  { %v3080_v14 = vmul.f32 %v7382_v12, %v3066_v42  ;;  %v3366_v42 = vld [vmem:[#allocation9 + $0x408] sm:$0xff]  ;;  %v3405_v12 = vld [vmem:[#allocation9 + $0x540] sm:$0xff] }
 0x79c   :  { %v7384_v60 = vpop.eup %7383  ;;  %v6334_v46 = vcombine.low %v3366_v42, %v3374_v45  ;;  %v6335_v47 = vcombine.high %v3366_v42, %v3374_v45  ;;  %v3469_v42 = vld [vmem:[#allocation9 + $0x740] sm:$0xff]  ;;  %v3470_v45 = vld [vmem:[#allocation9 + $0x748] sm:$0xff] }
 0x79d   :  { %v3081_v15 = vmul.f32 %v7384_v60, %v3067_v44  ;;  %v3086_v16 = vmul.f32 %v6310_v13, %v3080_v14  ;;  %v6333_v44 = vcombine.high %v3365_v23, %v3373_v41  ;;  %v6365_v14 = vcombine.high %v3397_v11, %v3405_v12  ;;  %v3406_v60 = vld [vmem:[#allocation9 + $0x548] sm:$0xff]  ;;  %v3461_v41 = vld [vmem:[#allocation9 + $0x700] sm:$0xff] }
 0x79e   :  { %4258 = vmatprep.subr.bf16.mxu0 %v6335_v47  ;;  %v6428_v22 = vcombine.low %v3461_v41, %v3469_v42  ;;  %v3477_v47 = vld [vmem:[#allocation9 + $0x780] sm:$0xff] }
 0x79f   :  { %v3087_v18 = vmul.f32 %v6310_v13, %v3081_v15  ;;  %v3092_v20 = vadd.f32 %v6311_v17, %v3086_v16  ;;  %4215 = vmatprep.subr.bf16.mxu1 %v6333_v44  ;;  %v3398_v13 = vld [vmem:[#allocation9 + $0x508] sm:$0xff]  ;;  %v6364_v15 = vcombine.low %v3397_v11, %v3405_v12  ;;  %v6429_v44 = vcombine.high %v3461_v41, %v3469_v42  ;;  %v3415_v41 = vld [vmem:[#allocation9 + $0x590] sm:$0xff] }
 0x7a0   :  { %v6366_v16 = vcombine.low %v3398_v13, %v3406_v60  ;;  %v3423_v42 = vld [vmem:[#allocation9 + $0x5d0] sm:$0xff] }
 0x7a1   :  { %v3093_v21 = vadd.f32 %v6311_v17, %v3087_v18  ;;  %v6367_v17 = vcombine.high %v3398_v13, %v3406_v60  ;;  %v3413_v18 = vld [vmem:[#allocation9 + $0x580] sm:$0xff] }
 0x7a3   :  { %v3105_v24 = vpack.c.bf16 %v3093_v21, %v3092_v20 }
 0x7a5   :  { %7049 = vmatmul.mubr.bf16.vlgmr.msra.gmra.mrb[36].mxu1 %v3105_v24 }
 0x7a6   :  { %4247 = vmatprep.mubr.bf16.mxu1 %v7569_v1  ;;  %4216 = vmatpush1.bf16.msra.mxu1 %v6332_v43  ;;  %v3462_v43 = vld [vmem:[#allocation9 + $0x708] sm:$0xff] }
 0x7a7   :  { %4217 = vmatprep.subr.bf16.mxu1 %v6349_v48  ;;  %v6430_v2 = vcombine.low %v3462_v43, %v3470_v45  ;;  %v3485_v48 = vld [vmem:[#allocation9 + $0x7c0] sm:$0xff] }
 0x7a8   :  { %v6445_v50 = vcombine.high %v3477_v47, %v3485_v48 }
 0x7aa   :  { %4218 = vmatpush1.bf16.msra.mxu1 %v6348_v52  ;;  %v6444_v52 = vcombine.low %v3477_v47, %v3485_v48  ;;  %v3431_v47 = vld [vmem:[#allocation9 + $0x610] sm:$0xff] }
 0x7ab   :  { %4219 = vmatprep.subr.bf16.mxu1 %v6365_v14  ;;  %v3439_v48 = vld [vmem:[#allocation9 + $0x650] sm:$0xff] }
 0x7ae   :  { %4220 = vmatpush1.bf16.msra.mxu1 %v6364_v15 }
 0x878   :  { %v3209_v27 = vpop.f32.mrb[36].mxu1 }
 0x879   :  { %v7050_v28 = vpop.f32.mrb[37].mxu1  ;;  %v3210_v30 = vadd.f32 %v6312_v26, %v3209_v27 }
 0x87a   :  { %v3212_v29 = vpop.f32.mrb[38].mxu1  ;;  %v3429_v28 = vld [vmem:[#allocation9 + $0x600] sm:$0xff] }
 0x87b   :  { %v3213_v63 = vadd.f32 %v6312_v26, %v3212_v29  ;;  %v7051_v31 = vpop.f32.mrb[39].mxu1  ;;  %v3437_v29 = vld [vmem:[#allocation9 + $0x640] sm:$0xff] }
 0x87c   :  { %v3438_v31 = vld [vmem:[#allocation9 + $0x648] sm:$0xff] }
 0x87d   :  { %v3216_v32 = vpack.c.bf16 %v3213_v63, %v3210_v30  ;;  %v3430_v30 = vld [vmem:[#allocation9 + $0x608] sm:$0xff]  ;;  %v6397_v63 = vcombine.high %v3429_v28, %v3437_v29 }
 0x87f   :  { %7069 = vmatmul.mubr.bf16.vlgmr.msra.gmra.mrb[40].mxu0 %v3216_v32  ;;  %v6396_v32 = vcombine.low %v3429_v28, %v3437_v29  ;;  %v3383_v29 = vld [vmem:[#allocation9 + $0x490] sm:$0xff] }
 0x880   :  { %4290 = vmatprep.mubr.bf16.mxu0 %v7569_v1  ;;  %4259 = vmatpush1.bf16.msra.mxu0 %v6334_v46  ;;  %v6431_v46 = vcombine.high %v3462_v43, %v3470_v45  ;;  %v3416_v43 = vld [vmem:[#allocation9 + $0x598] sm:$0xff] }
 0x881   :  { %4260 = vmatprep.subr.bf16.mxu0 %v6351_v51  ;;  %v3486_v51 = vld [vmem:[#allocation9 + $0x7c8] sm:$0xff] }
 0x884   :  { %4261 = vmatpush1.bf16.msra.mxu0 %v6350_v53  ;;  %v6446_v53 = vcombine.low %v3478_v49, %v3486_v51 }
 0x885   :  { %4262 = vmatprep.subr.bf16.mxu0 %v6367_v17 }
 0x888   :  { %4263 = vmatpush1.bf16.msra.mxu0 %v6366_v16 }
 0x952   :  { %v3320_v33 = vpop.f32.mrb[40].mxu0 }
 0x953   :  { %v3321_v34 = vadd.f32 %v6321_v0, %v3320_v33  ;;  %v7070_v35 = vpop.f32.mrb[41].mxu0  ;;  %v6399_v33 = vcombine.high %v3430_v30, %v3438_v31 }
 0x954   :  { %v3323_v36 = vpop.f32.mrb[42].mxu0  ;;  %v3453_v35 = vld [vmem:[#allocation9 + $0x6c0] sm:$0xff] }
 0x955   :  { %v3324_v37 = vadd.f32 %v6321_v0, %v3323_v36  ;;  %v7071_v38 = vpop.f32.mrb[43].mxu0  ;;  %v3327_v39 = vadd.f32 %v3321_v34, %v3092_v20  ;;  %v3421_v20 = vld [vmem:[#allocation9 + $0x5c0] sm:$0xff]  ;;  %v6398_v0 = vcombine.low %v3430_v30, %v3438_v31  ;;  %v3446_v36 = vld [vmem:[#allocation9 + $0x688] sm:$0xff]  ;;  %v3391_v30 = vld [vmem:[#allocation9 + $0x4d0] sm:$0xff] }
 0x956   :  { %v6381_v24 = vcombine.high %v3413_v18, %v3421_v20  ;;  %v6380_v6 = vcombine.low %v3413_v18, %v3421_v20  ;;  %v3445_v34 = vld [vmem:[#allocation9 + $0x680] sm:$0xff]  ;;  %v3454_v38 = vld [vmem:[#allocation9 + $0x6c8] sm:$0xff]  ;;  %v3392_v31 = vld [vmem:[#allocation9 + $0x4d8] sm:$0xff] }
 0x957   :  { %3329 = vadd.xlane.f32.xlu0 %v3327_v39  ;;  %v3328_v40 = vadd.f32 %v3324_v37, %v3093_v21  ;;  %v3414_v21 = vld [vmem:[#allocation9 + $0x588] sm:$0xff]  ;;  %v6413_v37 = vcombine.high %v3445_v34, %v3453_v35  ;;  %v6415_v23 = vcombine.high %v3446_v36, %v3454_v38 }
 0x958   :  { %v6382_v26 = vcombine.low %v3414_v21, %v3422_v25  ;;  %v6383_v27 = vcombine.high %v3414_v21, %v3422_v25  ;;  %4221 = vmatprep.subr.bf16.mxu1 %v6381_v24  ;;  %v6330_v21 = vld [vmem:[%s7997_s7 + $0xa] ss:$0 sm:$0xff] }
 0x959   :  { %3331 = vadd.xlane.f32.xlu1 %v3328_v40  ;;  %4222 = vmatpush1.bf16.msra.mxu1 %v6380_v6 }
 0x95a   :  { %4264 = vmatprep.subr.bf16.mxu0 %v6383_v27  ;;  %4223 = vmatprep.subr.bf16.mxu1 %v6397_v63  ;;  %v6331_v27 = vld [vmem:[%s7997_s7 + $0xb] ss:$0 sm:$0xff]  ;;  %v3384_v63 = vld [vmem:[#allocation9 + $0x498] sm:$0xff] }
 0x95b   :  { %4265 = vmatpush1.bf16.msra.mxu0 %v6382_v26 }
 0x95c   :  { %4266 = vmatprep.subr.bf16.mxu0 %v6399_v33  ;;  %v6353_v33 = vcombine.high %v3383_v29, %v3391_v30 }
 0x95d   :  { %4224 = vmatpush1.bf16.msra.mxu1 %v6396_v32 }
 0x95e   :  { %4225 = vmatprep.subr.bf16.mxu1 %v6413_v37  ;;  %v3408_v37 = vld [vmem:[#allocation9 + $0x558] sm:$0xff] }
 0x95f   :  { %4267 = vmatpush1.bf16.msra.mxu0 %v6398_v0 }
 0x960   :  { %4268 = vmatprep.subr.bf16.mxu0 %v6415_v23 }
 0x9e4   :  { %v3330_v54 = vpop.xlane.xlu0 %3329 }
 0x9e5   :  { %v3333_v19 = vmul.f32 0.0078125, %v3330_v54  ;;  %v6447_v54 = vcombine.high %v3478_v49, %v3486_v51  ;;  %v3432_v49 = vld [vmem:[#allocation9 + $0x618] sm:$0xff]  ;;  %v6384_v51 = vcombine.low %v3415_v41, %v3423_v42 }
 0x9e6   :  { %v3332_v55 = vpop.xlane.xlu1 %3331 }
 0x9e7   :  { %v7893_v56 = vsub.f32 %v3327_v39, %v3333_v19  ;;  %v3334_v57 = vmul.f32 0.0078125, %v3332_v55  ;;  %v6412_v39 = vcombine.low %v3445_v34, %v3453_v35  ;;  %v3367_v19 = vld [vmem:[#allocation9 + $0x410] sm:$0xff]  ;;  %v6355_v34 = vcombine.high %v3384_v63, %v3392_v31 }
 0x9e8   :  { %v3375_v55 = vld [vmem:[#allocation9 + $0x450] sm:$0xff] }
 0x9e9   :  { %v7895_v8 = vsub.f32 %v3328_v40, %v3334_v57  ;;  %v3337_v9 = vmul.f32 %v7893_v56, %v7893_v56  ;;  %v6414_v40 = vcombine.low %v3446_v36, %v3454_v38  ;;  %4226 = vmatpush1.bf16.msra.mxu1 %v6412_v39  ;;  %v3368_v57 = vld [vmem:[#allocation9 + $0x418] sm:$0xff]  ;;  %v6336_v11 = vcombine.low %v3367_v19, %v3375_v55  ;;  %v3407_v35 = vld [vmem:[#allocation9 + $0x550] sm:$0xff] }
 0x9ea   :  { %4227 = vmatprep.subr.bf16.mxu1 %v6429_v44  ;;  %v3400_v36 = vld [vmem:[#allocation9 + $0x518] sm:$0xff]  ;;  %v6352_v38 = vcombine.low %v3383_v29, %v3391_v30  ;;  %v6354_v39 = vcombine.low %v3384_v63, %v3392_v31  ;;  %v3369_v63 = vld [vmem:[#allocation9 + $0x420] sm:$0xff] }
 0x9eb   :  { %3339 = vadd.xlane.f32.xlu0 %v3337_v9  ;;  %v3338_v10 = vmul.f32 %v7895_v8, %v7895_v8  ;;  %4269 = vmatpush1.bf16.msra.mxu0 %v6414_v40  ;;  %v6337_v9 = vcombine.high %v3367_v19, %v3375_v55  ;;  %v6371_v23 = vcombine.high %v3400_v36, %v3408_v37  ;;  %v3424_v44 = vld [vmem:[#allocation9 + $0x5d8] sm:$0xff]  ;;  %v3447_v19 = vld [vmem:[#allocation9 + $0x690] sm:$0xff]  ;;  %v3377_v31 = vld [vmem:[#allocation9 + $0x460] sm:$0xff] }
 0x9ec   :  { %4270 = vmatprep.subr.bf16.mxu0 %v6431_v46  ;;  %v6387_v46 = vcombine.high %v3416_v43, %v3424_v44  ;;  %v3455_v55 = vld [vmem:[#allocation9 + $0x6d0] sm:$0xff] }
 0x9ed   :  { %3341 = vadd.xlane.f32.xlu1 %v3338_v10  ;;  %4228 = vmatpush1.bf16.msra.mxu1 %v6428_v22  ;;  %v3376_v10 = vld [vmem:[#allocation9 + $0x458] sm:$0xff]  ;;  %v6370_v22 = vcombine.low %v3400_v36, %v3408_v37  ;;  %v6341_v36 = vcombine.high %v3369_v63, %v3377_v31 }
 0x9ee   :  { %4229 = vmatprep.subr.bf16.mxu1 %v6445_v50  ;;  %v6338_v12 = vcombine.low %v3368_v57, %v3376_v10  ;;  %v6339_v13 = vcombine.high %v3368_v57, %v3376_v10  ;;  %v3440_v50 = vld [vmem:[#allocation9 + $0x658] sm:$0xff]  ;;  %v6400_v10 = vcombine.low %v3431_v47, %v3439_v48 }
 0x9ef   :  { %4271 = vmatpush1.bf16.msra.mxu0 %v6430_v2  ;;  %v6385_v2 = vcombine.high %v3415_v41, %v3423_v42  ;;  %v3448_v57 = vld [vmem:[#allocation9 + $0x698] sm:$0xff]  ;;  %v6340_v41 = vcombine.low %v3369_v63, %v3377_v31 }
 0x9f0   :  { %4272 = vmatprep.subr.bf16.mxu0 %v6447_v54  ;;  %v6403_v54 = vcombine.high %v3432_v49, %v3440_v50 }
 0x9f1   :  { %4230 = vmatpush1.bf16.msra.mxu1 %v6444_v52  ;;  %v6386_v52 = vcombine.low %v3416_v43, %v3424_v44 }
 0x9f2   :  { %4301 = vmatprep.subr.bf16.mxu1 %v6337_v9  ;;  %v3456_v9 = vld [vmem:[#allocation9 + $0x6d8] sm:$0xff] }
 0x9f3   :  { %4273 = vmatpush1.bf16.msra.mxu0 %v6446_v53  ;;  %v6401_v53 = vcombine.high %v3431_v47, %v3439_v48 }
 0x9f4   :  { %4344 = vmatprep.subr.bf16.mxu0 %v6339_v13  ;;  %v6419_v13 = vcombine.high %v3448_v57, %v3456_v9 }
 0xa78   :  { %v3340_v14 = vpop.xlane.xlu0 %3339 }
 0xa79   :  { %v3343_v60 = vmul.f32 0.0078125, %v3340_v14  ;;  %v3463_v14 = vld [vmem:[#allocation9 + $0x710] sm:$0xff] }
 0xa7a   :  { %v3342_v15 = vpop.xlane.xlu1 %3341 }
 0xa7b   :  { %v3345_v16 = vadd.f32 1e-05, %v3343_v60  ;;  %v3344_v17 = vmul.f32 0.0078125, %v3342_v15  ;;  %v3471_v60 = vld [vmem:[#allocation9 + $0x750] sm:$0xff]  ;;  %v3464_v15 = vld [vmem:[#allocation9 + $0x718] sm:$0xff] }
 0xa7d   :  { %7385 = vrsqrt.f32 %v3345_v16  ;;  %v3346_v18 = vadd.f32 1e-05, %v3344_v17  ;;  %v3472_v16 = vld [vmem:[#allocation9 + $0x758] sm:$0xff]  ;;  %v6416_v17 = vcombine.low %v3447_v19, %v3455_v55 }
 0xa7f   :  { %7387 = vrsqrt.f32 %v3346_v18  ;;  %v6418_v18 = vcombine.low %v3448_v57, %v3456_v9 }
 0xa87   :  { %v7386_v20 = vpop.eup %7385 }
 0xa88   :  { %v3349_v24 = vmul.f32 %v7386_v20, %v7893_v56  ;;  %v6433_v20 = vcombine.high %v3463_v14, %v3471_v60 }
 0xa89   :  { %v7388_v25 = vpop.eup %7387 }
 0xa8a   :  { %v3355_v6 = vmul.f32 %v6330_v21, %v3349_v24  ;;  %v3350_v26 = vmul.f32 %v7388_v25, %v7895_v8  ;;  %v3399_v8 = vld [vmem:[#allocation9 + $0x510] sm:$0xff] }
 0xa8b   :  { %v6369_v40 = vcombine.high %v3399_v8, %v3407_v35  ;;  %v6368_v45 = vcombine.low %v3399_v8, %v3407_v35  ;;  %v3479_v24 = vld [vmem:[#allocation9 + $0x790] sm:$0xff] }
 0xa8c   :  { %v3356_v28 = vmul.f32 %v6330_v21, %v3350_v26  ;;  %v7909_v32 = vadd.f32 %v6331_v27, %v3355_v6  ;;  %v6435_v21 = vcombine.high %v3464_v15, %v3472_v16  ;;  %v3487_v25 = vld [vmem:[#allocation9 + $0x7d0] sm:$0xff]  ;;  %v3480_v6 = vld [vmem:[#allocation9 + $0x798] sm:$0xff] }
 0xa8d   :  { %v3488_v26 = vld [vmem:[#allocation9 + $0x7d8] sm:$0xff]  ;;  %v6449_v29 = vcombine.high %v3479_v24, %v3487_v25  ;;  %v6448_v8 = vcombine.low %v3479_v24, %v3487_v25 }
 0xa8e   :  { %v7911_v0 = vadd.f32 %v6331_v27, %v3356_v28  ;;  %v6432_v27 = vcombine.low %v3463_v14, %v3471_v60  ;;  %v6434_v28 = vcombine.low %v3464_v15, %v3472_v16  ;;  %v6451_v30 = vcombine.high %v3480_v6, %v3488_v26 }
 0xa8f   :  { %v6450_v35 = vcombine.low %v3480_v6, %v3488_v26 }
 0xa90   :  { %v7915_v56 = vpack.c.bf16 %v7911_v0, %v7909_v32 }
 0xa92   :  { %4248 = vmatmul.mubr.bf16.vlgmr.msra.gmra.mrb[40].mxu1 %v7915_v56  ;;  %4291 = vmatmul.mubr.bf16.vlgmr.msra.gmra.mrb[44].mxu0 %v7915_v56 }
 0xa93   :  { %4302 = vmatpush1.bf16.msra.mxu1 %v6336_v11  ;;  %4345 = vmatpush1.bf16.msra.mxu0 %v6338_v12  ;;  %v6402_v11 = vcombine.low %v3432_v49, %v3440_v50  ;;  %v6417_v12 = vcombine.high %v3447_v19, %v3455_v55 }
 0xa94   :  { %4303 = vmatprep.subr.bf16.mxu1 %v6353_v33  ;;  %4346 = vmatprep.subr.bf16.mxu0 %v6355_v34  ;;  %v3370_v33 = vld [vmem:[#allocation9 + $0x428] sm:$0xff] }
 0xa95   :  { %4333 = vmatprep.mubr.bf16.mxu1 %v7569_v1  ;;  %4376 = vmatprep.mubr.bf16.mxu0 %v7569_v1  ;;  %v3378_v34 = vld [vmem:[#allocation9 + $0x468] sm:$0xff] }
 0xa96   :  { %v6343_v37 = vcombine.high %v3370_v33, %v3378_v34  ;;  %v6342_v42 = vcombine.low %v3370_v33, %v3378_v34 }
 0xa97   :  { %4304 = vmatpush1.bf16.msra.mxu1 %v6352_v38  ;;  %4347 = vmatpush1.bf16.msra.mxu0 %v6354_v39  ;;  %v3385_v38 = vld [vmem:[#allocation9 + $0x4a0] sm:$0xff] }
 0xa98   :  { %4305 = vmatprep.subr.bf16.mxu1 %v6369_v40  ;;  %4348 = vmatprep.subr.bf16.mxu0 %v6371_v23  ;;  %v3393_v39 = vld [vmem:[#allocation9 + $0x4e0] sm:$0xff]  ;;  %v3386_v40 = vld [vmem:[#allocation9 + $0x4a8] sm:$0xff] }
 0xa99   :  { %v3394_v23 = vld [vmem:[#allocation9 + $0x4e8] sm:$0xff]  ;;  %v6357_v43 = vcombine.high %v3385_v38, %v3393_v39  ;;  %v6356_v47 = vcombine.low %v3385_v38, %v3393_v39 }
 0xa9a   :  { %v6359_v44 = vcombine.high %v3386_v40, %v3394_v23  ;;  %v6358_v48 = vcombine.low %v3386_v40, %v3394_v23 }
 0xa9b   :  { %4306 = vmatpush1.bf16.msra.mxu1 %v6368_v45  ;;  %4349 = vmatpush1.bf16.msra.mxu0 %v6370_v22  ;;  %v3401_v45 = vld [vmem:[#allocation9 + $0x520] sm:$0xff] }
 0xa9c   :  { %4307 = vmatprep.subr.bf16.mxu1 %v6385_v2  ;;  %4350 = vmatprep.subr.bf16.mxu0 %v6387_v46  ;;  %v3409_v22 = vld [vmem:[#allocation9 + $0x560] sm:$0xff]  ;;  %v3402_v2 = vld [vmem:[#allocation9 + $0x528] sm:$0xff] }
 0xa9d   :  { %v3410_v46 = vld [vmem:[#allocation9 + $0x568] sm:$0xff]  ;;  %v6373_v49 = vcombine.high %v3401_v45, %v3409_v22  ;;  %v6372_v19 = vcombine.low %v3401_v45, %v3409_v22 }
 0xa9e   :  { %v6375_v50 = vcombine.high %v3402_v2, %v3410_v46  ;;  %v6374_v55 = vcombine.low %v3402_v2, %v3410_v46 }
 0xa9f   :  { %4308 = vmatpush1.bf16.msra.mxu1 %v6384_v51  ;;  %4351 = vmatpush1.bf16.msra.mxu0 %v6386_v52  ;;  %v3417_v51 = vld [vmem:[#allocation9 + $0x5a0] sm:$0xff] }
 0xaa0   :  { %4309 = vmatprep.subr.bf16.mxu1 %v6401_v53  ;;  %4352 = vmatprep.subr.bf16.mxu0 %v6403_v54  ;;  %v3425_v52 = vld [vmem:[#allocation9 + $0x5e0] sm:$0xff]  ;;  %v3418_v53 = vld [vmem:[#allocation9 + $0x5a8] sm:$0xff] }
 0xaa1   :  { %v3426_v54 = vld [vmem:[#allocation9 + $0x5e8] sm:$0xff]  ;;  %v6389_v57 = vcombine.high %v3417_v51, %v3425_v52  ;;  %v6388_v14 = vcombine.low %v3417_v51, %v3425_v52 }
 0xaa2   :  { %v6391_v9 = vcombine.high %v3418_v53, %v3426_v54  ;;  %v6390_v60 = vcombine.low %v3418_v53, %v3426_v54 }
 0xaa3   :  { %4310 = vmatpush1.bf16.msra.mxu1 %v6400_v10  ;;  %4353 = vmatpush1.bf16.msra.mxu0 %v6402_v11  ;;  %v3433_v10 = vld [vmem:[#allocation9 + $0x620] sm:$0xff] }
 0xaa4   :  { %4311 = vmatprep.subr.bf16.mxu1 %v6417_v12  ;;  %4354 = vmatprep.subr.bf16.mxu0 %v6419_v13  ;;  %v3441_v11 = vld [vmem:[#allocation9 + $0x660] sm:$0xff]  ;;  %v3434_v12 = vld [vmem:[#allocation9 + $0x628] sm:$0xff] }
 0xaa5   :  { %v3442_v13 = vld [vmem:[#allocation9 + $0x668] sm:$0xff]  ;;  %v6405_v15 = vcombine.high %v3433_v10, %v3441_v11  ;;  %v6404_v24 = vcombine.low %v3433_v10, %v3441_v11 }
 0xaa6   :  { %v6407_v16 = vcombine.high %v3434_v12, %v3442_v13  ;;  %v6406_v25 = vcombine.low %v3434_v12, %v3442_v13 }
 0xaa7   :  { %4312 = vmatpush1.bf16.msra.mxu1 %v6416_v17  ;;  %4355 = vmatpush1.bf16.msra.mxu0 %v6418_v18  ;;  %v3449_v17 = vld [vmem:[#allocation9 + $0x6a0] sm:$0xff] }
 0xaa8   :  { %4313 = vmatprep.subr.bf16.mxu1 %v6433_v20  ;;  %4356 = vmatprep.subr.bf16.mxu0 %v6435_v21  ;;  %v3457_v18 = vld [vmem:[#allocation9 + $0x6e0] sm:$0xff]  ;;  %v3450_v20 = vld [vmem:[#allocation9 + $0x6a8] sm:$0xff] }
 0xaa9   :  { %v3458_v21 = vld [vmem:[#allocation9 + $0x6e8] sm:$0xff]  ;;  %v6421_v6 = vcombine.high %v3449_v17, %v3457_v18  ;;  %v6420_v63 = vcombine.low %v3449_v17, %v3457_v18 }
 0xaaa   :  { %v6423_v26 = vcombine.high %v3450_v20, %v3458_v21  ;;  %v6422_v31 = vcombine.low %v3450_v20, %v3458_v21 }
 0xaab   :  { %4314 = vmatpush1.bf16.msra.mxu1 %v6432_v27  ;;  %4357 = vmatpush1.bf16.msra.mxu0 %v6434_v28  ;;  %v3465_v27 = vld [vmem:[#allocation9 + $0x720] sm:$0xff] }
 0xaac   :  { %4315 = vmatprep.subr.bf16.mxu1 %v6449_v29  ;;  %4358 = vmatprep.subr.bf16.mxu0 %v6451_v30  ;;  %v3473_v28 = vld [vmem:[#allocation9 + $0x760] sm:$0xff]  ;;  %v3466_v29 = vld [vmem:[#allocation9 + $0x728] sm:$0xff] }
 0xaad   :  { %v3474_v30 = vld [vmem:[#allocation9 + $0x768] sm:$0xff]  ;;  %v6437_v33 = vcombine.high %v3465_v27, %v3473_v28  ;;  %v6436_v38 = vcombine.low %v3465_v27, %v3473_v28 }
 0xaae   :  { %v6439_v34 = vcombine.high %v3466_v29, %v3474_v30  ;;  %v6438_v39 = vcombine.low %v3466_v29, %v3474_v30  ;;  %v3451_v30 = vld [vmem:[#allocation9 + $0x6b0] sm:$0xff] }
 0xaaf   :  { %4316 = vmatpush1.bf16.msra.mxu1 %v6448_v8  ;;  %4359 = vmatpush1.bf16.msra.mxu0 %v6450_v35  ;;  %v3481_v8 = vld [vmem:[#allocation9 + $0x7a0] sm:$0xff] }
 0xab0   :  { %4387 = vmatprep.subr.bf16.mxu1 %v6341_v36  ;;  %4430 = vmatprep.subr.bf16.mxu0 %v6343_v37  ;;  %v3489_v35 = vld [vmem:[#allocation9 + $0x7e0] sm:$0xff]  ;;  %v3482_v36 = vld [vmem:[#allocation9 + $0x7a8] sm:$0xff] }
 0xab1   :  { %v3490_v37 = vld [vmem:[#allocation9 + $0x7e8] sm:$0xff]  ;;  %v6453_v40 = vcombine.high %v3481_v8, %v3489_v35  ;;  %v6452_v45 = vcombine.low %v3481_v8, %v3489_v35 }
 0xab2   :  { %4334 = vmatmul.mubr.bf16.vlgmr.msra.gmra.mrb[44].mxu1 %v7915_v56  ;;  %4377 = vmatmul.mubr.bf16.vlgmr.msra.gmra.mrb[48].mxu0 %v7915_v56  ;;  %v6455_v23 = vcombine.high %v3482_v36, %v3490_v37  ;;  %v6454_v22 = vcombine.low %v3482_v36, %v3490_v37  ;;  %v3467_v37 = vld [vmem:[#allocation9 + $0x730] sm:$0xff] }
 0xab3   :  { %4388 = vmatpush1.bf16.msra.mxu1 %v6340_v41  ;;  %4431 = vmatpush1.bf16.msra.mxu0 %v6342_v42  ;;  %v3371_v41 = vld [vmem:[#allocation9 + $0x430] sm:$0xff] }
 0xab4   :  { %4389 = vmatprep.subr.bf16.mxu1 %v6357_v43  ;;  %4432 = vmatprep.subr.bf16.mxu0 %v6359_v44  ;;  %v3379_v42 = vld [vmem:[#allocation9 + $0x470] sm:$0xff]  ;;  %v3372_v43 = vld [vmem:[#allocation9 + $0x438] sm:$0xff] }
 0xab5   :  { %4419 = vmatprep.mubr.bf16.mxu1 %v7569_v1  ;;  %4462 = vmatprep.mubr.bf16.mxu0 %v7569_v1  ;;  %v3380_v44 = vld [vmem:[#allocation9 + $0x478] sm:$0xff]  ;;  %v6345_v2 = vcombine.high %v3371_v41, %v3379_v42  ;;  %v6344_v51 = vcombine.low %v3371_v41, %v3379_v42 }
 0xab6   :  { %v6347_v46 = vcombine.high %v3372_v43, %v3380_v44  ;;  %v6346_v52 = vcombine.low %v3372_v43, %v3380_v44  ;;  %v3483_v44 = vld [vmem:[#allocation9 + $0x7b0] sm:$0xff] }
 0xab7   :  { %4390 = vmatpush1.bf16.msra.mxu1 %v6356_v47  ;;  %4433 = vmatpush1.bf16.msra.mxu0 %v6358_v48  ;;  %v3387_v47 = vld [vmem:[#allocation9 + $0x4b0] sm:$0xff] }
 0xab8   :  { %4391 = vmatprep.subr.bf16.mxu1 %v6373_v49  ;;  %4434 = vmatprep.subr.bf16.mxu0 %v6375_v50  ;;  %v3395_v48 = vld [vmem:[#allocation9 + $0x4f0] sm:$0xff]  ;;  %v3388_v49 = vld [vmem:[#allocation9 + $0x4b8] sm:$0xff] }
 0xab9   :  { %v3396_v50 = vld [vmem:[#allocation9 + $0x4f8] sm:$0xff]  ;;  %v6361_v53 = vcombine.high %v3387_v47, %v3395_v48  ;;  %v6360_v10 = vcombine.low %v3387_v47, %v3395_v48 }
 0xaba   :  { %v6363_v54 = vcombine.high %v3388_v49, %v3396_v50  ;;  %v6362_v11 = vcombine.low %v3388_v49, %v3396_v50 }
 0xabb   :  { %4392 = vmatpush1.bf16.msra.mxu1 %v6372_v19  ;;  %4435 = vmatpush1.bf16.msra.mxu0 %v6374_v55  ;;  %v3403_v19 = vld [vmem:[#allocation9 + $0x530] sm:$0xff] }
 0xabc   :  { %4393 = vmatprep.subr.bf16.mxu1 %v6389_v57  ;;  %4436 = vmatprep.subr.bf16.mxu0 %v6391_v9  ;;  %v3411_v55 = vld [vmem:[#allocation9 + $0x570] sm:$0xff]  ;;  %v3404_v57 = vld [vmem:[#allocation9 + $0x538] sm:$0xff] }
 0xabd   :  { %v3412_v9 = vld [vmem:[#allocation9 + $0x578] sm:$0xff]  ;;  %v6377_v12 = vcombine.high %v3403_v19, %v3411_v55  ;;  %v6376_v17 = vcombine.low %v3403_v19, %v3411_v55  ;;  %v7252_v19 = vld [vmem:[#allocation10 + $0x480] sm:$0xff]   ;;  %v7253_v55 = vld [vmem:[#allocation10 + $0x448] sm:$0xff]  }
 0xabe   :  { %v6379_v13 = vcombine.high %v3404_v57, %v3412_v9  ;;  %v6378_v18 = vcombine.low %v3404_v57, %v3412_v9  ;;  %v7254_v57 = vld [vmem:[#allocation10 + $0x4c8] sm:$0xff]  }
 0xabf   :  { %4394 = vmatpush1.bf16.msra.mxu1 %v6388_v14  ;;  %4437 = vmatpush1.bf16.msra.mxu0 %v6390_v60  ;;  %v3419_v14 = vld [vmem:[#allocation9 + $0x5b0] sm:$0xff]  ;;  %v7255_v9 = vld [vmem:[#allocation10 + $0x408] sm:$0xff]  }
 0xac0   :  { %4395 = vmatprep.subr.bf16.mxu1 %v6405_v15  ;;  %4438 = vmatprep.subr.bf16.mxu0 %v6407_v16  ;;  %v3427_v60 = vld [vmem:[#allocation9 + $0x5f0] sm:$0xff]  ;;  %v3420_v15 = vld [vmem:[#allocation9 + $0x5b8] sm:$0xff] }
 0xac1   :  { %v3428_v16 = vld [vmem:[#allocation9 + $0x5f8] sm:$0xff]  ;;  %v6393_v20 = vcombine.high %v3419_v14, %v3427_v60  ;;  %v6392_v27 = vcombine.low %v3419_v14, %v3427_v60  ;;  %v7260_v14 = vld [vmem:[#allocation10 + $0x490] sm:$0xff]  }
 0xac2   :  { %v6395_v21 = vcombine.high %v3420_v15, %v3428_v16  ;;  %v6394_v28 = vcombine.low %v3420_v15, %v3428_v16  ;;  %v7261_v60 = vld [vmem:[#allocation10 + $0x458] sm:$0xff]  }
 0xac3   :  { %4396 = vmatpush1.bf16.msra.mxu1 %v6404_v24  ;;  %4439 = vmatpush1.bf16.msra.mxu0 %v6406_v25  ;;  %v3435_v24 = vld [vmem:[#allocation9 + $0x630] sm:$0xff]  ;;  %v7262_v15 = vld [vmem:[#allocation10 + $0x4d8] sm:$0xff]  }
 0xac4   :  { %4397 = vmatprep.subr.bf16.mxu1 %v6421_v6  ;;  %4440 = vmatprep.subr.bf16.mxu0 %v6423_v26  ;;  %v3443_v25 = vld [vmem:[#allocation9 + $0x670] sm:$0xff]  ;;  %v3436_v6 = vld [vmem:[#allocation9 + $0x638] sm:$0xff] }
 0xac5   :  { %v3444_v26 = vld [vmem:[#allocation9 + $0x678] sm:$0xff]  ;;  %v6409_v29 = vcombine.high %v3435_v24, %v3443_v25 }
 0xac6   :  { %v6410_v8 = vcombine.low %v3436_v6, %v3444_v26  ;;  %v7263_v16 = vld [vmem:[#allocation10 + $0x418] sm:$0xff]  }
 0xac7   :  { %4398 = vmatpush1.bf16.msra.mxu1 %v6420_v63  ;;  %4441 = vmatpush1.bf16.msra.mxu0 %v6422_v31  ;;  %v3459_v63 = vld [vmem:[#allocation9 + $0x6f0] sm:$0xff]  ;;  %v3452_v31 = vld [vmem:[#allocation9 + $0x6b8] sm:$0xff] }
 0xac8   :  { %4399 = vmatprep.subr.bf16.mxu1 %v6437_v33  ;;  %4442 = vmatprep.subr.bf16.mxu0 %v6439_v34  ;;  %v3460_v33 = vld [vmem:[#allocation9 + $0x6f8] sm:$0xff]  ;;  %v6408_v34 = vcombine.low %v3435_v24, %v3443_v25  ;;  %v6425_v35 = vcombine.high %v3451_v30, %v3459_v63  ;;  %v7269_v24 = vld [vmem:[#allocation10 + $0x468] sm:$0xff]  }
 0xac9   :  { %v6427_v36 = vcombine.high %v3452_v31, %v3460_v33  ;;  %v6426_v41 = vcombine.low %v3452_v31, %v3460_v33  ;;  %v7270_v25 = vld [vmem:[#allocation10 + $0x4e8] sm:$0xff]   ;;  %v7279_v31 = vld [vmem:[#allocation10 + $0x438] sm:$0xff]  }
 0xaca   :  { %v7280_v33 = vld [vmem:[#allocation10 + $0x4b8] sm:$0xff]  }
 0xacb   :  { %4400 = vmatpush1.bf16.msra.mxu1 %v6436_v38  ;;  %4443 = vmatpush1.bf16.msra.mxu0 %v6438_v39  ;;  %v3475_v38 = vld [vmem:[#allocation9 + $0x770] sm:$0xff]  ;;  %v3468_v39 = vld [vmem:[#allocation9 + $0x738] sm:$0xff] }
 0xacc   :  { %4401 = vmatprep.subr.bf16.mxu1 %v6453_v40  ;;  %4444 = vmatprep.subr.bf16.mxu0 %v6455_v23  ;;  %v3476_v40 = vld [vmem:[#allocation9 + $0x778] sm:$0xff]  ;;  %v6424_v23 = vcombine.low %v3451_v30, %v3459_v63  ;;  %v6441_v42 = vcombine.high %v3467_v37, %v3475_v38 }
 0xacd   :  { %v6443_v43 = vcombine.high %v3468_v39, %v3476_v40  ;;  %v6442_v47 = vcombine.low %v3468_v39, %v3476_v40  ;;  %v7277_v30 = vld [vmem:[#allocation10 + $0x478] sm:$0xff]  }
 0xace   :  { %v7278_v63 = vld [vmem:[#allocation10 + $0x4f8] sm:$0xff]  }
 0xacf   :  { %4402 = vmatpush1.bf16.msra.mxu1 %v6452_v45  ;;  %4445 = vmatpush1.bf16.msra.mxu0 %v6454_v22  ;;  %v3491_v45 = vld [vmem:[#allocation9 + $0x7f0] sm:$0xff]  ;;  %v3484_v22 = vld [vmem:[#allocation9 + $0x7b8] sm:$0xff] }
 0xad0   :  { %4473 = vmatprep.subr.bf16.mxu1 %v6345_v2  ;;  %4516 = vmatprep.subr.bf16.mxu0 %v6347_v46  ;;  %v3492_v2 = vld [vmem:[#allocation9 + $0x7f8] sm:$0xff]  ;;  %v6440_v46 = vcombine.low %v3467_v37, %v3475_v38  ;;  %v6457_v48 = vcombine.high %v3483_v44, %v3491_v45  ;;  %v6456_v50 = vcombine.low %v3483_v44, %v3491_v45 }
 0xad1   :  { %v6459_v49 = vcombine.high %v3484_v22, %v3492_v2 }
 0xad2   :  { %4420 = vmatmul.mubr.bf16.vlgmr.msra.gmra.mrb[48].mxu1 %v7915_v56  ;;  %4463 = vmatmul.mubr.bf16.vlgmr.msra.gmra.mrb[52].mxu0 %v7915_v56 }
 0xad3   :  { %4474 = vmatpush1.bf16.msra.mxu1 %v6344_v51  ;;  %4517 = vmatpush1.bf16.msra.mxu0 %v6346_v52  ;;  %v6458_v51 = vcombine.low %v3484_v22, %v3492_v2  ;;  %v7249_v52 = vld [vmem:[#allocation10 + $0x440] sm:$0xff]  }
 0xad4   :  { %4475 = vmatprep.subr.bf16.mxu1 %v6361_v53  ;;  %4518 = vmatprep.subr.bf16.mxu0 %v6363_v54  ;;  %v7250_v53 = vld [vmem:[#allocation10 + $0x4c0] sm:$0xff]  }
 0xad5   :  { %4505 = vmatprep.mubr.bf16.mxu1 %v7569_v1  ;;  %4548 = vmatprep.mubr.bf16.mxu0 %v7569_v1  ;;  %v6411_v1 = vcombine.high %v3436_v6, %v3444_v26  ;;  %v7251_v54 = vld [vmem:[#allocation10 + $0x400] sm:$0xff]   ;;  %v7271_v6 = vld [vmem:[#allocation10 + $0x428] sm:$0xff]  }
 0xad6   :  { %v7272_v26 = vld [vmem:[#allocation10 + $0x4a8] sm:$0xff]  }
 0xad7   :  { %4476 = vmatpush1.bf16.msra.mxu1 %v6360_v10  ;;  %4519 = vmatpush1.bf16.msra.mxu0 %v6362_v11  ;;  %v7256_v10 = vld [vmem:[#allocation10 + $0x488] sm:$0xff]   ;;  %v7257_v11 = vld [vmem:[#allocation10 + $0x450] sm:$0xff]  }
 0xad8   :  { %4477 = vmatprep.subr.bf16.mxu1 %v6377_v12  ;;  %4520 = vmatprep.subr.bf16.mxu0 %v6379_v13  ;;  %v7258_v12 = vld [vmem:[#allocation10 + $0x4d0] sm:$0xff]  }
 0xad9   :  { %v7259_v13 = vld [vmem:[#allocation10 + $0x410] sm:$0xff]  }
 0xadb   :  { %4478 = vmatpush1.bf16.msra.mxu1 %v6376_v17  ;;  %4521 = vmatpush1.bf16.msra.mxu0 %v6378_v18  ;;  %v7265_v17 = vld [vmem:[#allocation10 + $0x460] sm:$0xff]  }
 0xadc   :  { %4479 = vmatprep.subr.bf16.mxu1 %v6393_v20  ;;  %4522 = vmatprep.subr.bf16.mxu0 %v6395_v21  ;;  %v7266_v18 = vld [vmem:[#allocation10 + $0x4e0] sm:$0xff]  }
 0xadd   :  { %v7267_v20 = vld [vmem:[#allocation10 + $0x420] sm:$0xff]  }
 0xade   :  { %v7268_v21 = vld [vmem:[#allocation10 + $0x4a0] sm:$0xff]  }
 0xadf   :  { %4480 = vmatpush1.bf16.msra.mxu1 %v6392_v27  ;;  %4523 = vmatpush1.bf16.msra.mxu0 %v6394_v28  ;;  %v7273_v27 = vld [vmem:[#allocation10 + $0x470] sm:$0xff]  }
 0xae0   :  { %4481 = vmatprep.subr.bf16.mxu1 %v6409_v29  ;;  %4524 = vmatprep.subr.bf16.mxu0 %v6411_v1  ;;  %v7274_v28 = vld [vmem:[#allocation10 + $0x4f0] sm:$0xff]  }
 0xae1   :  { %v7275_v29 = vld [vmem:[#allocation10 + $0x430] sm:$0xff]  }
 0xae2   :  { %v7276_v1 = vld [vmem:[#allocation10 + $0x4b0] sm:$0xff]  }
 0xae3   :  { %4482 = vmatpush1.bf16.msra.mxu1 %v6408_v34  ;;  %4525 = vmatpush1.bf16.msra.mxu0 %v6410_v8  ;;  %v7281_v34 = vld [vmem:[#allocation10 + $0x540] sm:$0xff]  }
 0xae4   :  { %4483 = vmatprep.subr.bf16.mxu1 %v6425_v35  ;;  %4526 = vmatprep.subr.bf16.mxu0 %v6427_v36  ;;  %v7282_v8 = vld [vmem:[#allocation10 + $0x5c0] sm:$0xff]  }
 0xae5   :  { %v7931_v35 = vld [vmem:[#allocation12 + $0x1] ss:$2 sm:$0xff] }
 0xae6   :  { %v3498_v36 = vrot.slane %v7931_v35, %v7795_v61  ;;  %v3506_v37 = vrot.slane %v7931_v35, %v7798_v62  ;;  %v3502_v38 = vrot.slane %v7931_v35, %v7803_v3  ;;  %v3510_v39 = vrot.slane %v7931_v35, %v7806_v4 }
 0xae7   :  { %4484 = vmatpush1.bf16.msra.mxu1 %v6424_v23  ;;  %4527 = vmatpush1.bf16.msra.mxu0 %v6426_v41 }
 0xae8   :  { %4485 = vmatprep.subr.bf16.mxu1 %v6441_v42  ;;  %4528 = vmatprep.subr.bf16.mxu0 %v6443_v43 }
 0xaeb   :  { %4486 = vmatpush1.bf16.msra.mxu1 %v6440_v46  ;;  %4529 = vmatpush1.bf16.msra.mxu0 %v6442_v47 }
 0xaec   :  { %4487 = vmatprep.subr.bf16.mxu1 %v6457_v48  ;;  %4530 = vmatprep.subr.bf16.mxu0 %v6459_v49 }
 0xaef   :  { %4488 = vmatpush1.bf16.msra.mxu1 %v6456_v50  ;;  %4531 = vmatpush1.bf16.msra.mxu0 %v6458_v51 }
 0xaf0   :  { %6808 = vmatprep.subr.bf16.mxu1 %v7249_v52  ;;  %6830 = vmatprep.subr.bf16.mxu0 %v7250_v53 }
 0xaf2   :  { %4506 = vmatmul.mubr.bf16.vlgmr.msra.gmra.mrb[52].mxu1 %v7915_v56  ;;  %4549 = vmatmul.mubr.bf16.vlgmr.msra.gmra.mrb[56].mxu0 %v7915_v56  ;;  %v7264_v56 = vld [vmem:[#allocation10 + $0x498] sm:$0xff]  }
 0xaf3   :  { %6809 = vmatpush3.bf16.msra.mxu1 %v7251_v54  ;;  %6831 = vmatpush3.bf16.msra.mxu0 %v7252_v19 }
 0xaf4   :  { %6810 = vmatprep.subr.bf16.mxu1 %v7253_v55  ;;  %6832 = vmatprep.subr.bf16.mxu0 %v7254_v57 }
 0xaf7   :  { %6811 = vmatpush3.bf16.msra.mxu1 %v7255_v9  ;;  %6833 = vmatpush3.bf16.msra.mxu0 %v7256_v10 }
 0xaf8   :  { %6812 = vmatprep.subr.bf16.mxu1 %v7257_v11  ;;  %6834 = vmatprep.subr.bf16.mxu0 %v7258_v12 }
 0xafb   :  { %6813 = vmatpush3.bf16.msra.mxu1 %v7259_v13  ;;  %6835 = vmatpush3.bf16.msra.mxu0 %v7260_v14 }
 0xafc   :  { %6814 = vmatprep.subr.bf16.mxu1 %v7261_v60  ;;  %6836 = vmatprep.subr.bf16.mxu0 %v7262_v15  ;;  %v7283_v15 = vld [vmem:[#allocation10 + $0x500] sm:$0xff]  }
 0xaff   :  { %6815 = vmatpush3.bf16.msra.mxu1 %v7263_v16  ;;  %6837 = vmatpush3.bf16.msra.mxu0 %v7264_v56  ;;  %v7284_v16 = vld [vmem:[#allocation10 + $0x580] sm:$0xff]   ;;  %v7285_v56 = vld [vmem:[#allocation10 + $0x548] sm:$0xff]  }
 0xb00   :  { %6816 = vmatprep.subr.bf16.mxu1 %v7265_v17  ;;  %6838 = vmatprep.subr.bf16.mxu0 %v7266_v18  ;;  %v7286_v17 = vld [vmem:[#allocation10 + $0x5c8] sm:$0xff]  }
 0xb01   :  { %v7287_v18 = vld [vmem:[#allocation10 + $0x508] sm:$0xff]  }
 0xb03   :  { %6817 = vmatpush3.bf16.msra.mxu1 %v7267_v20  ;;  %6839 = vmatpush3.bf16.msra.mxu0 %v7268_v21  ;;  %v7288_v20 = vld [vmem:[#allocation10 + $0x588] sm:$0xff]   ;;  %v7289_v21 = vld [vmem:[#allocation10 + $0x550] sm:$0xff]  }
 0xb04   :  { %6818 = vmatprep.subr.bf16.mxu1 %v7269_v24  ;;  %6840 = vmatprep.subr.bf16.mxu0 %v7270_v25  ;;  %v7290_v24 = vld [vmem:[#allocation10 + $0x5d0] sm:$0xff]  }
 0xb05   :  { %v7291_v25 = vld [vmem:[#allocation10 + $0x510] sm:$0xff]  }
 0xb07   :  { %6819 = vmatpush3.bf16.msra.mxu1 %v7271_v6  ;;  %6841 = vmatpush3.bf16.msra.mxu0 %v7272_v26  ;;  %v7292_v6 = vld [vmem:[#allocation10 + $0x590] sm:$0xff]   ;;  %v7293_v26 = vld [vmem:[#allocation10 + $0x558] sm:$0xff]  }
 0xb08   :  { %6820 = vmatprep.subr.bf16.mxu1 %v7273_v27  ;;  %6842 = vmatprep.subr.bf16.mxu0 %v7274_v28  ;;  %v7294_v27 = vld [vmem:[#allocation10 + $0x5d8] sm:$0xff]  }
 0xb09   :  { %v7295_v28 = vld [vmem:[#allocation10 + $0x518] sm:$0xff]  }
 0xb0b   :  { %6821 = vmatpush3.bf16.msra.mxu1 %v7275_v29  ;;  %6843 = vmatpush3.bf16.msra.mxu0 %v7276_v1  ;;  %v7296_v29 = vld [vmem:[#allocation10 + $0x598] sm:$0xff]   ;;  %v7297_v1 = vld [vmem:[#allocation10 + $0x560] sm:$0xff]  }
 0xb0c   :  { %6822 = vmatprep.subr.bf16.mxu1 %v7277_v30  ;;  %6844 = vmatprep.subr.bf16.mxu0 %v7278_v63  ;;  %v7298_v30 = vld [vmem:[#allocation10 + $0x5e0] sm:$0xff]  }
 0xb0d   :  { %v7299_v63 = vld [vmem:[#allocation10 + $0x520] sm:$0xff]  }
 0xb0f   :  { %6823 = vmatpush3.bf16.msra.mxu1 %v7279_v31  ;;  %6845 = vmatpush3.bf16.msra.mxu0 %v7280_v33  ;;  %v7300_v31 = vld [vmem:[#allocation10 + $0x5a0] sm:$0xff]   ;;  %v7301_v33 = vld [vmem:[#allocation10 + $0x568] sm:$0xff]  }
 0xb10   :  { %6852 = vmatprep.subr.bf16.mxu1 %v7281_v34  ;;  %6874 = vmatprep.subr.bf16.mxu0 %v7282_v8  ;;  %v7302_v34 = vld [vmem:[#allocation10 + $0x5e8] sm:$0xff]  }
 0xb11   :  { %v7303_v8 = vld [vmem:[#allocation10 + $0x528] sm:$0xff]  }
 0xb65   :  { %v4249_v40 = vpop.f32.mrb[40].mxu1  ;;  %v4292_v23 = vpop.f32.mrb[44].mxu0 }
 0xb66   :  { %v4250_v41 = vadd.f32 %v4249_v40, %v3498_v36  ;;  %v4293_v42 = vadd.f32 %v4292_v23, %v3506_v37  ;;  %v4251_v43 = vpop.f32.mrb[41].mxu1  ;;  %v4294_v44 = vpop.f32.mrb[45].mxu0  ;;  %v7306_v40 = vld [vmem:[#allocation10 + $0x5f0] sm:$0xff]   ;;  %v3518_v23 = vrot.slane %v7931_v35, %v7823_v5 }
 0xb67   :  { %v4252_v45 = vadd.f32 %v4251_v43, %v3502_v38  ;;  %v4295_v22 = vadd.f32 %v4294_v44, %v3510_v39  ;;  %v4253_v2 = vpop.f32.mrb[42].mxu1  ;;  %v4296_v46 = vpop.f32.mrb[46].mxu0  ;;  %v7307_v44 = vld [vmem:[#allocation10 + $0x530] sm:$0xff]  }
 0xb68   :  { %v4254_v47 = vadd.f32 %v4253_v2, %v3498_v36  ;;  %v4297_v48 = vadd.f32 %v4296_v46, %v3506_v37  ;;  %v4255_v49 = vpop.f32.mrb[43].mxu1  ;;  %v4298_v50 = vpop.f32.mrb[47].mxu0  ;;  %v4559_v53 = vmax.f32 %v4250_v41, 0.0  ;;  %v4561_v54 = vmax.f32 %v4293_v42, 0.0  ;;  %v7304_v36 = vld [vmem:[#allocation10 + $0x5a8] sm:$0xff]  }
 0xb69   :  { %v4256_v51 = vadd.f32 %v4255_v49, %v3502_v38  ;;  %v4299_v52 = vadd.f32 %v4298_v50, %v3510_v39  ;;  %v4560_v57 = vmax.f32 %v4252_v45, 0.0  ;;  %v4562_v9 = vmax.f32 %v4295_v22, 0.0  ;;  %v7305_v39 = vld [vmem:[#allocation10 + $0x570] sm:$0xff]   ;;  %v7310_v49 = vld [vmem:[#allocation10 + $0x5f8] sm:$0xff]  }
 0xb6a   :  { %v4575_v19 = vmax.f32 %v4254_v47, 0.0  ;;  %v4577_v55 = vmax.f32 %v4297_v48, 0.0  ;;  %v3514_v37 = vrot.slane %v7931_v35, %v7817_v58  ;;  %v3522_v38 = vrot.slane %v7931_v35, %v7820_v59  ;;  %v7308_v45 = vld [vmem:[#allocation10 + $0x5b0] sm:$0xff]   ;;  %v7309_v48 = vld [vmem:[#allocation10 + $0x578] sm:$0xff]  }
 0xb6b   :  { %v4576_v10 = vmax.f32 %v4256_v51, 0.0  ;;  %v4578_v11 = vmax.f32 %v4299_v52, 0.0  ;;  %v3526_v41 = vrot.slane %v7931_v35, %v7826_v7 }
 0xb6c   :  { %v4591_v12 = vpack.c.bf16 %v4575_v19, %v4559_v53  ;;  %v4593_v13 = vpack.c.bf16 %v4577_v55, %v4561_v54 }
 0xb6d   :  { %v4592_v14 = vpack.c.bf16 %v4576_v10, %v4560_v57  ;;  %v4594_v60 = vpack.c.bf16 %v4578_v11, %v4562_v9  ;;  %v7311_v10 = vld [vmem:[#allocation10 + $0x538] sm:$0xff]  }
 0xb6e   :  { %v7312_v11 = vld [vmem:[#allocation10 + $0x5b8] sm:$0xff]  }
 0xb6f   :  { %5668 = vmatprep.mubr.bf16.mxu1 %v4592_v14  ;;  %5709 = vmatprep.mubr.bf16.mxu0 %v4594_v60 }
 0xb70   :  { %5669 = vmatmul.mubr.bf16.vlgmr.msra.gmra.mrb[56].mxu1 %v4591_v12  ;;  %5710 = vmatmul.mubr.bf16.vlgmr.msra.gmra.mrb[60].mxu0 %v4593_v13 }
 0xb71   :  { %6853 = vmatpush3.bf16.msra.mxu1 %v7283_v15  ;;  %6875 = vmatpush3.bf16.msra.mxu0 %v7284_v16  ;;  %v7313_v15 = vld [vmem:[#allocation10 + $0x640] sm:$0xff]  }
 0xb72   :  { %6854 = vmatprep.subr.bf16.mxu1 %v7285_v56  ;;  %6876 = vmatprep.subr.bf16.mxu0 %v7286_v17  ;;  %v7314_v16 = vld [vmem:[#allocation10 + $0x6c0] sm:$0xff]  }
 0xb75   :  { %6855 = vmatpush3.bf16.msra.mxu1 %v7287_v18  ;;  %6877 = vmatpush3.bf16.msra.mxu0 %v7288_v20 }
 0xb76   :  { %6856 = vmatprep.subr.bf16.mxu1 %v7289_v21  ;;  %6878 = vmatprep.subr.bf16.mxu0 %v7290_v24 }
 0xb79   :  { %6857 = vmatpush3.bf16.msra.mxu1 %v7291_v25  ;;  %6879 = vmatpush3.bf16.msra.mxu0 %v7292_v6 }
 0xb7a   :  { %6858 = vmatprep.subr.bf16.mxu1 %v7293_v26  ;;  %6880 = vmatprep.subr.bf16.mxu0 %v7294_v27  ;;  %v7315_v26 = vld [vmem:[#allocation10 + $0x600] sm:$0xff]  }
 0xb7b   :  { %v7316_v27 = vld [vmem:[#allocation10 + $0x680] sm:$0xff]  }
 0xb7d   :  { %6859 = vmatpush3.bf16.msra.mxu1 %v7295_v28  ;;  %6881 = vmatpush3.bf16.msra.mxu0 %v7296_v29  ;;  %v7317_v28 = vld [vmem:[#allocation10 + $0x648] sm:$0xff]  }
 0xb7e   :  { %6860 = vmatprep.subr.bf16.mxu1 %v7297_v1  ;;  %6882 = vmatprep.subr.bf16.mxu0 %v7298_v30  ;;  %v7318_v29 = vld [vmem:[#allocation10 + $0x6c8] sm:$0xff]  }
 0xb7f   :  { %v7319_v1 = vld [vmem:[#allocation10 + $0x608] sm:$0xff]  }
 0xb80   :  { %v7320_v30 = vld [vmem:[#allocation10 + $0x688] sm:$0xff]  }
 0xb81   :  { %6861 = vmatpush3.bf16.msra.mxu1 %v7299_v63  ;;  %6883 = vmatpush3.bf16.msra.mxu0 %v7300_v31  ;;  %v7321_v63 = vld [vmem:[#allocation10 + $0x650] sm:$0xff]  }
 0xb82   :  { %6862 = vmatprep.subr.bf16.mxu1 %v7301_v33  ;;  %6884 = vmatprep.subr.bf16.mxu0 %v7302_v34  ;;  %v7322_v31 = vld [vmem:[#allocation10 + $0x6d0] sm:$0xff]  }
 0xb83   :  { %v7323_v33 = vld [vmem:[#allocation10 + $0x610] sm:$0xff]  }
 0xb84   :  { %v7324_v34 = vld [vmem:[#allocation10 + $0x690] sm:$0xff]  }
 0xb85   :  { %v4335_v42 = vpop.f32.mrb[44].mxu1  ;;  %v4378_v43 = vpop.f32.mrb[48].mxu0  ;;  %6863 = vmatpush3.bf16.msra.mxu1 %v7303_v8  ;;  %6885 = vmatpush3.bf16.msra.mxu0 %v7304_v36  ;;  %v7325_v8 = vld [vmem:[#allocation10 + $0x658] sm:$0xff]  }
 0xb86   :  { %v4336_v22 = vadd.f32 %v4335_v42, %v3514_v37  ;;  %v4379_v2 = vadd.f32 %v4378_v43, %v3522_v38  ;;  %v4337_v46 = vpop.f32.mrb[45].mxu1  ;;  %v4380_v47 = vpop.f32.mrb[49].mxu0  ;;  %6864 = vmatprep.subr.bf16.mxu1 %v7305_v39  ;;  %6886 = vmatprep.subr.bf16.mxu0 %v7306_v40  ;;  %v7326_v36 = vld [vmem:[#allocation10 + $0x6d8] sm:$0xff]   ;;  %v7329_v39 = vld [vmem:[#allocation10 + $0x660] sm:$0xff]   ;;  %v7333_v42 = vld [vmem:[#allocation10 + $0x668] sm:$0xff]  }
 0xb87   :  { %v4338_v50 = vadd.f32 %v4337_v46, %v3518_v23  ;;  %v4381_v51 = vadd.f32 %v4380_v47, %v3526_v41  ;;  %v4339_v52 = vpop.f32.mrb[46].mxu1  ;;  %v4382_v53 = vpop.f32.mrb[50].mxu0  ;;  %v7330_v40 = vld [vmem:[#allocation10 + $0x6e0] sm:$0xff]   ;;  %v7334_v43 = vld [vmem:[#allocation10 + $0x6e8] sm:$0xff]   ;;  %v7337_v47 = vld [vmem:[#allocation10 + $0x670] sm:$0xff]  }
 0xb88   :  { %v4340_v54 = vadd.f32 %v4339_v52, %v3514_v37  ;;  %v4383_v35 = vadd.f32 %v4382_v53, %v3522_v38  ;;  %v4341_v19 = vpop.f32.mrb[47].mxu1  ;;  %v4384_v55 = vpop.f32.mrb[51].mxu0  ;;  %v4563_v12 = vmax.f32 %v4336_v22, 0.0  ;;  %v4565_v13 = vmax.f32 %v4379_v2, 0.0  ;;  %v7327_v37 = vld [vmem:[#allocation10 + $0x618] sm:$0xff]   ;;  %v7336_v22 = vld [vmem:[#allocation10 + $0x6a8] sm:$0xff]  }
 0xb89   :  { %v4342_v57 = vadd.f32 %v4341_v19, %v3518_v23  ;;  %v4385_v9 = vadd.f32 %v4384_v55, %v3526_v41  ;;  %6865 = vmatpush3.bf16.msra.mxu1 %v7307_v44  ;;  %6887 = vmatpush3.bf16.msra.mxu0 %v7308_v45  ;;  %v4564_v56 = vmax.f32 %v4338_v50, 0.0  ;;  %v4566_v17 = vmax.f32 %v4381_v51, 0.0  ;;  %v7328_v38 = vld [vmem:[#allocation10 + $0x698] sm:$0xff]   ;;  %v7331_v23 = vld [vmem:[#allocation10 + $0x620] sm:$0xff]   ;;  %v7335_v45 = vld [vmem:[#allocation10 + $0x628] sm:$0xff]  }
 0xb8a   :  { %v4579_v14 = vmax.f32 %v4340_v54, 0.0  ;;  %v4581_v60 = vmax.f32 %v4383_v35, 0.0  ;;  %6866 = vmatprep.subr.bf16.mxu1 %v7309_v48  ;;  %6888 = vmatprep.subr.bf16.mxu0 %v7310_v49  ;;  %v7332_v41 = vld [vmem:[#allocation10 + $0x6a0] sm:$0xff]   ;;  %v7949_v44 = vld [vmem:[#allocation12 + $0x11] ss:$2 sm:$0xff] }
 0xb8b   :  { %v4580_v18 = vmax.f32 %v4342_v57, 0.0  ;;  %v4582_v20 = vmax.f32 %v4385_v9, 0.0  ;;  %v3530_v2 = vrot.slane %v7949_v44, %v7795_v61  ;;  %v3538_v46 = vrot.slane %v7949_v44, %v7798_v62  ;;  %v7338_v48 = vld [vmem:[#allocation10 + $0x6f0] sm:$0xff]   ;;  %v7341_v62 = vld [vmem:[#allocation10 + $0x678] sm:$0xff]  }
 0xb8c   :  { %v4595_v21 = vpack.c.bf16 %v4579_v14, %v4563_v12  ;;  %v4597_v24 = vpack.c.bf16 %v4581_v60, %v4565_v13  ;;  %v3534_v49 = vrot.slane %v7949_v44, %v7803_v3  ;;  %v3542_v50 = vrot.slane %v7949_v44, %v7806_v4  ;;  %v7339_v53 = vld [vmem:[#allocation10 + $0x630] sm:$0xff]   ;;  %v7342_v57 = vld [vmem:[#allocation10 + $0x6f8] sm:$0xff]  }
 0xb8d   :  { %v4596_v25 = vpack.c.bf16 %v4580_v18, %v4564_v56  ;;  %v4598_v6 = vpack.c.bf16 %v4582_v20, %v4566_v17  ;;  %6867 = vmatpush3.bf16.msra.mxu1 %v7311_v10  ;;  %6889 = vmatpush3.bf16.msra.mxu0 %v7312_v11  ;;  %v7340_v54 = vld [vmem:[#allocation10 + $0x6b0] sm:$0xff]   ;;  %v7344_v56 = vld [vmem:[#allocation10 + $0x6b8] sm:$0xff]  }
 0xb8e   :  { %6896 = vmatprep.subr.bf16.mxu1 %v7313_v15  ;;  %6918 = vmatprep.subr.bf16.mxu0 %v7314_v16  ;;  %v7343_v16 = vld [vmem:[#allocation10 + $0x638] sm:$0xff]  }
 0xb8f   :  { %5750 = vmatprep.mubr.bf16.mxu1 %v4596_v25  ;;  %5791 = vmatprep.mubr.bf16.mxu0 %v4598_v6  ;;  %v7346_v25 = vld [vmem:[#allocation10 + $0x7c0] sm:$0xff]  }
 0xb90   :  { %5751 = vmatmul.mubr.bf16.vlgmr.msra.gmra.mrb[60].mxu1 %v4595_v21  ;;  %5792 = vmatmul.mubr.bf16.vlgmr.msra.gmra.mrb[64].mxu0 %v4597_v24  ;;  %v7345_v24 = vld [vmem:[#allocation10 + $0x740] sm:$0xff]  }
 0xb91   :  { %6897 = vmatpush3.bf16.msra.mxu1 %v7315_v26  ;;  %6919 = vmatpush3.bf16.msra.mxu0 %v7316_v27 }
 0xb92   :  { %6898 = vmatprep.subr.bf16.mxu1 %v7317_v28  ;;  %6920 = vmatprep.subr.bf16.mxu0 %v7318_v29 }
 0xb95   :  { %6899 = vmatpush3.bf16.msra.mxu1 %v7319_v1  ;;  %6921 = vmatpush3.bf16.msra.mxu0 %v7320_v30 }
 0xb96   :  { %6900 = vmatprep.subr.bf16.mxu1 %v7321_v63  ;;  %6922 = vmatprep.subr.bf16.mxu0 %v7322_v31  ;;  %v7347_v31 = vld [vmem:[#allocation10 + $0x700] sm:$0xff]  }
 0xb99   :  { %6901 = vmatpush3.bf16.msra.mxu1 %v7323_v33  ;;  %6923 = vmatpush3.bf16.msra.mxu0 %v7324_v34  ;;  %v7348_v33 = vld [vmem:[#allocation10 + $0x780] sm:$0xff]   ;;  %v7349_v34 = vld [vmem:[#allocation10 + $0x748] sm:$0xff]  }
 0xb9a   :  { %6902 = vmatprep.subr.bf16.mxu1 %v7325_v8  ;;  %6924 = vmatprep.subr.bf16.mxu0 %v7326_v36  ;;  %v7350_v8 = vld [vmem:[#allocation10 + $0x7c8] sm:$0xff]  }
 0xb9b   :  { %v7351_v36 = vld [vmem:[#allocation10 + $0x708] sm:$0xff]  }
 0xb9d   :  { %6903 = vmatpush3.bf16.msra.mxu1 %v7327_v37  ;;  %6925 = vmatpush3.bf16.msra.mxu0 %v7328_v38  ;;  %v7352_v37 = vld [vmem:[#allocation10 + $0x788] sm:$0xff]   ;;  %v7353_v38 = vld [vmem:[#allocation10 + $0x750] sm:$0xff]  }
 0xb9e   :  { %6904 = vmatprep.subr.bf16.mxu1 %v7329_v39  ;;  %6926 = vmatprep.subr.bf16.mxu0 %v7330_v40  ;;  %v7354_v39 = vld [vmem:[#allocation10 + $0x7d0] sm:$0xff]  }
 0xb9f   :  { %v7355_v40 = vld [vmem:[#allocation10 + $0x710] sm:$0xff]  }
 0xba1   :  { %6905 = vmatpush3.bf16.msra.mxu1 %v7331_v23  ;;  %6927 = vmatpush3.bf16.msra.mxu0 %v7332_v41  ;;  %v7356_v23 = vld [vmem:[#allocation10 + $0x790] sm:$0xff]   ;;  %v7357_v41 = vld [vmem:[#allocation10 + $0x758] sm:$0xff]  }
 0xba2   :  { %6906 = vmatprep.subr.bf16.mxu1 %v7333_v42  ;;  %6928 = vmatprep.subr.bf16.mxu0 %v7334_v43  ;;  %v7358_v42 = vld [vmem:[#allocation10 + $0x7d8] sm:$0xff]  }
 0xba3   :  { %v7359_v43 = vld [vmem:[#allocation10 + $0x718] sm:$0xff]  }
 0xba5   :  { %v4421_v51 = vpop.f32.mrb[48].mxu1  ;;  %v4464_v52 = vpop.f32.mrb[52].mxu0  ;;  %6907 = vmatpush3.bf16.msra.mxu1 %v7335_v45  ;;  %6929 = vmatpush3.bf16.msra.mxu0 %v7336_v22  ;;  %v7360_v45 = vld [vmem:[#allocation10 + $0x798] sm:$0xff]   ;;  %v7361_v22 = vld [vmem:[#allocation10 + $0x760] sm:$0xff]  }
 0xba6   :  { %v4422_v35 = vadd.f32 %v4421_v51, %v3530_v2  ;;  %v4465_v19 = vadd.f32 %v4464_v52, %v3538_v46  ;;  %v4423_v61 = vpop.f32.mrb[49].mxu1  ;;  %v4466_v55 = vpop.f32.mrb[53].mxu0  ;;  %6908 = vmatprep.subr.bf16.mxu1 %v7337_v47  ;;  %6930 = vmatprep.subr.bf16.mxu0 %v7338_v48  ;;  %v7364_v47 = vld [vmem:[#allocation10 + $0x7a0] sm:$0xff]   ;;  %v7365_v48 = vld [vmem:[#allocation10 + $0x768] sm:$0xff]   ;;  %v3546_v52 = vrot.slane %v7949_v44, %v7817_v58 }
 0xba7   :  { %v4424_v9 = vadd.f32 %v4423_v61, %v3534_v49  ;;  %v4467_v10 = vadd.f32 %v4466_v55, %v3542_v50  ;;  %v4425_v3 = vpop.f32.mrb[50].mxu1  ;;  %v4468_v11 = vpop.f32.mrb[54].mxu0  ;;  %v7368_v51 = vld [vmem:[#allocation10 + $0x7a8] sm:$0xff]   ;;  %v3558_v61 = vrot.slane %v7949_v44, %v7826_v7 }
 0xba8   :  { %v4426_v12 = vadd.f32 %v4425_v3, %v3530_v2  ;;  %v4469_v4 = vadd.f32 %v4468_v11, %v3538_v46  ;;  %v4427_v13 = vpop.f32.mrb[51].mxu1  ;;  %v4470_v14 = vpop.f32.mrb[55].mxu0  ;;  %v4567_v17 = vmax.f32 %v4422_v35, 0.0  ;;  %v4569_v18 = vmax.f32 %v4465_v19, 0.0  ;;  %v7362_v2 = vld [vmem:[#allocation10 + $0x7e0] sm:$0xff]   ;;  %v7370_v35 = vld [vmem:[#allocation10 + $0x7f0] sm:$0xff]  }
 0xba9   :  { %v4428_v60 = vadd.f32 %v4427_v13, %v3534_v49  ;;  %v4471_v15 = vadd.f32 %v4470_v14, %v3542_v50  ;;  %6909 = vmatpush3.bf16.msra.mxu1 %v7339_v53  ;;  %6931 = vmatpush3.bf16.msra.mxu0 %v7340_v54  ;;  %v4568_v6 = vmax.f32 %v4424_v9, 0.0  ;;  %v4570_v26 = vmax.f32 %v4467_v10, 0.0  ;;  %v7363_v46 = vld [vmem:[#allocation10 + $0x720] sm:$0xff]   ;;  %v7366_v49 = vld [vmem:[#allocation10 + $0x7e8] sm:$0xff]   ;;  %v7369_v54 = vld [vmem:[#allocation10 + $0x770] sm:$0xff]  }
 0xbaa   :  { %v4583_v20 = vmax.f32 %v4426_v12, 0.0  ;;  %v4585_v21 = vmax.f32 %v4469_v4, 0.0  ;;  %6910 = vmatprep.subr.bf16.mxu1 %v7341_v62  ;;  %6932 = vmatprep.subr.bf16.mxu0 %v7342_v57  ;;  %v7367_v50 = vld [vmem:[#allocation10 + $0x728] sm:$0xff]   ;;  %v3554_v53 = vrot.slane %v7949_v44, %v7820_v59  ;;  %v3550_v19 = vrot.slane %v7949_v44, %v7823_v5  ;;  %v7371_v57 = vld [vmem:[#allocation10 + $0x730] sm:$0xff]   ;;  %v7373_v59 = vld [vmem:[#allocation10 + $0x778] sm:$0xff]  }
 0xbab   :  { %v4584_v27 = vmax.f32 %v4428_v60, 0.0  ;;  %v4586_v28 = vmax.f32 %v4471_v15, 0.0  ;;  %v7372_v9 = vld [vmem:[#allocation10 + $0x7b0] sm:$0xff]   ;;  %v7374_v12 = vld [vmem:[#allocation10 + $0x7f8] sm:$0xff]  }
 0xbac   :  { %v4599_v29 = vpack.c.bf16 %v4583_v20, %v4567_v17  ;;  %v4601_v1 = vpack.c.bf16 %v4585_v21, %v4569_v18  ;;  %v7375_v17 = vld [vmem:[#allocation10 + $0x738] sm:$0xff]  }
 0xbad   :  { %v4600_v30 = vpack.c.bf16 %v4584_v27, %v4568_v6  ;;  %v4602_v63 = vpack.c.bf16 %v4586_v28, %v4570_v26  ;;  %6911 = vmatpush3.bf16.msra.mxu1 %v7343_v16  ;;  %6933 = vmatpush3.bf16.msra.mxu0 %v7344_v56  ;;  %v7376_v18 = vld [vmem:[#allocation10 + $0x7b8] sm:$0xff]  }
 0xbae   :  { %6940 = vmatprep.subr.bf16.mxu1 %v7345_v24  ;;  %6962 = vmatprep.subr.bf16.mxu0 %v7346_v25 }
 0xbaf   :  { %5832 = vmatprep.mubr.bf16.mxu1 %v4600_v30  ;;  %5873 = vmatprep.mubr.bf16.mxu0 %v4602_v63 }
 0xbb0   :  { %5833 = vmatmul.mubr.bf16.vlgmr.msra.gmra.mrb[64].mxu1 %v4599_v29  ;;  %5874 = vmatmul.mubr.bf16.vlgmr.msra.gmra.mrb[68].mxu0 %v4601_v1 }
 0xbb1   :  { %6941 = vmatpush3.bf16.msra.mxu1 %v7347_v31  ;;  %6963 = vmatpush3.bf16.msra.mxu0 %v7348_v33 }
 0xbb2   :  { %6942 = vmatprep.subr.bf16.mxu1 %v7349_v34  ;;  %6964 = vmatprep.subr.bf16.mxu0 %v7350_v8  ;;  %v6460_v34 = vld [vmem:[%s7997_s7 + $0xc] ss:$0 sm:$0xff] }
 0xbb5   :  { %6943 = vmatpush3.bf16.msra.mxu1 %v7351_v36  ;;  %6965 = vmatpush3.bf16.msra.mxu0 %v7352_v37 }
 0xbb6   :  { %6944 = vmatprep.subr.bf16.mxu1 %v7353_v38  ;;  %6966 = vmatprep.subr.bf16.mxu0 %v7354_v39 }
 0xbb9   :  { %6945 = vmatpush3.bf16.msra.mxu1 %v7355_v40  ;;  %6967 = vmatpush3.bf16.msra.mxu0 %v7356_v23 }
 0xbba   :  { %6946 = vmatprep.subr.bf16.mxu1 %v7357_v41  ;;  %6968 = vmatprep.subr.bf16.mxu0 %v7358_v42 }
 0xbbd   :  { %6947 = vmatpush3.bf16.msra.mxu1 %v7359_v43  ;;  %6969 = vmatpush3.bf16.msra.mxu0 %v7360_v45 }
 0xbbe   :  { %6948 = vmatprep.subr.bf16.mxu1 %v7361_v22  ;;  %6970 = vmatprep.subr.bf16.mxu0 %v7362_v2 }
 0xbc1   :  { %6949 = vmatpush3.bf16.msra.mxu1 %v7363_v46  ;;  %6971 = vmatpush3.bf16.msra.mxu0 %v7364_v47 }
 0xbc2   :  { %6950 = vmatprep.subr.bf16.mxu1 %v7365_v48  ;;  %6972 = vmatprep.subr.bf16.mxu0 %v7366_v49 }
 0xbc5   :  { %v4507_v55 = vpop.f32.mrb[52].mxu1  ;;  %v4550_v62 = vpop.f32.mrb[56].mxu0  ;;  %6951 = vmatpush3.bf16.msra.mxu1 %v7367_v50  ;;  %6973 = vmatpush3.bf16.msra.mxu0 %v7368_v51 }
 0xbc6   :  { %v4508_v10 = vadd.f32 %v4507_v55, %v3546_v52  ;;  %v4551_v3 = vadd.f32 %v4550_v62, %v3554_v53  ;;  %v4509_v58 = vpop.f32.mrb[53].mxu1  ;;  %v4552_v11 = vpop.f32.mrb[57].mxu0  ;;  %6952 = vmatprep.subr.bf16.mxu1 %v7369_v54  ;;  %6974 = vmatprep.subr.bf16.mxu0 %v7370_v35 }
 0xbc7   :  { %v4510_v4 = vadd.f32 %v4509_v58, %v3550_v19  ;;  %v4553_v13 = vadd.f32 %v4552_v11, %v3558_v61  ;;  %v4511_v5 = vpop.f32.mrb[54].mxu1  ;;  %v4554_v14 = vpop.f32.mrb[58].mxu0 }
 0xbc8   :  { %v4512_v60 = vadd.f32 %v4511_v5, %v3546_v52  ;;  %v4555_v7 = vadd.f32 %v4554_v14, %v3554_v53  ;;  %v4513_v44 = vpop.f32.mrb[55].mxu1  ;;  %v4556_v15 = vpop.f32.mrb[59].mxu0  ;;  %v4571_v20 = vmax.f32 %v4508_v10, 0.0  ;;  %v4573_v21 = vmax.f32 %v4551_v3, 0.0 }
 0xbc9   :  { %v4514_v16 = vadd.f32 %v4513_v44, %v3550_v19  ;;  %v4557_v56 = vadd.f32 %v4556_v15, %v3558_v61  ;;  %6953 = vmatpush3.bf16.msra.mxu1 %v7371_v57  ;;  %6975 = vmatpush3.bf16.msra.mxu0 %v7372_v9  ;;  %v4572_v6 = vmax.f32 %v4510_v4, 0.0  ;;  %v4574_v26 = vmax.f32 %v4553_v13, 0.0 }
 0xbca   :  { %v4587_v24 = vmax.f32 %v4512_v60, 0.0  ;;  %v4589_v25 = vmax.f32 %v4555_v7, 0.0  ;;  %6954 = vmatprep.subr.bf16.mxu1 %v7373_v59  ;;  %6976 = vmatprep.subr.bf16.mxu0 %v7374_v12 }
 0xbcb   :  { %v4588_v27 = vmax.f32 %v4514_v16, 0.0  ;;  %v4590_v28 = vmax.f32 %v4557_v56, 0.0 }
 0xbcc   :  { %v4603_v29 = vpack.c.bf16 %v4587_v24, %v4571_v20  ;;  %v4605_v1 = vpack.c.bf16 %v4589_v25, %v4573_v21 }
 0xbcd   :  { %v4604_v30 = vpack.c.bf16 %v4588_v27, %v4572_v6  ;;  %v4606_v63 = vpack.c.bf16 %v4590_v28, %v4574_v26  ;;  %6955 = vmatpush3.bf16.msra.mxu1 %v7375_v17  ;;  %6977 = vmatpush3.bf16.msra.mxu0 %v7376_v18 }
 0xbcf   :  { %5914 = vmatprep.mubr.bf16.mxu1 %v4604_v30  ;;  %5955 = vmatprep.mubr.bf16.mxu0 %v4606_v63 }
 0xbd0   :  { %5915 = vmatmul.mubr.bf16.vlgmr.msra.gmra.mrb[68].mxu1 %v4603_v29  ;;  %5956 = vmatmul.mubr.bf16.vlgmr.msra.gmra.mrb[72].mxu0 %v4605_v1 }
 0xc43   :  { %v6824_v31 = vpop.f32.mrb[56].mxu1  ;;  %v6846_v33 = vpop.f32.mrb[60].mxu0 }
 0xc44   :  { %v6825_v8 = vpop.f32.mrb[57].mxu1  ;;  %v6847_v36 = vpop.f32.mrb[61].mxu0 }
 0xc45   :  { %v6826_v37 = vadd.f32 %v6825_v8, %v6824_v31  ;;  %v6848_v38 = vadd.f32 %v6847_v36, %v6846_v33  ;;  %v6827_v39 = vpop.f32.mrb[58].mxu1  ;;  %v6849_v40 = vpop.f32.mrb[62].mxu0 }
 0xc46   :  { %v6828_v23 = vpop.f32.mrb[59].mxu1  ;;  %v6850_v41 = vpop.f32.mrb[63].mxu0 }
 0xc47   :  { %v5671_v42 = vadd.f32 %v6826_v37, %v6460_v34  ;;  %v6829_v43 = vadd.f32 %v6828_v23, %v6827_v39  ;;  %v6851_v45 = vadd.f32 %v6850_v41, %v6849_v40 }
 0xc49   :  { %v5712_v22 = vadd.f32 %v6848_v38, %v5671_v42  ;;  %v5674_v2 = vadd.f32 %v6829_v43, %v6460_v34 }
 0xc4b   :  { %v5715_v46 = vadd.f32 %v6851_v45, %v5674_v2 }
 0xc63   :  { %v6868_v47 = vpop.f32.mrb[60].mxu1  ;;  %v6890_v48 = vpop.f32.mrb[64].mxu0 }
 0xc64   :  { %v6869_v49 = vpop.f32.mrb[61].mxu1  ;;  %v6891_v50 = vpop.f32.mrb[65].mxu0 }
 0xc65   :  { %v6870_v51 = vadd.f32 %v6869_v49, %v6868_v47  ;;  %v6892_v52 = vadd.f32 %v6891_v50, %v6890_v48  ;;  %v6871_v53 = vpop.f32.mrb[62].mxu1  ;;  %v6893_v54 = vpop.f32.mrb[66].mxu0  ;;  %v6589_v48 = vld [vmem:[%s7997_s7 + $0xd] ss:$0 sm:$0xff] }
 0xc66   :  { %v6872_v35 = vpop.f32.mrb[63].mxu1  ;;  %v6894_v19 = vpop.f32.mrb[67].mxu0 }
 0xc67   :  { %v5753_v61 = vadd.f32 %v6870_v51, %v5712_v22  ;;  %v6873_v55 = vadd.f32 %v6872_v35, %v6871_v53  ;;  %v6895_v62 = vadd.f32 %v6894_v19, %v6893_v54  ;;  %v6590_v51 = vld [vmem:[%s7997_s7 + $0xe] ss:$0 sm:$0xff]  ;;  %v6591_v54 = vld [vmem:[%s7997_s7 + $0xf] ss:$0 sm:$0xff] }
 0xc69   :  { %v5794_v57 = vadd.f32 %v6892_v52, %v5753_v61  ;;  %v5756_v9 = vadd.f32 %v6873_v55, %v5715_v46 }
 0xc6b   :  { %v5797_v10 = vadd.f32 %v6895_v62, %v5756_v9 }
 0xc83   :  { %v6912_v3 = vpop.f32.mrb[64].mxu1  ;;  %v6934_v58 = vpop.f32.mrb[68].mxu0 }
 0xc84   :  { %v6913_v11 = vpop.f32.mrb[65].mxu1  ;;  %v6935_v59 = vpop.f32.mrb[69].mxu0 }
 0xc85   :  { %v6914_v12 = vadd.f32 %v6913_v11, %v6912_v3  ;;  %v6936_v4 = vadd.f32 %v6935_v59, %v6934_v58  ;;  %v6915_v13 = vpop.f32.mrb[66].mxu1  ;;  %v6937_v5 = vpop.f32.mrb[70].mxu0 }
 0xc86   :  { %v6916_v14 = vpop.f32.mrb[67].mxu1  ;;  %v6938_v60 = vpop.f32.mrb[71].mxu0 }
 0xc87   :  { %v5835_v7 = vadd.f32 %v6914_v12, %v5794_v57  ;;  %v6917_v44 = vadd.f32 %v6916_v14, %v6915_v13  ;;  %v6939_v15 = vadd.f32 %v6938_v60, %v6937_v5  ;;  %v6592_v57 = vld [vmem:[%s7997_s7 + $0x10] ss:$0 sm:$0xff] }
 0xc89   :  { %v5876_v16 = vadd.f32 %v6936_v4, %v5835_v7  ;;  %v5838_v56 = vadd.f32 %v6917_v44, %v5797_v10 }
 0xc8b   :  { %v5879_v17 = vadd.f32 %v6939_v15, %v5838_v56 }
 0xca3   :  { %v6956_v18 = vpop.f32.mrb[68].mxu1  ;;  %v6978_v20 = vpop.f32.mrb[72].mxu0 }
 0xca4   :  { %v6957_v21 = vpop.f32.mrb[69].mxu1  ;;  %v6979_v24 = vpop.f32.mrb[73].mxu0 }
 0xca5   :  { %v6958_v25 = vadd.f32 %v6957_v21, %v6956_v18  ;;  %v6980_v6 = vadd.f32 %v6979_v24, %v6978_v20  ;;  %v6959_v26 = vpop.f32.mrb[70].mxu1  ;;  %v6981_v27 = vpop.f32.mrb[74].mxu0 }
 0xca6   :  { %v6960_v28 = vpop.f32.mrb[71].mxu1  ;;  %v6982_v29 = vpop.f32.mrb[75].mxu0 }
 0xca7   :  { %v5917_v1 = vadd.f32 %v6958_v25, %v5876_v16  ;;  %v6961_v30 = vadd.f32 %v6960_v28, %v6959_v26  ;;  %v6983_v63 = vadd.f32 %v6982_v29, %v6981_v27 }
 0xca9   :  { %v5958_v31 = vadd.f32 %v6980_v6, %v5917_v1  ;;  %v5920_v33 = vadd.f32 %v6961_v30, %v5879_v17 }
 0xcab   :  { %v5961_v34 = vadd.f32 %v6983_v63, %v5920_v33  ;;  %v5964_v8 = vadd.f32 %v5958_v31, %v7909_v32 }
 0xcad   :  { %5966 = vadd.xlane.f32.xlu0 %v5964_v8  ;;  %v5965_v36 = vadd.f32 %v5961_v34, %v7911_v0 }
 0xcaf   :  { %5968 = vadd.xlane.f32.xlu1 %v5965_v36 }
 0xd3a   :  { %v5967_v37 = vpop.xlane.xlu0 %5966 }
 0xd3b   :  { %v5970_v38 = vmul.f32 0.0078125, %v5967_v37 }
 0xd3c   :  { %v5969_v39 = vpop.xlane.xlu1 %5968 }
 0xd3d   :  { %v5972_v40 = vsub.f32 %v5964_v8, %v5970_v38  ;;  %v5971_v23 = vmul.f32 0.0078125, %v5969_v39 }
 0xd3f   :  { %v5973_v41 = vsub.f32 %v5965_v36, %v5971_v23  ;;  %v5974_v42 = vmul.f32 %v5972_v40, %v5972_v40 }
 0xd41   :  { %5976 = vadd.xlane.f32.xlu0 %v5974_v42  ;;  %v5975_v43 = vmul.f32 %v5973_v41, %v5973_v41 }
 0xd43   :  { %5978 = vadd.xlane.f32.xlu1 %v5975_v43 }
 0xdce   :  { %v5977_v45 = vpop.xlane.xlu0 %5976 }
 0xdcf   :  { %v5980_v22 = vmul.f32 0.0078125, %v5977_v45 }
 0xdd0   :  { %v5979_v2 = vpop.xlane.xlu1 %5978 }
 0xdd1   :  { %v5982_v46 = vadd.f32 1e-05, %v5980_v22  ;;  %v5981_v47 = vmul.f32 0.0078125, %v5979_v2 }
 0xdd3   :  { %7389 = vrsqrt.f32 %v5982_v46  ;;  %v5983_v32 = vadd.f32 1e-05, %v5981_v47 }
 0xdd5   :  { %7391 = vrsqrt.f32 %v5983_v32 }
 0xddd   :  { %v7390_v0 = vpop.eup %7389 }
 0xdde   :  { %v5986_v49 = vmul.f32 %v7390_v0, %v5972_v40 }
 0xddf   :  { %v7392_v50 = vpop.eup %7391 }
 0xde0   :  { %v5992_v52 = vmul.f32 %v6589_v48, %v5986_v49  ;;  %v5987_v53 = vmul.f32 %v7392_v50, %v5973_v41 }
 0xde2   :  { %v5998_v35 = vadd.f32 %v6590_v51, %v5992_v52  ;;  %v5993_v19 = vmul.f32 %v6589_v48, %v5987_v53 }
 0xde4   :  { %v6006_v61 = vmul.f32 %v6591_v54, %v5998_v35  ;;  %v5999_v55 = vadd.f32 %v6590_v51, %v5993_v19 }
 0xde6   :  { %6008 = vadd.xlane.f32.xlu0 %v6006_v61  ;;  %v6007_v62 = vmul.f32 %v6591_v54, %v5999_v55 }
 0xde8   :  { %6010 = vadd.xlane.f32.xlu1 %v6007_v62 }
 0xe73   :  { %v6009_v9 = vpop.xlane.xlu0 %6008 }
 0xe74   :  { %v6016_v10 = vadd.f32 %v6592_v57, %v6009_v9 }
 0xe75   :  { %v6011_v3 = vpop.xlane.xlu1 %6010 }
 0xe76   :  { %6019 = vst.msk [vmem:[%s7998_s8] sm:$0xff] %vm6018_vm2, %v6016_v10  ;;  %v6017_v58 = vadd.f32 %v6592_v57, %v6011_v3 }
 0xe78   :  { %6020 = vst.msk [vmem:[%s7998_s8 + $0x8] sm:$0xff] %vm6018_vm2, %v6017_v58 }
 0xe79   :  { %6025 = vsyncpa [#allocation3], 1 }
 0xe7a   :  { %6026 = vsyncpa [#allocation5], 1 }
 0xe7b   :  { %6027 = vsyncpa [#allocation8], 1 }
 0xe7c   :  { %6028 = vsyncpa [#allocation11], 1 }

</bundles_post_ra>
